<compile_context>
chip_gen: v5e
topology: v5e:2x2
jax: 0.10.0
libtpu: 0.0.40
codegen_flags: <defaults>
</compile_context>

<pallas_src>
import math

import jax
import jax.numpy as jnp
from jax.experimental import pallas as pl
from jax.experimental.pallas import tpu as pltpu

# ----------------------------- small config ---------------------------------
B, L, NOBJ = 2, 8, 4
HIDDEN, NHEADS = 32, 4
HEAD_DIM = HIDDEN // NHEADS
INTER = 64
VOCAB, MAXPOS, NTYPE = 100, 64, 2
VFEAT_DIM, VPOS_DIM = 16, 4
LLAYERS, RLAYERS, XLAYERS = 1, 1, 1
EPS = 1e-12

_INV_SQRT2 = 1.0 / math.sqrt(2.0)
_ATT_SCALE = 1.0 / math.sqrt(HEAD_DIM)   # folded into Q projection weights at init


# --------------------- static weight-slab packing layout ---------------------
class _Slab:
    """name -> (offset, width) registry along one packed axis.  Shared by the
    init-time packing and the kernel's static slicing (so offsets always agree)."""

    def __init__(self):
        self._off = {}
        self.size = 0

    def add(self, name, width=1):
        self._off[name] = (self.size, width)
        self.size += width

    def sl(self, name):
        off, width = self._off[name]
        return slice(off, off + width)


def _build_layouts():
    wh, wi, vh, vi = _Slab(), _Slab(), _Slab(), _Slab()

    # frontend (embedding LN + visual feature encoder) vectors
    for n in ("emb_ln_g", "emb_ln_b", "visn_fc_b", "visn_ln_g", "visn_ln_b",
              "box_fc_b", "box_ln_g", "box_ln_b"):
        vh.add(n)

    def self_att(p):
        wh.add(f"{p}_qkv", 3 * HIDDEN)        # fused Q|K|V projection
        wh.add(f"{p}_out", HIDDEN)
        for n in ("q_b", "k_b", "v_b", "out_b", "ln_g", "ln_b"):
            vh.add(f"{p}_{n}")

    def cross_att(p):
        wh.add(f"{p}_q", HIDDEN)
        wh.add(f"{p}_kv", 2 * HIDDEN)         # fused K|V projection (context modality)
        wh.add(f"{p}_out", HIDDEN)
        for n in ("q_b", "k_b", "v_b", "out_b", "ln_g", "ln_b"):
            vh.add(f"{p}_{n}")

    def ffn(p):
        wh.add(f"{p}_inter", INTER)
        wi.add(f"{p}_ffnout", HIDDEN)
        vi.add(f"{p}_inter_b")
        for n in ("ffnout_b", "ffnln_g", "ffnln_b"):
            vh.add(f"{p}_{n}")

    for i in range(LLAYERS):
        self_att(f"l{i}_att"); ffn(f"l{i}")
    for i in range(RLAYERS):
        self_att(f"r{i}_att"); ffn(f"r{i}")
    for i in range(XLAYERS):
        cross_att(f"x{i}_xatt")
        self_att(f"x{i}_lself")
        self_att(f"x{i}_vself")
        ffn(f"x{i}_lang")
        ffn(f"x{i}_visn")
    wh.add("pool", HIDDEN)
    vh.add("pool_b")
    return wh, wi, vh, vi


WH, WI, VECH, VECI = _build_layouts()


# ------------------------------ fused kernel ---------------------------------
def _lxrt_kernel(emb_ref, vfeat_ref, vbox_ref, lmask_ref, vmask_ref,
                 wH_ref, wI_ref, wF_ref, wB_ref, vecH_ref, vecI_ref,
                 pooled_ref):
    """Whole LXRT forward for one batch element, all stages resident in VMEM."""

    # --- static-slice accessors into the packed weight slabs (cheap VMEM loads) ---
    def wh(name):   # [HIDDEN, width]
        return wH_ref[:, WH.sl(name)]

    def wi(name):   # [INTER, width]
        return wI_ref[:, WI.sl(name)]

    def vh(name):   # [1, HIDDEN]
        return vecH_ref[VECH.sl(name), :]

    def vi(name):   # [1, INTER]
        return vecI_ref[VECI.sl(name), :]

    # ------------------------------ math helpers ------------------------------
    def dense(x, w, b):
        return jnp.dot(x, w, preferred_element_type=jnp.float32) + b

    def layer_norm(x, g, b):
        mean = jnp.mean(x, axis=-1, keepdims=True)
        var = jnp.mean(jnp.square(x - mean), axis=-1, keepdims=True)
        return (x - mean) * jax.lax.rsqrt(var + EPS) * g + b

    def gelu(x):  # exact BERT gelu
        return 0.5 * x * (1.0 + jax.lax.erf(x * _INV_SQRT2))

    def mha(q, k, v, mask_add, p):
        """Multi-head attention + fused output projection.
        The 1/sqrt(head_dim) scale is pre-folded into the Q projection weights.
        Per-head static lane slices + 2-D matmuls only (no in-kernel transposes)."""
        out_w = wh(f"{p}_out")                                    # [H, H]
        acc = None
        for h in range(NHEADS):
            sl = slice(h * HEAD_DIM, (h + 1) * HEAD_DIM)
            s = jax.lax.dot_general(q[:, sl], k[:, sl], (((1,), (1,)), ((), ())),
                                    preferred_element_type=jnp.float32)
            s = s + mask_add
            s = s - jnp.max(s, axis=-1, keepdims=True)
            prob = jnp.exp(s)
            prob = prob / jnp.sum(prob, axis=-1, keepdims=True)   # exact softmax
            ctx = jnp.dot(prob, v[:, sl], preferred_element_type=jnp.float32)
            contrib = jnp.dot(ctx, out_w[sl, :], preferred_element_type=jnp.float32)
            acc = contrib if acc is None else acc + contrib
        return acc + vh(f"{p}_out_b")

    def self_att_block(x, mask_add, p):
        qkv = jnp.dot(x, wh(f"{p}_qkv"), preferred_element_type=jnp.float32)   # [S, 3H]
        q = qkv[:, 0:HIDDEN] + vh(f"{p}_q_b")
        k = qkv[:, HIDDEN:2 * HIDDEN] + vh(f"{p}_k_b")
        v = qkv[:, 2 * HIDDEN:3 * HIDDEN] + vh(f"{p}_v_b")
        att = mha(q, k, v, mask_add, p)
        return layer_norm(x + att, vh(f"{p}_ln_g"), vh(f"{p}_ln_b"))   # residual fused in LN

    def cross_att_block(x, ctx_in, ctx_mask, p):
        q = dense(x, wh(f"{p}_q"), vh(f"{p}_q_b"))
        kv = jnp.dot(ctx_in, wh(f"{p}_kv"), preferred_element_type=jnp.float32)  # [Sk, 2H]
        k = kv[:, 0:HIDDEN] + vh(f"{p}_k_b")
        v = kv[:, HIDDEN:2 * HIDDEN] + vh(f"{p}_v_b")
        att = mha(q, k, v, ctx_mask, p)
        return layer_norm(x + att, vh(f"{p}_ln_g"), vh(f"{p}_ln_b"))

    def ffn_block(x, p):
        h = gelu(dense(x, wh(f"{p}_inter"), vi(f"{p}_inter_b")))
        y = dense(h, wi(f"{p}_ffnout"), vh(f"{p}_ffnout_b"))
        return layer_norm(x + y, vh(f"{p}_ffnln_g"), vh(f"{p}_ffnln_b"))

    # ------------------------------- frontend ----------------------------------
    lang = layer_norm(emb_ref[0], vh("emb_ln_g"), vh("emb_ln_b"))               # [L, H]
    vf = layer_norm(dense(vfeat_ref[0], wF_ref[...], vh("visn_fc_b")),
                    vh("visn_ln_g"), vh("visn_ln_b"))
    bx = layer_norm(dense(vbox_ref[0], wB_ref[...], vh("box_fc_b")),
                    vh("box_ln_g"), vh("box_ln_b"))
    visn = (vf + bx) * 0.5                                                      # [NOBJ, H]

    lmask = lmask_ref[0]                                                        # [1, L]
    vmask = vmask_ref[0]                                                        # [1, NOBJ]

    # ------------------------ single-modality encoders --------------------------
    for i in range(LLAYERS):
        lang = ffn_block(self_att_block(lang, lmask, f"l{i}_att"), f"l{i}")
    for i in range(RLAYERS):
        visn = ffn_block(self_att_block(visn, vmask, f"r{i}_att"), f"r{i}")

    # ------------------------- cross-modality encoder ---------------------------
    for i in range(XLAYERS):
        # shared cross-attention module, both directions, applied to the ORIGINAL inputs
        lang_x = cross_att_block(lang, visn, vmask, f"x{i}_xatt")
        visn_x = cross_att_block(visn, lang, lmask, f"x{i}_xatt")
        # per-modality self attention
        lang = self_att_block(lang_x, lmask, f"x{i}_lself")
        visn = self_att_block(visn_x, vmask, f"x{i}_vself")
        # per-modality FFN
        lang = ffn_block(lang, f"x{i}_lang")
        visn = ffn_block(visn, f"x{i}_visn")

    # --------------------------- pooler (mode 'x') -------------------------------
    pooled = jnp.tanh(dense(lang[0:1, :], wh("pool"), vh("pool_b")))
    pooled_ref[0] = pooled.astype(pooled_ref.dtype)


# ----------------------------- parameters ------------------------------------
def init_params(seed=0):
    keys = iter(jax.random.split(jax.random.PRNGKey(seed), 256))

    def rnd(shape):
        return (jax.random.normal(next(keys), shape) * 0.02).astype(jnp.float32)

    p = {}
    # embedding tables (the gathers stay in XLA glue — no Pallas win at these sizes)
    p["word_emb"] = rnd((VOCAB, HIDDEN))
    p["pos_emb"] = rnd((MAXPOS, HIDDEN))
    p["type_emb"] = rnd((NTYPE, HIDDEN))

    # packed slabs (biases default to zero; LN gammas set to one below)
    wH = jnp.zeros((HIDDEN, WH.size), jnp.float32)
    wI = jnp.zeros((INTER, WI.size), jnp.float32)
    vH = jnp.zeros((VECH.size, HIDDEN), jnp.float32)
    vI = jnp.zeros((VECI.size, INTER), jnp.float32)

    def set_gamma(name):
        nonlocal vH
        vH = vH.at[VECH.sl(name), :].set(1.0)

    def pack_self_att(pre):
        nonlocal wH
        qkv = rnd((HIDDEN, 3 * HIDDEN))
        # fold 1/sqrt(head_dim) into the Q projection (q bias is zero, so the
        # packed q_b row equals the scaled bias too — exact)
        qkv = qkv.at[:, 0:HIDDEN].multiply(_ATT_SCALE)
        wH = wH.at[:, WH.sl(f"{pre}_qkv")].set(qkv)
        wH = wH.at[:, WH.sl(f"{pre}_out")].set(rnd((HIDDEN, HIDDEN)))
        set_gamma(f"{pre}_ln_g")

    def pack_cross_att(pre):
        nonlocal wH
        wH = wH.at[:, WH.sl(f"{pre}_q")].set(rnd((HIDDEN, HIDDEN)) * _ATT_SCALE)
        wH = wH.at[:, WH.sl(f"{pre}_kv")].set(rnd((HIDDEN, 2 * HIDDEN)))
        wH = wH.at[:, WH.sl(f"{pre}_out")].set(rnd((HIDDEN, HIDDEN)))
        set_gamma(f"{pre}_ln_g")

    def pack_ffn(pre):
        nonlocal wH, wI
        wH = wH.at[:, WH.sl(f"{pre}_inter")].set(rnd((HIDDEN, INTER)))
        wI = wI.at[:, WI.sl(f"{pre}_ffnout")].set(rnd((INTER, HIDDEN)))
        set_gamma(f"{pre}_ffnln_g")

    # frontend
    set_gamma("emb_ln_g"); set_gamma("visn_ln_g"); set_gamma("box_ln_g")
    p["wF"] = rnd((VFEAT_DIM, HIDDEN))
    p["wB"] = rnd((VPOS_DIM, HIDDEN))

    for i in range(LLAYERS):
        pack_self_att(f"l{i}_att"); pack_ffn(f"l{i}")
    for i in range(RLAYERS):
        pack_self_att(f"r{i}_att"); pack_ffn(f"r{i}")
    for i in range(XLAYERS):
        pack_cross_att(f"x{i}_xatt")
        pack_self_att(f"x{i}_lself")
        pack_self_att(f"x{i}_vself")
        pack_ffn(f"x{i}_lang")
        pack_ffn(f"x{i}_visn")
    wH = wH.at[:, WH.sl("pool")].set(rnd((HIDDEN, HIDDEN)))

    p["wH"], p["wI"], p["vecH"], p["vecI"] = wH, wI, vH, vI
    return p


# ----------------------------- full forward ----------------------------------
def lxrt_encoder_forward(p, input_ids, token_position, segment_ids, input_mask,
                         visual_feats, visual_boxes, visual_attention_mask=None):
    # embedding table gathers in XLA glue; everything else runs in one fused pallas_call
    emb = (p["word_emb"][input_ids] + p["pos_emb"][token_position]
           + p["type_emb"][segment_ids]).astype(jnp.float32)              # [B, L, H]

    lang_mask = ((1.0 - input_mask.astype(jnp.float32)) * -10000.0).reshape(B, 1, L)
    if visual_attention_mask is None:
        visn_mask = jnp.zeros((B, 1, NOBJ), jnp.float32)
    else:
        visn_mask = ((1.0 - visual_attention_mask.astype(jnp.float32))
                     * -10000.0).reshape(B, 1, NOBJ)

    const2d = lambda b: (0, 0)   # weight slabs: same full block every grid step (no re-DMA)
    pooled = pl.pallas_call(
        _lxrt_kernel,
        out_shape=jax.ShapeDtypeStruct((B, 1, HIDDEN), jnp.float32),
        grid=(B,),
        in_specs=[
            pl.BlockSpec((1, L, HIDDEN), lambda b: (b, 0, 0)),          # emb
            pl.BlockSpec((1, NOBJ, VFEAT_DIM), lambda b: (b, 0, 0)),    # visual feats
            pl.BlockSpec((1, NOBJ, VPOS_DIM), lambda b: (b, 0, 0)),     # visual boxes
            pl.BlockSpec((1, 1, L), lambda b: (b, 0, 0)),               # lang mask (additive)
            pl.BlockSpec((1, 1, NOBJ), lambda b: (b, 0, 0)),            # visn mask (additive)
            pl.BlockSpec((HIDDEN, WH.size), const2d),                   # wH slab
            pl.BlockSpec((INTER, WI.size), const2d),                    # wI slab
            pl.BlockSpec((VFEAT_DIM, HIDDEN), const2d),                 # visn_fc_w
            pl.BlockSpec((VPOS_DIM, HIDDEN), const2d),                  # box_fc_w
            pl.BlockSpec((VECH.size, HIDDEN), const2d),                 # H-wide bias/LN slab
            pl.BlockSpec((VECI.size, INTER), const2d),                  # INTER-wide bias slab
        ],
        out_specs=pl.BlockSpec((1, 1, HIDDEN), lambda b: (b, 0, 0)),
        compiler_params=pltpu.CompilerParams(
            dimension_semantics=("parallel",)),   # v7x: both TCs busy; v5e/v6e: 2 serial steps
    )(emb, visual_feats, visual_boxes, lang_mask, visn_mask,
      p["wH"], p["wI"], p["wF"], p["wB"], p["vecH"], p["vecI"])

    return pooled.reshape(B, HIDDEN)   # mode 'x': pooled output only


# ----------------------------- main -------------------------------------------
if __name__ == "__main__":
    key = jax.random.PRNGKey(0)
    k1, k2, k3, _ = jax.random.split(key, 4)

    input_ids = jax.random.randint(k1, (B, L), 0, VOCAB, dtype=jnp.int32)
    token_position = jnp.broadcast_to(jnp.arange(L, dtype=jnp.int32), (B, L))
    segment_ids = jnp.zeros((B, L), jnp.int32)
    input_mask = jnp.ones((B, L), jnp.int32).at[1, L - 2:].set(0)
    visual_feats = jax.random.normal(k2, (B, NOBJ, VFEAT_DIM), jnp.float32)
    visual_boxes = jax.random.uniform(k3, (B, NOBJ, VPOS_DIM), jnp.float32)

    params = init_params(seed=0)

    fwd = jax.jit(lxrt_encoder_forward)
    out = fwd(params, input_ids, token_position, segment_ids, input_mask,
              visual_feats, visual_boxes, None)
    out = jax.block_until_ready(out)
    assert out.shape == (B, HIDDEN) and out.dtype == jnp.float32
    assert bool(jnp.all(jnp.isfinite(out)))
    print("KERNEL_OK")
</pallas_src>

<mosaic_0001>
module attributes {stable_mosaic.version = 11 : i64} {
  func.func @_lxrt_kernel(%arg0: i32, %arg1: memref<1x8x32xf32, #tpu.memory_space<vmem>>, %arg2: memref<1x4x16xf32, #tpu.memory_space<vmem>>, %arg3: memref<1x4x4xf32, #tpu.memory_space<vmem>>, %arg4: memref<1x1x8xf32, #tpu.memory_space<vmem>>, %arg5: memref<1x1x4xf32, #tpu.memory_space<vmem>>, %arg6: memref<32x928xf32, #tpu.memory_space<vmem>>, %arg7: memref<64x128xf32, #tpu.memory_space<vmem>>, %arg8: memref<16x32xf32, #tpu.memory_space<vmem>>, %arg9: memref<4x32xf32, #tpu.memory_space<vmem>>, %arg10: memref<51x32xf32, #tpu.memory_space<vmem>>, %arg11: memref<4x64xf32, #tpu.memory_space<vmem>>, %arg12: memref<1x1x32xf32, #tpu.memory_space<vmem>>) attributes {dimension_semantics = [#tpu.dimension_semantics<parallel>], iteration_bounds = array<i64: 2>, scalar_prefetch = 0 : i64, scratch_operands = 0 : i64, tpu.core_type = #tpu.core_type<tc>, window_params = [{transform_indices = @transform_0, window_bounds = array<i64: 1, 8, 32>}, {transform_indices = @transform_1, window_bounds = array<i64: 1, 4, 16>}, {transform_indices = @transform_2, window_bounds = array<i64: 1, 4, 4>}, {transform_indices = @transform_3, window_bounds = array<i64: 1, 1, 8>}, {transform_indices = @transform_4, window_bounds = array<i64: 1, 1, 4>}, {pipeline_mode = #tpu.pipeline_mode<synchronous>, transform_indices = @transform_5, window_bounds = array<i64: 32, 928>}, {pipeline_mode = #tpu.pipeline_mode<synchronous>, transform_indices = @transform_6, window_bounds = array<i64: 64, 128>}, {pipeline_mode = #tpu.pipeline_mode<synchronous>, transform_indices = @transform_7, window_bounds = array<i64: 16, 32>}, {pipeline_mode = #tpu.pipeline_mode<synchronous>, transform_indices = @transform_8, window_bounds = array<i64: 4, 32>}, {pipeline_mode = #tpu.pipeline_mode<synchronous>, transform_indices = @transform_9, window_bounds = array<i64: 51, 32>}, {pipeline_mode = #tpu.pipeline_mode<synchronous>, transform_indices = @transform_10, window_bounds = array<i64: 4, 64>}, {transform_indices = @transform_11, window_bounds = array<i64: 1, 1, 32>}]} {
    %c0 = arith.constant 0 : index
    %c0_0 = arith.constant 0 : index
    %c0_1 = arith.constant 0 : index
    %0 = vector.load %arg1[%c0, %c0_0, %c0_1] : memref<1x8x32xf32, #tpu.memory_space<vmem>>, vector<1x8x32xf32>
    %1 = vector.shape_cast %0 : vector<1x8x32xf32> to vector<8x32xf32>
    %c0_2 = arith.constant 0 : index
    %c0_3 = arith.constant 0 : index
    %2 = vector.load %arg10[%c0_2, %c0_3] : memref<51x32xf32, #tpu.memory_space<vmem>>, vector<1x32xf32>
    %c1 = arith.constant 1 : index
    %c0_4 = arith.constant 0 : index
    %3 = vector.load %arg10[%c1, %c0_4] : memref<51x32xf32, #tpu.memory_space<vmem>>, vector<1x32xf32>
    %cst = arith.constant dense<0.000000e+00> : vector<8xf32>
    %4 = vector.multi_reduction <add>, %1, %cst [1] : vector<8x32xf32> to vector<8xf32>
    %5 = vector.shape_cast %4 : vector<8xf32> to vector<8x1xf32>
    %cst_5 = arith.constant 3.200000e+01 : f32
    %6 = vector.broadcast %cst_5 : f32 to vector<8x1xf32>
    %7 = arith.divf %5, %6 : vector<8x1xf32>
    %8 = vector.broadcast %7 : vector<8x1xf32> to vector<8x32xf32>
    %9 = arith.subf %1, %8 : vector<8x32xf32>
    %10 = arith.mulf %9, %9 : vector<8x32xf32>
    %cst_6 = arith.constant dense<0.000000e+00> : vector<8xf32>
    %11 = vector.multi_reduction <add>, %10, %cst_6 [1] : vector<8x32xf32> to vector<8xf32>
    %12 = vector.shape_cast %11 : vector<8xf32> to vector<8x1xf32>
    %cst_7 = arith.constant 3.200000e+01 : f32
    %13 = vector.broadcast %cst_7 : f32 to vector<8x1xf32>
    %14 = arith.divf %12, %13 : vector<8x1xf32>
    %15 = vector.broadcast %7 : vector<8x1xf32> to vector<8x32xf32>
    %16 = arith.subf %1, %15 : vector<8x32xf32>
    %cst_8 = arith.constant 9.99999996E-13 : f32
    %17 = vector.broadcast %cst_8 : f32 to vector<8x1xf32>
    %18 = arith.addf %14, %17 : vector<8x1xf32>
    %19 = math.rsqrt %18 : vector<8x1xf32>
    %20 = vector.broadcast %19 : vector<8x1xf32> to vector<8x32xf32>
    %21 = arith.mulf %16, %20 : vector<8x32xf32>
    %22 = vector.broadcast %2 : vector<1x32xf32> to vector<8x32xf32>
    %23 = arith.mulf %21, %22 : vector<8x32xf32>
    %24 = vector.broadcast %3 : vector<1x32xf32> to vector<8x32xf32>
    %25 = arith.addf %23, %24 : vector<8x32xf32>
    %c0_9 = arith.constant 0 : index
    %c0_10 = arith.constant 0 : index
    %c0_11 = arith.constant 0 : index
    %26 = vector.load %arg2[%c0_9, %c0_10, %c0_11] : memref<1x4x16xf32, #tpu.memory_space<vmem>>, vector<1x4x16xf32>
    %27 = vector.shape_cast %26 : vector<1x4x16xf32> to vector<4x16xf32>
    %c0_12 = arith.constant 0 : index
    %c0_13 = arith.constant 0 : index
    %28 = vector.load %arg8[%c0_12, %c0_13] : memref<16x32xf32, #tpu.memory_space<vmem>>, vector<16x32xf32>
    %c2 = arith.constant 2 : index
    %c0_14 = arith.constant 0 : index
    %29 = vector.load %arg10[%c2, %c0_14] : memref<51x32xf32, #tpu.memory_space<vmem>>, vector<1x32xf32>
    %cst_15 = arith.constant dense<0.000000e+00> : vector<4x32xf32>
    %30 = tpu.matmul %27, %28, %cst_15 {dimension_numbers = #tpu.dot_dimension_numbers<[1], [0], [0], [1], [0, 0, 1, 1], [], []>} : vector<4x16xf32>, vector<16x32xf32>, vector<4x32xf32> -> vector<4x32xf32>
    %31 = vector.broadcast %29 : vector<1x32xf32> to vector<4x32xf32>
    %32 = arith.addf %30, %31 : vector<4x32xf32>
    %c3 = arith.constant 3 : index
    %c0_16 = arith.constant 0 : index
    %33 = vector.load %arg10[%c3, %c0_16] : memref<51x32xf32, #tpu.memory_space<vmem>>, vector<1x32xf32>
    %c4 = arith.constant 4 : index
    %c0_17 = arith.constant 0 : index
    %34 = vector.load %arg10[%c4, %c0_17] : memref<51x32xf32, #tpu.memory_space<vmem>>, vector<1x32xf32>
    %cst_18 = arith.constant dense<0.000000e+00> : vector<4xf32>
    %35 = vector.multi_reduction <add>, %32, %cst_18 [1] : vector<4x32xf32> to vector<4xf32>
    %36 = vector.shape_cast %35 : vector<4xf32> to vector<4x1xf32>
    %cst_19 = arith.constant 3.200000e+01 : f32
    %37 = vector.broadcast %cst_19 : f32 to vector<4x1xf32>
    %38 = arith.divf %36, %37 : vector<4x1xf32>
    %39 = vector.broadcast %38 : vector<4x1xf32> to vector<4x32xf32>
    %40 = arith.subf %32, %39 : vector<4x32xf32>
    %41 = arith.mulf %40, %40 : vector<4x32xf32>
    %cst_20 = arith.constant dense<0.000000e+00> : vector<4xf32>
    %42 = vector.multi_reduction <add>, %41, %cst_20 [1] : vector<4x32xf32> to vector<4xf32>
    %43 = vector.shape_cast %42 : vector<4xf32> to vector<4x1xf32>
    %cst_21 = arith.constant 3.200000e+01 : f32
    %44 = vector.broadcast %cst_21 : f32 to vector<4x1xf32>
    %45 = arith.divf %43, %44 : vector<4x1xf32>
    %46 = vector.broadcast %38 : vector<4x1xf32> to vector<4x32xf32>
    %47 = arith.subf %32, %46 : vector<4x32xf32>
    %cst_22 = arith.constant 9.99999996E-13 : f32
    %48 = vector.broadcast %cst_22 : f32 to vector<4x1xf32>
    %49 = arith.addf %45, %48 : vector<4x1xf32>
    %50 = math.rsqrt %49 : vector<4x1xf32>
    %51 = vector.broadcast %50 : vector<4x1xf32> to vector<4x32xf32>
    %52 = arith.mulf %47, %51 : vector<4x32xf32>
    %53 = vector.broadcast %33 : vector<1x32xf32> to vector<4x32xf32>
    %54 = arith.mulf %52, %53 : vector<4x32xf32>
    %55 = vector.broadcast %34 : vector<1x32xf32> to vector<4x32xf32>
    %56 = arith.addf %54, %55 : vector<4x32xf32>
    %c0_23 = arith.constant 0 : index
    %c0_24 = arith.constant 0 : index
    %c0_25 = arith.constant 0 : index
    %57 = vector.load %arg3[%c0_23, %c0_24, %c0_25] : memref<1x4x4xf32, #tpu.memory_space<vmem>>, vector<1x4x4xf32>
    %58 = vector.shape_cast %57 : vector<1x4x4xf32> to vector<4x4xf32>
    %c0_26 = arith.constant 0 : index
    %c0_27 = arith.constant 0 : index
    %59 = vector.load %arg9[%c0_26, %c0_27] : memref<4x32xf32, #tpu.memory_space<vmem>>, vector<4x32xf32>
    %c5 = arith.constant 5 : index
    %c0_28 = arith.constant 0 : index
    %60 = vector.load %arg10[%c5, %c0_28] : memref<51x32xf32, #tpu.memory_space<vmem>>, vector<1x32xf32>
    %cst_29 = arith.constant dense<0.000000e+00> : vector<4x32xf32>
    %61 = tpu.matmul %58, %59, %cst_29 {dimension_numbers = #tpu.dot_dimension_numbers<[1], [0], [0], [1], [0, 0, 1, 1], [], []>} : vector<4x4xf32>, vector<4x32xf32>, vector<4x32xf32> -> vector<4x32xf32>
    %62 = vector.broadcast %60 : vector<1x32xf32> to vector<4x32xf32>
    %63 = arith.addf %61, %62 : vector<4x32xf32>
    %c6 = arith.constant 6 : index
    %c0_30 = arith.constant 0 : index
    %64 = vector.load %arg10[%c6, %c0_30] : memref<51x32xf32, #tpu.memory_space<vmem>>, vector<1x32xf32>
    %c7 = arith.constant 7 : index
    %c0_31 = arith.constant 0 : index
    %65 = vector.load %arg10[%c7, %c0_31] : memref<51x32xf32, #tpu.memory_space<vmem>>, vector<1x32xf32>
    %cst_32 = arith.constant dense<0.000000e+00> : vector<4xf32>
    %66 = vector.multi_reduction <add>, %63, %cst_32 [1] : vector<4x32xf32> to vector<4xf32>
    %67 = vector.shape_cast %66 : vector<4xf32> to vector<4x1xf32>
    %cst_33 = arith.constant 3.200000e+01 : f32
    %68 = vector.broadcast %cst_33 : f32 to vector<4x1xf32>
    %69 = arith.divf %67, %68 : vector<4x1xf32>
    %70 = vector.broadcast %69 : vector<4x1xf32> to vector<4x32xf32>
    %71 = arith.subf %63, %70 : vector<4x32xf32>
    %72 = arith.mulf %71, %71 : vector<4x32xf32>
    %cst_34 = arith.constant dense<0.000000e+00> : vector<4xf32>
    %73 = vector.multi_reduction <add>, %72, %cst_34 [1] : vector<4x32xf32> to vector<4xf32>
    %74 = vector.shape_cast %73 : vector<4xf32> to vector<4x1xf32>
    %cst_35 = arith.constant 3.200000e+01 : f32
    %75 = vector.broadcast %cst_35 : f32 to vector<4x1xf32>
    %76 = arith.divf %74, %75 : vector<4x1xf32>
    %77 = vector.broadcast %69 : vector<4x1xf32> to vector<4x32xf32>
    %78 = arith.subf %63, %77 : vector<4x32xf32>
    %cst_36 = arith.constant 9.99999996E-13 : f32
    %79 = vector.broadcast %cst_36 : f32 to vector<4x1xf32>
    %80 = arith.addf %76, %79 : vector<4x1xf32>
    %81 = math.rsqrt %80 : vector<4x1xf32>
    %82 = vector.broadcast %81 : vector<4x1xf32> to vector<4x32xf32>
    %83 = arith.mulf %78, %82 : vector<4x32xf32>
    %84 = vector.broadcast %64 : vector<1x32xf32> to vector<4x32xf32>
    %85 = arith.mulf %83, %84 : vector<4x32xf32>
    %86 = vector.broadcast %65 : vector<1x32xf32> to vector<4x32xf32>
    %87 = arith.addf %85, %86 : vector<4x32xf32>
    %88 = arith.addf %56, %87 : vector<4x32xf32>
    %cst_37 = arith.constant 5.000000e-01 : f32
    %89 = vector.broadcast %cst_37 : f32 to vector<4x32xf32>
    %90 = arith.mulf %88, %89 : vector<4x32xf32>
    %c0_38 = arith.constant 0 : index
    %c0_39 = arith.constant 0 : index
    %c0_40 = arith.constant 0 : index
    %91 = vector.load %arg4[%c0_38, %c0_39, %c0_40] : memref<1x1x8xf32, #tpu.memory_space<vmem>>, vector<1x1x8xf32>
    %92 = vector.shape_cast %91 : vector<1x1x8xf32> to vector<1x8xf32>
    %c0_41 = arith.constant 0 : index
    %c0_42 = arith.constant 0 : index
    %c0_43 = arith.constant 0 : index
    %93 = vector.load %arg5[%c0_41, %c0_42, %c0_43] : memref<1x1x4xf32, #tpu.memory_space<vmem>>, vector<1x1x4xf32>
    %94 = vector.shape_cast %93 : vector<1x1x4xf32> to vector<1x4xf32>
    %c0_44 = arith.constant 0 : index
    %c0_45 = arith.constant 0 : index
    %95 = vector.load %arg6[%c0_44, %c0_45] : memref<32x928xf32, #tpu.memory_space<vmem>>, vector<32x96xf32>
    %cst_46 = arith.constant dense<0.000000e+00> : vector<8x96xf32>
    %96 = tpu.matmul %25, %95, %cst_46 {dimension_numbers = #tpu.dot_dimension_numbers<[1], [0], [0], [1], [0, 0, 1, 1], [], []>} : vector<8x32xf32>, vector<32x96xf32>, vector<8x96xf32> -> vector<8x96xf32>
    %97 = vector.extract_strided_slice %96 {offsets = [0, 0], sizes = [8, 32], strides = [1, 1]} : vector<8x96xf32> to vector<8x32xf32>
    %c8 = arith.constant 8 : index
    %c0_47 = arith.constant 0 : index
    %98 = vector.load %arg10[%c8, %c0_47] : memref<51x32xf32, #tpu.memory_space<vmem>>, vector<1x32xf32>
    %99 = vector.broadcast %98 : vector<1x32xf32> to vector<8x32xf32>
    %100 = arith.addf %97, %99 : vector<8x32xf32>
    %101 = vector.extract_strided_slice %96 {offsets = [0, 32], sizes = [8, 32], strides = [1, 1]} : vector<8x96xf32> to vector<8x32xf32>
    %c9 = arith.constant 9 : index
    %c0_48 = arith.constant 0 : index
    %102 = vector.load %arg10[%c9, %c0_48] : memref<51x32xf32, #tpu.memory_space<vmem>>, vector<1x32xf32>
    %103 = vector.broadcast %102 : vector<1x32xf32> to vector<8x32xf32>
    %104 = arith.addf %101, %103 : vector<8x32xf32>
    %105 = vector.extract_strided_slice %96 {offsets = [0, 64], sizes = [8, 32], strides = [1, 1]} : vector<8x96xf32> to vector<8x32xf32>
    %c10 = arith.constant 10 : index
    %c0_49 = arith.constant 0 : index
    %106 = vector.load %arg10[%c10, %c0_49] : memref<51x32xf32, #tpu.memory_space<vmem>>, vector<1x32xf32>
    %107 = vector.broadcast %106 : vector<1x32xf32> to vector<8x32xf32>
    %108 = arith.addf %105, %107 : vector<8x32xf32>
    %c0_50 = arith.constant 0 : index
    %c96 = arith.constant 96 : index
    %109 = vector.load %arg6[%c0_50, %c96] : memref<32x928xf32, #tpu.memory_space<vmem>>, vector<32x32xf32>
    %110 = vector.extract_strided_slice %100 {offsets = [0, 0], sizes = [8, 8], strides = [1, 1]} : vector<8x32xf32> to vector<8x8xf32>
    %111 = vector.extract_strided_slice %104 {offsets = [0, 0], sizes = [8, 8], strides = [1, 1]} : vector<8x32xf32> to vector<8x8xf32>
    %cst_51 = arith.constant dense<0.000000e+00> : vector<8x8xf32>
    %112 = tpu.matmul %110, %111, %cst_51 {dimension_numbers = #tpu.dot_dimension_numbers<[1], [1], [0], [0], [0, 0, 1, 0], [], []>} : vector<8x8xf32>, vector<8x8xf32>, vector<8x8xf32> -> vector<8x8xf32>
    %113 = vector.broadcast %92 : vector<1x8xf32> to vector<8x8xf32>
    %114 = arith.addf %112, %113 : vector<8x8xf32>
    %cst_52 = arith.constant dense<0xFF800000> : vector<8xf32>
    %115 = vector.multi_reduction <maximumf>, %114, %cst_52 [1] : vector<8x8xf32> to vector<8xf32>
    %116 = vector.shape_cast %115 : vector<8xf32> to vector<8x1xf32>
    %117 = vector.broadcast %116 : vector<8x1xf32> to vector<8x8xf32>
    %118 = arith.subf %114, %117 : vector<8x8xf32>
    %119 = math.exp %118 : vector<8x8xf32>
    %cst_53 = arith.constant dense<0.000000e+00> : vector<8xf32>
    %120 = vector.multi_reduction <add>, %119, %cst_53 [1] : vector<8x8xf32> to vector<8xf32>
    %121 = vector.shape_cast %120 : vector<8xf32> to vector<8x1xf32>
    %122 = vector.broadcast %121 : vector<8x1xf32> to vector<8x8xf32>
    %123 = arith.divf %119, %122 : vector<8x8xf32>
    %124 = vector.extract_strided_slice %108 {offsets = [0, 0], sizes = [8, 8], strides = [1, 1]} : vector<8x32xf32> to vector<8x8xf32>
    %cst_54 = arith.constant dense<0.000000e+00> : vector<8x8xf32>
    %125 = tpu.matmul %123, %124, %cst_54 {dimension_numbers = #tpu.dot_dimension_numbers<[1], [0], [0], [1], [0, 0, 1, 1], [], []>} : vector<8x8xf32>, vector<8x8xf32>, vector<8x8xf32> -> vector<8x8xf32>
    %126 = vector.extract_strided_slice %109 {offsets = [0, 0], sizes = [8, 32], strides = [1, 1]} : vector<32x32xf32> to vector<8x32xf32>
    %cst_55 = arith.constant dense<0.000000e+00> : vector<8x32xf32>
    %127 = tpu.matmul %125, %126, %cst_55 {dimension_numbers = #tpu.dot_dimension_numbers<[1], [0], [0], [1], [0, 0, 1, 1], [], []>} : vector<8x8xf32>, vector<8x32xf32>, vector<8x32xf32> -> vector<8x32xf32>
    %128 = vector.extract_strided_slice %100 {offsets = [0, 8], sizes = [8, 8], strides = [1, 1]} : vector<8x32xf32> to vector<8x8xf32>
    %129 = vector.extract_strided_slice %104 {offsets = [0, 8], sizes = [8, 8], strides = [1, 1]} : vector<8x32xf32> to vector<8x8xf32>
    %cst_56 = arith.constant dense<0.000000e+00> : vector<8x8xf32>
    %130 = tpu.matmul %128, %129, %cst_56 {dimension_numbers = #tpu.dot_dimension_numbers<[1], [1], [0], [0], [0, 0, 1, 0], [], []>} : vector<8x8xf32>, vector<8x8xf32>, vector<8x8xf32> -> vector<8x8xf32>
    %131 = vector.broadcast %92 : vector<1x8xf32> to vector<8x8xf32>
    %132 = arith.addf %130, %131 : vector<8x8xf32>
    %cst_57 = arith.constant dense<0xFF800000> : vector<8xf32>
    %133 = vector.multi_reduction <maximumf>, %132, %cst_57 [1] : vector<8x8xf32> to vector<8xf32>
    %134 = vector.shape_cast %133 : vector<8xf32> to vector<8x1xf32>
    %135 = vector.broadcast %134 : vector<8x1xf32> to vector<8x8xf32>
    %136 = arith.subf %132, %135 : vector<8x8xf32>
    %137 = math.exp %136 : vector<8x8xf32>
    %cst_58 = arith.constant dense<0.000000e+00> : vector<8xf32>
    %138 = vector.multi_reduction <add>, %137, %cst_58 [1] : vector<8x8xf32> to vector<8xf32>
    %139 = vector.shape_cast %138 : vector<8xf32> to vector<8x1xf32>
    %140 = vector.broadcast %139 : vector<8x1xf32> to vector<8x8xf32>
    %141 = arith.divf %137, %140 : vector<8x8xf32>
    %142 = vector.extract_strided_slice %108 {offsets = [0, 8], sizes = [8, 8], strides = [1, 1]} : vector<8x32xf32> to vector<8x8xf32>
    %cst_59 = arith.constant dense<0.000000e+00> : vector<8x8xf32>
    %143 = tpu.matmul %141, %142, %cst_59 {dimension_numbers = #tpu.dot_dimension_numbers<[1], [0], [0], [1], [0, 0, 1, 1], [], []>} : vector<8x8xf32>, vector<8x8xf32>, vector<8x8xf32> -> vector<8x8xf32>
    %144 = vector.extract_strided_slice %109 {offsets = [8, 0], sizes = [8, 32], strides = [1, 1]} : vector<32x32xf32> to vector<8x32xf32>
    %cst_60 = arith.constant dense<0.000000e+00> : vector<8x32xf32>
    %145 = tpu.matmul %143, %144, %cst_60 {dimension_numbers = #tpu.dot_dimension_numbers<[1], [0], [0], [1], [0, 0, 1, 1], [], []>} : vector<8x8xf32>, vector<8x32xf32>, vector<8x32xf32> -> vector<8x32xf32>
    %146 = arith.addf %127, %145 : vector<8x32xf32>
    %147 = vector.extract_strided_slice %100 {offsets = [0, 16], sizes = [8, 8], strides = [1, 1]} : vector<8x32xf32> to vector<8x8xf32>
    %148 = vector.extract_strided_slice %104 {offsets = [0, 16], sizes = [8, 8], strides = [1, 1]} : vector<8x32xf32> to vector<8x8xf32>
    %cst_61 = arith.constant dense<0.000000e+00> : vector<8x8xf32>
    %149 = tpu.matmul %147, %148, %cst_61 {dimension_numbers = #tpu.dot_dimension_numbers<[1], [1], [0], [0], [0, 0, 1, 0], [], []>} : vector<8x8xf32>, vector<8x8xf32>, vector<8x8xf32> -> vector<8x8xf32>
    %150 = vector.broadcast %92 : vector<1x8xf32> to vector<8x8xf32>
    %151 = arith.addf %149, %150 : vector<8x8xf32>
    %cst_62 = arith.constant dense<0xFF800000> : vector<8xf32>
    %152 = vector.multi_reduction <maximumf>, %151, %cst_62 [1] : vector<8x8xf32> to vector<8xf32>
    %153 = vector.shape_cast %152 : vector<8xf32> to vector<8x1xf32>
    %154 = vector.broadcast %153 : vector<8x1xf32> to vector<8x8xf32>
    %155 = arith.subf %151, %154 : vector<8x8xf32>
    %156 = math.exp %155 : vector<8x8xf32>
    %cst_63 = arith.constant dense<0.000000e+00> : vector<8xf32>
    %157 = vector.multi_reduction <add>, %156, %cst_63 [1] : vector<8x8xf32> to vector<8xf32>
    %158 = vector.shape_cast %157 : vector<8xf32> to vector<8x1xf32>
    %159 = vector.broadcast %158 : vector<8x1xf32> to vector<8x8xf32>
    %160 = arith.divf %156, %159 : vector<8x8xf32>
    %161 = vector.extract_strided_slice %108 {offsets = [0, 16], sizes = [8, 8], strides = [1, 1]} : vector<8x32xf32> to vector<8x8xf32>
    %cst_64 = arith.constant dense<0.000000e+00> : vector<8x8xf32>
    %162 = tpu.matmul %160, %161, %cst_64 {dimension_numbers = #tpu.dot_dimension_numbers<[1], [0], [0], [1], [0, 0, 1, 1], [], []>} : vector<8x8xf32>, vector<8x8xf32>, vector<8x8xf32> -> vector<8x8xf32>
    %163 = vector.extract_strided_slice %109 {offsets = [16, 0], sizes = [8, 32], strides = [1, 1]} : vector<32x32xf32> to vector<8x32xf32>
    %cst_65 = arith.constant dense<0.000000e+00> : vector<8x32xf32>
    %164 = tpu.matmul %162, %163, %cst_65 {dimension_numbers = #tpu.dot_dimension_numbers<[1], [0], [0], [1], [0, 0, 1, 1], [], []>} : vector<8x8xf32>, vector<8x32xf32>, vector<8x32xf32> -> vector<8x32xf32>
    %165 = arith.addf %146, %164 : vector<8x32xf32>
    %166 = vector.extract_strided_slice %100 {offsets = [0, 24], sizes = [8, 8], strides = [1, 1]} : vector<8x32xf32> to vector<8x8xf32>
    %167 = vector.extract_strided_slice %104 {offsets = [0, 24], sizes = [8, 8], strides = [1, 1]} : vector<8x32xf32> to vector<8x8xf32>
    %cst_66 = arith.constant dense<0.000000e+00> : vector<8x8xf32>
    %168 = tpu.matmul %166, %167, %cst_66 {dimension_numbers = #tpu.dot_dimension_numbers<[1], [1], [0], [0], [0, 0, 1, 0], [], []>} : vector<8x8xf32>, vector<8x8xf32>, vector<8x8xf32> -> vector<8x8xf32>
    %169 = vector.broadcast %92 : vector<1x8xf32> to vector<8x8xf32>
    %170 = arith.addf %168, %169 : vector<8x8xf32>
    %cst_67 = arith.constant dense<0xFF800000> : vector<8xf32>
    %171 = vector.multi_reduction <maximumf>, %170, %cst_67 [1] : vector<8x8xf32> to vector<8xf32>
    %172 = vector.shape_cast %171 : vector<8xf32> to vector<8x1xf32>
    %173 = vector.broadcast %172 : vector<8x1xf32> to vector<8x8xf32>
    %174 = arith.subf %170, %173 : vector<8x8xf32>
    %175 = math.exp %174 : vector<8x8xf32>
    %cst_68 = arith.constant dense<0.000000e+00> : vector<8xf32>
    %176 = vector.multi_reduction <add>, %175, %cst_68 [1] : vector<8x8xf32> to vector<8xf32>
    %177 = vector.shape_cast %176 : vector<8xf32> to vector<8x1xf32>
    %178 = vector.broadcast %177 : vector<8x1xf32> to vector<8x8xf32>
    %179 = arith.divf %175, %178 : vector<8x8xf32>
    %180 = vector.extract_strided_slice %108 {offsets = [0, 24], sizes = [8, 8], strides = [1, 1]} : vector<8x32xf32> to vector<8x8xf32>
    %cst_69 = arith.constant dense<0.000000e+00> : vector<8x8xf32>
    %181 = tpu.matmul %179, %180, %cst_69 {dimension_numbers = #tpu.dot_dimension_numbers<[1], [0], [0], [1], [0, 0, 1, 1], [], []>} : vector<8x8xf32>, vector<8x8xf32>, vector<8x8xf32> -> vector<8x8xf32>
    %182 = vector.extract_strided_slice %109 {offsets = [24, 0], sizes = [8, 32], strides = [1, 1]} : vector<32x32xf32> to vector<8x32xf32>
    %cst_70 = arith.constant dense<0.000000e+00> : vector<8x32xf32>
    %183 = tpu.matmul %181, %182, %cst_70 {dimension_numbers = #tpu.dot_dimension_numbers<[1], [0], [0], [1], [0, 0, 1, 1], [], []>} : vector<8x8xf32>, vector<8x32xf32>, vector<8x32xf32> -> vector<8x32xf32>
    %184 = arith.addf %165, %183 : vector<8x32xf32>
    %c11 = arith.constant 11 : index
    %c0_71 = arith.constant 0 : index
    %185 = vector.load %arg10[%c11, %c0_71] : memref<51x32xf32, #tpu.memory_space<vmem>>, vector<1x32xf32>
    %186 = vector.broadcast %185 : vector<1x32xf32> to vector<8x32xf32>
    %187 = arith.addf %184, %186 : vector<8x32xf32>
    %188 = arith.addf %25, %187 : vector<8x32xf32>
    %c12 = arith.constant 12 : index
    %c0_72 = arith.constant 0 : index
    %189 = vector.load %arg10[%c12, %c0_72] : memref<51x32xf32, #tpu.memory_space<vmem>>, vector<1x32xf32>
    %c13 = arith.constant 13 : index
    %c0_73 = arith.constant 0 : index
    %190 = vector.load %arg10[%c13, %c0_73] : memref<51x32xf32, #tpu.memory_space<vmem>>, vector<1x32xf32>
    %cst_74 = arith.constant dense<0.000000e+00> : vector<8xf32>
    %191 = vector.multi_reduction <add>, %188, %cst_74 [1] : vector<8x32xf32> to vector<8xf32>
    %192 = vector.shape_cast %191 : vector<8xf32> to vector<8x1xf32>
    %cst_75 = arith.constant 3.200000e+01 : f32
    %193 = vector.broadcast %cst_75 : f32 to vector<8x1xf32>
    %194 = arith.divf %192, %193 : vector<8x1xf32>
    %195 = vector.broadcast %194 : vector<8x1xf32> to vector<8x32xf32>
    %196 = arith.subf %188, %195 : vector<8x32xf32>
    %197 = arith.mulf %196, %196 : vector<8x32xf32>
    %cst_76 = arith.constant dense<0.000000e+00> : vector<8xf32>
    %198 = vector.multi_reduction <add>, %197, %cst_76 [1] : vector<8x32xf32> to vector<8xf32>
    %199 = vector.shape_cast %198 : vector<8xf32> to vector<8x1xf32>
    %cst_77 = arith.constant 3.200000e+01 : f32
    %200 = vector.broadcast %cst_77 : f32 to vector<8x1xf32>
    %201 = arith.divf %199, %200 : vector<8x1xf32>
    %202 = vector.broadcast %194 : vector<8x1xf32> to vector<8x32xf32>
    %203 = arith.subf %188, %202 : vector<8x32xf32>
    %cst_78 = arith.constant 9.99999996E-13 : f32
    %204 = vector.broadcast %cst_78 : f32 to vector<8x1xf32>
    %205 = arith.addf %201, %204 : vector<8x1xf32>
    %206 = math.rsqrt %205 : vector<8x1xf32>
    %207 = vector.broadcast %206 : vector<8x1xf32> to vector<8x32xf32>
    %208 = arith.mulf %203, %207 : vector<8x32xf32>
    %209 = vector.broadcast %189 : vector<1x32xf32> to vector<8x32xf32>
    %210 = arith.mulf %208, %209 : vector<8x32xf32>
    %211 = vector.broadcast %190 : vector<1x32xf32> to vector<8x32xf32>
    %212 = arith.addf %210, %211 : vector<8x32xf32>
    %c0_79 = arith.constant 0 : index
    %c128 = arith.constant 128 : index
    %213 = vector.load %arg6[%c0_79, %c128] : memref<32x928xf32, #tpu.memory_space<vmem>>, vector<32x64xf32>
    %c0_80 = arith.constant 0 : index
    %c0_81 = arith.constant 0 : index
    %214 = vector.load %arg11[%c0_80, %c0_81] : memref<4x64xf32, #tpu.memory_space<vmem>>, vector<1x64xf32>
    %cst_82 = arith.constant dense<0.000000e+00> : vector<8x64xf32>
    %215 = tpu.matmul %212, %213, %cst_82 {dimension_numbers = #tpu.dot_dimension_numbers<[1], [0], [0], [1], [0, 0, 1, 1], [], []>} : vector<8x32xf32>, vector<32x64xf32>, vector<8x64xf32> -> vector<8x64xf32>
    %216 = vector.broadcast %214 : vector<1x64xf32> to vector<8x64xf32>
    %217 = arith.addf %215, %216 : vector<8x64xf32>
    %cst_83 = arith.constant 5.000000e-01 : f32
    %218 = vector.broadcast %cst_83 : f32 to vector<8x64xf32>
    %219 = arith.mulf %218, %217 : vector<8x64xf32>
    %cst_84 = arith.constant 0.707106769 : f32
    %220 = vector.broadcast %cst_84 : f32 to vector<8x64xf32>
    %221 = arith.mulf %217, %220 : vector<8x64xf32>
    %222 = math.erf %221 : vector<8x64xf32>
    %cst_85 = arith.constant 1.000000e+00 : f32
    %223 = vector.broadcast %cst_85 : f32 to vector<8x64xf32>
    %224 = arith.addf %223, %222 : vector<8x64xf32>
    %225 = arith.mulf %219, %224 : vector<8x64xf32>
    %c0_86 = arith.constant 0 : index
    %c0_87 = arith.constant 0 : index
    %226 = vector.load %arg7[%c0_86, %c0_87] : memref<64x128xf32, #tpu.memory_space<vmem>>, vector<64x32xf32>
    %c14 = arith.constant 14 : index
    %c0_88 = arith.constant 0 : index
    %227 = vector.load %arg10[%c14, %c0_88] : memref<51x32xf32, #tpu.memory_space<vmem>>, vector<1x32xf32>
    %cst_89 = arith.constant dense<0.000000e+00> : vector<8x32xf32>
    %228 = tpu.matmul %225, %226, %cst_89 {dimension_numbers = #tpu.dot_dimension_numbers<[1], [0], [0], [1], [0, 0, 1, 1], [], []>} : vector<8x64xf32>, vector<64x32xf32>, vector<8x32xf32> -> vector<8x32xf32>
    %229 = vector.broadcast %227 : vector<1x32xf32> to vector<8x32xf32>
    %230 = arith.addf %228, %229 : vector<8x32xf32>
    %231 = arith.addf %212, %230 : vector<8x32xf32>
    %c15 = arith.constant 15 : index
    %c0_90 = arith.constant 0 : index
    %232 = vector.load %arg10[%c15, %c0_90] : memref<51x32xf32, #tpu.memory_space<vmem>>, vector<1x32xf32>
    %c16 = arith.constant 16 : index
    %c0_91 = arith.constant 0 : index
    %233 = vector.load %arg10[%c16, %c0_91] : memref<51x32xf32, #tpu.memory_space<vmem>>, vector<1x32xf32>
    %cst_92 = arith.constant dense<0.000000e+00> : vector<8xf32>
    %234 = vector.multi_reduction <add>, %231, %cst_92 [1] : vector<8x32xf32> to vector<8xf32>
    %235 = vector.shape_cast %234 : vector<8xf32> to vector<8x1xf32>
    %cst_93 = arith.constant 3.200000e+01 : f32
    %236 = vector.broadcast %cst_93 : f32 to vector<8x1xf32>
    %237 = arith.divf %235, %236 : vector<8x1xf32>
    %238 = vector.broadcast %237 : vector<8x1xf32> to vector<8x32xf32>
    %239 = arith.subf %231, %238 : vector<8x32xf32>
    %240 = arith.mulf %239, %239 : vector<8x32xf32>
    %cst_94 = arith.constant dense<0.000000e+00> : vector<8xf32>
    %241 = vector.multi_reduction <add>, %240, %cst_94 [1] : vector<8x32xf32> to vector<8xf32>
    %242 = vector.shape_cast %241 : vector<8xf32> to vector<8x1xf32>
    %cst_95 = arith.constant 3.200000e+01 : f32
    %243 = vector.broadcast %cst_95 : f32 to vector<8x1xf32>
    %244 = arith.divf %242, %243 : vector<8x1xf32>
    %245 = vector.broadcast %237 : vector<8x1xf32> to vector<8x32xf32>
    %246 = arith.subf %231, %245 : vector<8x32xf32>
    %cst_96 = arith.constant 9.99999996E-13 : f32
    %247 = vector.broadcast %cst_96 : f32 to vector<8x1xf32>
    %248 = arith.addf %244, %247 : vector<8x1xf32>
    %249 = math.rsqrt %248 : vector<8x1xf32>
    %250 = vector.broadcast %249 : vector<8x1xf32> to vector<8x32xf32>
    %251 = arith.mulf %246, %250 : vector<8x32xf32>
    %252 = vector.broadcast %232 : vector<1x32xf32> to vector<8x32xf32>
    %253 = arith.mulf %251, %252 : vector<8x32xf32>
    %254 = vector.broadcast %233 : vector<1x32xf32> to vector<8x32xf32>
    %255 = arith.addf %253, %254 : vector<8x32xf32>
    %c0_97 = arith.constant 0 : index
    %c192 = arith.constant 192 : index
    %256 = vector.load %arg6[%c0_97, %c192] : memref<32x928xf32, #tpu.memory_space<vmem>>, vector<32x96xf32>
    %cst_98 = arith.constant dense<0.000000e+00> : vector<4x96xf32>
    %257 = tpu.matmul %90, %256, %cst_98 {dimension_numbers = #tpu.dot_dimension_numbers<[1], [0], [0], [1], [0, 0, 1, 1], [], []>} : vector<4x32xf32>, vector<32x96xf32>, vector<4x96xf32> -> vector<4x96xf32>
    %258 = vector.extract_strided_slice %257 {offsets = [0, 0], sizes = [4, 32], strides = [1, 1]} : vector<4x96xf32> to vector<4x32xf32>
    %c17 = arith.constant 17 : index
    %c0_99 = arith.constant 0 : index
    %259 = vector.load %arg10[%c17, %c0_99] : memref<51x32xf32, #tpu.memory_space<vmem>>, vector<1x32xf32>
    %260 = vector.broadcast %259 : vector<1x32xf32> to vector<4x32xf32>
    %261 = arith.addf %258, %260 : vector<4x32xf32>
    %262 = vector.extract_strided_slice %257 {offsets = [0, 32], sizes = [4, 32], strides = [1, 1]} : vector<4x96xf32> to vector<4x32xf32>
    %c18 = arith.constant 18 : index
    %c0_100 = arith.constant 0 : index
    %263 = vector.load %arg10[%c18, %c0_100] : memref<51x32xf32, #tpu.memory_space<vmem>>, vector<1x32xf32>
    %264 = vector.broadcast %263 : vector<1x32xf32> to vector<4x32xf32>
    %265 = arith.addf %262, %264 : vector<4x32xf32>
    %266 = vector.extract_strided_slice %257 {offsets = [0, 64], sizes = [4, 32], strides = [1, 1]} : vector<4x96xf32> to vector<4x32xf32>
    %c19 = arith.constant 19 : index
    %c0_101 = arith.constant 0 : index
    %267 = vector.load %arg10[%c19, %c0_101] : memref<51x32xf32, #tpu.memory_space<vmem>>, vector<1x32xf32>
    %268 = vector.broadcast %267 : vector<1x32xf32> to vector<4x32xf32>
    %269 = arith.addf %266, %268 : vector<4x32xf32>
    %c0_102 = arith.constant 0 : index
    %c288 = arith.constant 288 : index
    %270 = vector.load %arg6[%c0_102, %c288] : memref<32x928xf32, #tpu.memory_space<vmem>>, vector<32x32xf32>
    %271 = vector.extract_strided_slice %261 {offsets = [0, 0], sizes = [4, 8], strides = [1, 1]} : vector<4x32xf32> to vector<4x8xf32>
    %272 = vector.extract_strided_slice %265 {offsets = [0, 0], sizes = [4, 8], strides = [1, 1]} : vector<4x32xf32> to vector<4x8xf32>
    %cst_103 = arith.constant dense<0.000000e+00> : vector<4x4xf32>
    %273 = tpu.matmul %271, %272, %cst_103 {dimension_numbers = #tpu.dot_dimension_numbers<[1], [1], [0], [0], [0, 0, 1, 0], [], []>} : vector<4x8xf32>, vector<4x8xf32>, vector<4x4xf32> -> vector<4x4xf32>
    %274 = vector.broadcast %94 : vector<1x4xf32> to vector<4x4xf32>
    %275 = arith.addf %273, %274 : vector<4x4xf32>
    %cst_104 = arith.constant dense<0xFF800000> : vector<4xf32>
    %276 = vector.multi_reduction <maximumf>, %275, %cst_104 [1] : vector<4x4xf32> to vector<4xf32>
    %277 = vector.shape_cast %276 : vector<4xf32> to vector<4x1xf32>
    %278 = vector.broadcast %277 : vector<4x1xf32> to vector<4x4xf32>
    %279 = arith.subf %275, %278 : vector<4x4xf32>
    %280 = math.exp %279 : vector<4x4xf32>
    %cst_105 = arith.constant dense<0.000000e+00> : vector<4xf32>
    %281 = vector.multi_reduction <add>, %280, %cst_105 [1] : vector<4x4xf32> to vector<4xf32>
    %282 = vector.shape_cast %281 : vector<4xf32> to vector<4x1xf32>
    %283 = vector.broadcast %282 : vector<4x1xf32> to vector<4x4xf32>
    %284 = arith.divf %280, %283 : vector<4x4xf32>
    %285 = vector.extract_strided_slice %269 {offsets = [0, 0], sizes = [4, 8], strides = [1, 1]} : vector<4x32xf32> to vector<4x8xf32>
    %cst_106 = arith.constant dense<0.000000e+00> : vector<4x8xf32>
    %286 = tpu.matmul %284, %285, %cst_106 {dimension_numbers = #tpu.dot_dimension_numbers<[1], [0], [0], [1], [0, 0, 1, 1], [], []>} : vector<4x4xf32>, vector<4x8xf32>, vector<4x8xf32> -> vector<4x8xf32>
    %287 = vector.extract_strided_slice %270 {offsets = [0, 0], sizes = [8, 32], strides = [1, 1]} : vector<32x32xf32> to vector<8x32xf32>
    %cst_107 = arith.constant dense<0.000000e+00> : vector<4x32xf32>
    %288 = tpu.matmul %286, %287, %cst_107 {dimension_numbers = #tpu.dot_dimension_numbers<[1], [0], [0], [1], [0, 0, 1, 1], [], []>} : vector<4x8xf32>, vector<8x32xf32>, vector<4x32xf32> -> vector<4x32xf32>
    %289 = vector.extract_strided_slice %261 {offsets = [0, 8], sizes = [4, 8], strides = [1, 1]} : vector<4x32xf32> to vector<4x8xf32>
    %290 = vector.extract_strided_slice %265 {offsets = [0, 8], sizes = [4, 8], strides = [1, 1]} : vector<4x32xf32> to vector<4x8xf32>
    %cst_108 = arith.constant dense<0.000000e+00> : vector<4x4xf32>
    %291 = tpu.matmul %289, %290, %cst_108 {dimension_numbers = #tpu.dot_dimension_numbers<[1], [1], [0], [0], [0, 0, 1, 0], [], []>} : vector<4x8xf32>, vector<4x8xf32>, vector<4x4xf32> -> vector<4x4xf32>
    %292 = vector.broadcast %94 : vector<1x4xf32> to vector<4x4xf32>
    %293 = arith.addf %291, %292 : vector<4x4xf32>
    %cst_109 = arith.constant dense<0xFF800000> : vector<4xf32>
    %294 = vector.multi_reduction <maximumf>, %293, %cst_109 [1] : vector<4x4xf32> to vector<4xf32>
    %295 = vector.shape_cast %294 : vector<4xf32> to vector<4x1xf32>
    %296 = vector.broadcast %295 : vector<4x1xf32> to vector<4x4xf32>
    %297 = arith.subf %293, %296 : vector<4x4xf32>
    %298 = math.exp %297 : vector<4x4xf32>
    %cst_110 = arith.constant dense<0.000000e+00> : vector<4xf32>
    %299 = vector.multi_reduction <add>, %298, %cst_110 [1] : vector<4x4xf32> to vector<4xf32>
    %300 = vector.shape_cast %299 : vector<4xf32> to vector<4x1xf32>
    %301 = vector.broadcast %300 : vector<4x1xf32> to vector<4x4xf32>
    %302 = arith.divf %298, %301 : vector<4x4xf32>
    %303 = vector.extract_strided_slice %269 {offsets = [0, 8], sizes = [4, 8], strides = [1, 1]} : vector<4x32xf32> to vector<4x8xf32>
    %cst_111 = arith.constant dense<0.000000e+00> : vector<4x8xf32>
    %304 = tpu.matmul %302, %303, %cst_111 {dimension_numbers = #tpu.dot_dimension_numbers<[1], [0], [0], [1], [0, 0, 1, 1], [], []>} : vector<4x4xf32>, vector<4x8xf32>, vector<4x8xf32> -> vector<4x8xf32>
    %305 = vector.extract_strided_slice %270 {offsets = [8, 0], sizes = [8, 32], strides = [1, 1]} : vector<32x32xf32> to vector<8x32xf32>
    %cst_112 = arith.constant dense<0.000000e+00> : vector<4x32xf32>
    %306 = tpu.matmul %304, %305, %cst_112 {dimension_numbers = #tpu.dot_dimension_numbers<[1], [0], [0], [1], [0, 0, 1, 1], [], []>} : vector<4x8xf32>, vector<8x32xf32>, vector<4x32xf32> -> vector<4x32xf32>
    %307 = arith.addf %288, %306 : vector<4x32xf32>
    %308 = vector.extract_strided_slice %261 {offsets = [0, 16], sizes = [4, 8], strides = [1, 1]} : vector<4x32xf32> to vector<4x8xf32>
    %309 = vector.extract_strided_slice %265 {offsets = [0, 16], sizes = [4, 8], strides = [1, 1]} : vector<4x32xf32> to vector<4x8xf32>
    %cst_113 = arith.constant dense<0.000000e+00> : vector<4x4xf32>
    %310 = tpu.matmul %308, %309, %cst_113 {dimension_numbers = #tpu.dot_dimension_numbers<[1], [1], [0], [0], [0, 0, 1, 0], [], []>} : vector<4x8xf32>, vector<4x8xf32>, vector<4x4xf32> -> vector<4x4xf32>
    %311 = vector.broadcast %94 : vector<1x4xf32> to vector<4x4xf32>
    %312 = arith.addf %310, %311 : vector<4x4xf32>
    %cst_114 = arith.constant dense<0xFF800000> : vector<4xf32>
    %313 = vector.multi_reduction <maximumf>, %312, %cst_114 [1] : vector<4x4xf32> to vector<4xf32>
    %314 = vector.shape_cast %313 : vector<4xf32> to vector<4x1xf32>
    %315 = vector.broadcast %314 : vector<4x1xf32> to vector<4x4xf32>
    %316 = arith.subf %312, %315 : vector<4x4xf32>
    %317 = math.exp %316 : vector<4x4xf32>
    %cst_115 = arith.constant dense<0.000000e+00> : vector<4xf32>
    %318 = vector.multi_reduction <add>, %317, %cst_115 [1] : vector<4x4xf32> to vector<4xf32>
    %319 = vector.shape_cast %318 : vector<4xf32> to vector<4x1xf32>
    %320 = vector.broadcast %319 : vector<4x1xf32> to vector<4x4xf32>
    %321 = arith.divf %317, %320 : vector<4x4xf32>
    %322 = vector.extract_strided_slice %269 {offsets = [0, 16], sizes = [4, 8], strides = [1, 1]} : vector<4x32xf32> to vector<4x8xf32>
    %cst_116 = arith.constant dense<0.000000e+00> : vector<4x8xf32>
    %323 = tpu.matmul %321, %322, %cst_116 {dimension_numbers = #tpu.dot_dimension_numbers<[1], [0], [0], [1], [0, 0, 1, 1], [], []>} : vector<4x4xf32>, vector<4x8xf32>, vector<4x8xf32> -> vector<4x8xf32>
    %324 = vector.extract_strided_slice %270 {offsets = [16, 0], sizes = [8, 32], strides = [1, 1]} : vector<32x32xf32> to vector<8x32xf32>
    %cst_117 = arith.constant dense<0.000000e+00> : vector<4x32xf32>
    %325 = tpu.matmul %323, %324, %cst_117 {dimension_numbers = #tpu.dot_dimension_numbers<[1], [0], [0], [1], [0, 0, 1, 1], [], []>} : vector<4x8xf32>, vector<8x32xf32>, vector<4x32xf32> -> vector<4x32xf32>
    %326 = arith.addf %307, %325 : vector<4x32xf32>
    %327 = vector.extract_strided_slice %261 {offsets = [0, 24], sizes = [4, 8], strides = [1, 1]} : vector<4x32xf32> to vector<4x8xf32>
    %328 = vector.extract_strided_slice %265 {offsets = [0, 24], sizes = [4, 8], strides = [1, 1]} : vector<4x32xf32> to vector<4x8xf32>
    %cst_118 = arith.constant dense<0.000000e+00> : vector<4x4xf32>
    %329 = tpu.matmul %327, %328, %cst_118 {dimension_numbers = #tpu.dot_dimension_numbers<[1], [1], [0], [0], [0, 0, 1, 0], [], []>} : vector<4x8xf32>, vector<4x8xf32>, vector<4x4xf32> -> vector<4x4xf32>
    %330 = vector.broadcast %94 : vector<1x4xf32> to vector<4x4xf32>
    %331 = arith.addf %329, %330 : vector<4x4xf32>
    %cst_119 = arith.constant dense<0xFF800000> : vector<4xf32>
    %332 = vector.multi_reduction <maximumf>, %331, %cst_119 [1] : vector<4x4xf32> to vector<4xf32>
    %333 = vector.shape_cast %332 : vector<4xf32> to vector<4x1xf32>
    %334 = vector.broadcast %333 : vector<4x1xf32> to vector<4x4xf32>
    %335 = arith.subf %331, %334 : vector<4x4xf32>
    %336 = math.exp %335 : vector<4x4xf32>
    %cst_120 = arith.constant dense<0.000000e+00> : vector<4xf32>
    %337 = vector.multi_reduction <add>, %336, %cst_120 [1] : vector<4x4xf32> to vector<4xf32>
    %338 = vector.shape_cast %337 : vector<4xf32> to vector<4x1xf32>
    %339 = vector.broadcast %338 : vector<4x1xf32> to vector<4x4xf32>
    %340 = arith.divf %336, %339 : vector<4x4xf32>
    %341 = vector.extract_strided_slice %269 {offsets = [0, 24], sizes = [4, 8], strides = [1, 1]} : vector<4x32xf32> to vector<4x8xf32>
    %cst_121 = arith.constant dense<0.000000e+00> : vector<4x8xf32>
    %342 = tpu.matmul %340, %341, %cst_121 {dimension_numbers = #tpu.dot_dimension_numbers<[1], [0], [0], [1], [0, 0, 1, 1], [], []>} : vector<4x4xf32>, vector<4x8xf32>, vector<4x8xf32> -> vector<4x8xf32>
    %343 = vector.extract_strided_slice %270 {offsets = [24, 0], sizes = [8, 32], strides = [1, 1]} : vector<32x32xf32> to vector<8x32xf32>
    %cst_122 = arith.constant dense<0.000000e+00> : vector<4x32xf32>
    %344 = tpu.matmul %342, %343, %cst_122 {dimension_numbers = #tpu.dot_dimension_numbers<[1], [0], [0], [1], [0, 0, 1, 1], [], []>} : vector<4x8xf32>, vector<8x32xf32>, vector<4x32xf32> -> vector<4x32xf32>
    %345 = arith.addf %326, %344 : vector<4x32xf32>
    %c20 = arith.constant 20 : index
    %c0_123 = arith.constant 0 : index
    %346 = vector.load %arg10[%c20, %c0_123] : memref<51x32xf32, #tpu.memory_space<vmem>>, vector<1x32xf32>
    %347 = vector.broadcast %346 : vector<1x32xf32> to vector<4x32xf32>
    %348 = arith.addf %345, %347 : vector<4x32xf32>
    %349 = arith.addf %90, %348 : vector<4x32xf32>
    %c21 = arith.constant 21 : index
    %c0_124 = arith.constant 0 : index
    %350 = vector.load %arg10[%c21, %c0_124] : memref<51x32xf32, #tpu.memory_space<vmem>>, vector<1x32xf32>
    %c22 = arith.constant 22 : index
    %c0_125 = arith.constant 0 : index
    %351 = vector.load %arg10[%c22, %c0_125] : memref<51x32xf32, #tpu.memory_space<vmem>>, vector<1x32xf32>
    %cst_126 = arith.constant dense<0.000000e+00> : vector<4xf32>
    %352 = vector.multi_reduction <add>, %349, %cst_126 [1] : vector<4x32xf32> to vector<4xf32>
    %353 = vector.shape_cast %352 : vector<4xf32> to vector<4x1xf32>
    %cst_127 = arith.constant 3.200000e+01 : f32
    %354 = vector.broadcast %cst_127 : f32 to vector<4x1xf32>
    %355 = arith.divf %353, %354 : vector<4x1xf32>
    %356 = vector.broadcast %355 : vector<4x1xf32> to vector<4x32xf32>
    %357 = arith.subf %349, %356 : vector<4x32xf32>
    %358 = arith.mulf %357, %357 : vector<4x32xf32>
    %cst_128 = arith.constant dense<0.000000e+00> : vector<4xf32>
    %359 = vector.multi_reduction <add>, %358, %cst_128 [1] : vector<4x32xf32> to vector<4xf32>
    %360 = vector.shape_cast %359 : vector<4xf32> to vector<4x1xf32>
    %cst_129 = arith.constant 3.200000e+01 : f32
    %361 = vector.broadcast %cst_129 : f32 to vector<4x1xf32>
    %362 = arith.divf %360, %361 : vector<4x1xf32>
    %363 = vector.broadcast %355 : vector<4x1xf32> to vector<4x32xf32>
    %364 = arith.subf %349, %363 : vector<4x32xf32>
    %cst_130 = arith.constant 9.99999996E-13 : f32
    %365 = vector.broadcast %cst_130 : f32 to vector<4x1xf32>
    %366 = arith.addf %362, %365 : vector<4x1xf32>
    %367 = math.rsqrt %366 : vector<4x1xf32>
    %368 = vector.broadcast %367 : vector<4x1xf32> to vector<4x32xf32>
    %369 = arith.mulf %364, %368 : vector<4x32xf32>
    %370 = vector.broadcast %350 : vector<1x32xf32> to vector<4x32xf32>
    %371 = arith.mulf %369, %370 : vector<4x32xf32>
    %372 = vector.broadcast %351 : vector<1x32xf32> to vector<4x32xf32>
    %373 = arith.addf %371, %372 : vector<4x32xf32>
    %c0_131 = arith.constant 0 : index
    %c320 = arith.constant 320 : index
    %374 = vector.load %arg6[%c0_131, %c320] : memref<32x928xf32, #tpu.memory_space<vmem>>, vector<32x64xf32>
    %c1_132 = arith.constant 1 : index
    %c0_133 = arith.constant 0 : index
    %375 = vector.load %arg11[%c1_132, %c0_133] : memref<4x64xf32, #tpu.memory_space<vmem>>, vector<1x64xf32>
    %cst_134 = arith.constant dense<0.000000e+00> : vector<4x64xf32>
    %376 = tpu.matmul %373, %374, %cst_134 {dimension_numbers = #tpu.dot_dimension_numbers<[1], [0], [0], [1], [0, 0, 1, 1], [], []>} : vector<4x32xf32>, vector<32x64xf32>, vector<4x64xf32> -> vector<4x64xf32>
    %377 = vector.broadcast %375 : vector<1x64xf32> to vector<4x64xf32>
    %378 = arith.addf %376, %377 : vector<4x64xf32>
    %cst_135 = arith.constant 5.000000e-01 : f32
    %379 = vector.broadcast %cst_135 : f32 to vector<4x64xf32>
    %380 = arith.mulf %379, %378 : vector<4x64xf32>
    %cst_136 = arith.constant 0.707106769 : f32
    %381 = vector.broadcast %cst_136 : f32 to vector<4x64xf32>
    %382 = arith.mulf %378, %381 : vector<4x64xf32>
    %383 = math.erf %382 : vector<4x64xf32>
    %cst_137 = arith.constant 1.000000e+00 : f32
    %384 = vector.broadcast %cst_137 : f32 to vector<4x64xf32>
    %385 = arith.addf %384, %383 : vector<4x64xf32>
    %386 = arith.mulf %380, %385 : vector<4x64xf32>
    %c0_138 = arith.constant 0 : index
    %c32 = arith.constant 32 : index
    %387 = vector.load %arg7[%c0_138, %c32] : memref<64x128xf32, #tpu.memory_space<vmem>>, vector<64x32xf32>
    %c23 = arith.constant 23 : index
    %c0_139 = arith.constant 0 : index
    %388 = vector.load %arg10[%c23, %c0_139] : memref<51x32xf32, #tpu.memory_space<vmem>>, vector<1x32xf32>
    %cst_140 = arith.constant dense<0.000000e+00> : vector<4x32xf32>
    %389 = tpu.matmul %386, %387, %cst_140 {dimension_numbers = #tpu.dot_dimension_numbers<[1], [0], [0], [1], [0, 0, 1, 1], [], []>} : vector<4x64xf32>, vector<64x32xf32>, vector<4x32xf32> -> vector<4x32xf32>
    %390 = vector.broadcast %388 : vector<1x32xf32> to vector<4x32xf32>
    %391 = arith.addf %389, %390 : vector<4x32xf32>
    %392 = arith.addf %373, %391 : vector<4x32xf32>
    %c24 = arith.constant 24 : index
    %c0_141 = arith.constant 0 : index
    %393 = vector.load %arg10[%c24, %c0_141] : memref<51x32xf32, #tpu.memory_space<vmem>>, vector<1x32xf32>
    %c25 = arith.constant 25 : index
    %c0_142 = arith.constant 0 : index
    %394 = vector.load %arg10[%c25, %c0_142] : memref<51x32xf32, #tpu.memory_space<vmem>>, vector<1x32xf32>
    %cst_143 = arith.constant dense<0.000000e+00> : vector<4xf32>
    %395 = vector.multi_reduction <add>, %392, %cst_143 [1] : vector<4x32xf32> to vector<4xf32>
    %396 = vector.shape_cast %395 : vector<4xf32> to vector<4x1xf32>
    %cst_144 = arith.constant 3.200000e+01 : f32
    %397 = vector.broadcast %cst_144 : f32 to vector<4x1xf32>
    %398 = arith.divf %396, %397 : vector<4x1xf32>
    %399 = vector.broadcast %398 : vector<4x1xf32> to vector<4x32xf32>
    %400 = arith.subf %392, %399 : vector<4x32xf32>
    %401 = arith.mulf %400, %400 : vector<4x32xf32>
    %cst_145 = arith.constant dense<0.000000e+00> : vector<4xf32>
    %402 = vector.multi_reduction <add>, %401, %cst_145 [1] : vector<4x32xf32> to vector<4xf32>
    %403 = vector.shape_cast %402 : vector<4xf32> to vector<4x1xf32>
    %cst_146 = arith.constant 3.200000e+01 : f32
    %404 = vector.broadcast %cst_146 : f32 to vector<4x1xf32>
    %405 = arith.divf %403, %404 : vector<4x1xf32>
    %406 = vector.broadcast %398 : vector<4x1xf32> to vector<4x32xf32>
    %407 = arith.subf %392, %406 : vector<4x32xf32>
    %cst_147 = arith.constant 9.99999996E-13 : f32
    %408 = vector.broadcast %cst_147 : f32 to vector<4x1xf32>
    %409 = arith.addf %405, %408 : vector<4x1xf32>
    %410 = math.rsqrt %409 : vector<4x1xf32>
    %411 = vector.broadcast %410 : vector<4x1xf32> to vector<4x32xf32>
    %412 = arith.mulf %407, %411 : vector<4x32xf32>
    %413 = vector.broadcast %393 : vector<1x32xf32> to vector<4x32xf32>
    %414 = arith.mulf %412, %413 : vector<4x32xf32>
    %415 = vector.broadcast %394 : vector<1x32xf32> to vector<4x32xf32>
    %416 = arith.addf %414, %415 : vector<4x32xf32>
    %c0_148 = arith.constant 0 : index
    %c384 = arith.constant 384 : index
    %417 = vector.load %arg6[%c0_148, %c384] : memref<32x928xf32, #tpu.memory_space<vmem>>, vector<32x32xf32>
    %c26 = arith.constant 26 : index
    %c0_149 = arith.constant 0 : index
    %418 = vector.load %arg10[%c26, %c0_149] : memref<51x32xf32, #tpu.memory_space<vmem>>, vector<1x32xf32>
    %cst_150 = arith.constant dense<0.000000e+00> : vector<8x32xf32>
    %419 = tpu.matmul %255, %417, %cst_150 {dimension_numbers = #tpu.dot_dimension_numbers<[1], [0], [0], [1], [0, 0, 1, 1], [], []>} : vector<8x32xf32>, vector<32x32xf32>, vector<8x32xf32> -> vector<8x32xf32>
    %420 = vector.broadcast %418 : vector<1x32xf32> to vector<8x32xf32>
    %421 = arith.addf %419, %420 : vector<8x32xf32>
    %c0_151 = arith.constant 0 : index
    %c416 = arith.constant 416 : index
    %422 = vector.load %arg6[%c0_151, %c416] : memref<32x928xf32, #tpu.memory_space<vmem>>, vector<32x64xf32>
    %cst_152 = arith.constant dense<0.000000e+00> : vector<4x64xf32>
    %423 = tpu.matmul %416, %422, %cst_152 {dimension_numbers = #tpu.dot_dimension_numbers<[1], [0], [0], [1], [0, 0, 1, 1], [], []>} : vector<4x32xf32>, vector<32x64xf32>, vector<4x64xf32> -> vector<4x64xf32>
    %424 = vector.extract_strided_slice %423 {offsets = [0, 0], sizes = [4, 32], strides = [1, 1]} : vector<4x64xf32> to vector<4x32xf32>
    %c27 = arith.constant 27 : index
    %c0_153 = arith.constant 0 : index
    %425 = vector.load %arg10[%c27, %c0_153] : memref<51x32xf32, #tpu.memory_space<vmem>>, vector<1x32xf32>
    %426 = vector.broadcast %425 : vector<1x32xf32> to vector<4x32xf32>
    %427 = arith.addf %424, %426 : vector<4x32xf32>
    %428 = vector.extract_strided_slice %423 {offsets = [0, 32], sizes = [4, 32], strides = [1, 1]} : vector<4x64xf32> to vector<4x32xf32>
    %c28 = arith.constant 28 : index
    %c0_154 = arith.constant 0 : index
    %429 = vector.load %arg10[%c28, %c0_154] : memref<51x32xf32, #tpu.memory_space<vmem>>, vector<1x32xf32>
    %430 = vector.broadcast %429 : vector<1x32xf32> to vector<4x32xf32>
    %431 = arith.addf %428, %430 : vector<4x32xf32>
    %c0_155 = arith.constant 0 : index
    %c480 = arith.constant 480 : index
    %432 = vector.load %arg6[%c0_155, %c480] : memref<32x928xf32, #tpu.memory_space<vmem>>, vector<32x32xf32>
    %433 = vector.extract_strided_slice %421 {offsets = [0, 0], sizes = [8, 8], strides = [1, 1]} : vector<8x32xf32> to vector<8x8xf32>
    %434 = vector.extract_strided_slice %427 {offsets = [0, 0], sizes = [4, 8], strides = [1, 1]} : vector<4x32xf32> to vector<4x8xf32>
    %cst_156 = arith.constant dense<0.000000e+00> : vector<8x4xf32>
    %435 = tpu.matmul %433, %434, %cst_156 {dimension_numbers = #tpu.dot_dimension_numbers<[1], [1], [0], [0], [0, 0, 1, 0], [], []>} : vector<8x8xf32>, vector<4x8xf32>, vector<8x4xf32> -> vector<8x4xf32>
    %436 = vector.broadcast %94 : vector<1x4xf32> to vector<8x4xf32>
    %437 = arith.addf %435, %436 : vector<8x4xf32>
    %cst_157 = arith.constant dense<0xFF800000> : vector<8xf32>
    %438 = vector.multi_reduction <maximumf>, %437, %cst_157 [1] : vector<8x4xf32> to vector<8xf32>
    %439 = vector.shape_cast %438 : vector<8xf32> to vector<8x1xf32>
    %440 = vector.broadcast %439 : vector<8x1xf32> to vector<8x4xf32>
    %441 = arith.subf %437, %440 : vector<8x4xf32>
    %442 = math.exp %441 : vector<8x4xf32>
    %cst_158 = arith.constant dense<0.000000e+00> : vector<8xf32>
    %443 = vector.multi_reduction <add>, %442, %cst_158 [1] : vector<8x4xf32> to vector<8xf32>
    %444 = vector.shape_cast %443 : vector<8xf32> to vector<8x1xf32>
    %445 = vector.broadcast %444 : vector<8x1xf32> to vector<8x4xf32>
    %446 = arith.divf %442, %445 : vector<8x4xf32>
    %447 = vector.extract_strided_slice %431 {offsets = [0, 0], sizes = [4, 8], strides = [1, 1]} : vector<4x32xf32> to vector<4x8xf32>
    %cst_159 = arith.constant dense<0.000000e+00> : vector<8x8xf32>
    %448 = tpu.matmul %446, %447, %cst_159 {dimension_numbers = #tpu.dot_dimension_numbers<[1], [0], [0], [1], [0, 0, 1, 1], [], []>} : vector<8x4xf32>, vector<4x8xf32>, vector<8x8xf32> -> vector<8x8xf32>
    %449 = vector.extract_strided_slice %432 {offsets = [0, 0], sizes = [8, 32], strides = [1, 1]} : vector<32x32xf32> to vector<8x32xf32>
    %cst_160 = arith.constant dense<0.000000e+00> : vector<8x32xf32>
    %450 = tpu.matmul %448, %449, %cst_160 {dimension_numbers = #tpu.dot_dimension_numbers<[1], [0], [0], [1], [0, 0, 1, 1], [], []>} : vector<8x8xf32>, vector<8x32xf32>, vector<8x32xf32> -> vector<8x32xf32>
    %451 = vector.extract_strided_slice %421 {offsets = [0, 8], sizes = [8, 8], strides = [1, 1]} : vector<8x32xf32> to vector<8x8xf32>
    %452 = vector.extract_strided_slice %427 {offsets = [0, 8], sizes = [4, 8], strides = [1, 1]} : vector<4x32xf32> to vector<4x8xf32>
    %cst_161 = arith.constant dense<0.000000e+00> : vector<8x4xf32>
    %453 = tpu.matmul %451, %452, %cst_161 {dimension_numbers = #tpu.dot_dimension_numbers<[1], [1], [0], [0], [0, 0, 1, 0], [], []>} : vector<8x8xf32>, vector<4x8xf32>, vector<8x4xf32> -> vector<8x4xf32>
    %454 = vector.broadcast %94 : vector<1x4xf32> to vector<8x4xf32>
    %455 = arith.addf %453, %454 : vector<8x4xf32>
    %cst_162 = arith.constant dense<0xFF800000> : vector<8xf32>
    %456 = vector.multi_reduction <maximumf>, %455, %cst_162 [1] : vector<8x4xf32> to vector<8xf32>
    %457 = vector.shape_cast %456 : vector<8xf32> to vector<8x1xf32>
    %458 = vector.broadcast %457 : vector<8x1xf32> to vector<8x4xf32>
    %459 = arith.subf %455, %458 : vector<8x4xf32>
    %460 = math.exp %459 : vector<8x4xf32>
    %cst_163 = arith.constant dense<0.000000e+00> : vector<8xf32>
    %461 = vector.multi_reduction <add>, %460, %cst_163 [1] : vector<8x4xf32> to vector<8xf32>
    %462 = vector.shape_cast %461 : vector<8xf32> to vector<8x1xf32>
    %463 = vector.broadcast %462 : vector<8x1xf32> to vector<8x4xf32>
    %464 = arith.divf %460, %463 : vector<8x4xf32>
    %465 = vector.extract_strided_slice %431 {offsets = [0, 8], sizes = [4, 8], strides = [1, 1]} : vector<4x32xf32> to vector<4x8xf32>
    %cst_164 = arith.constant dense<0.000000e+00> : vector<8x8xf32>
    %466 = tpu.matmul %464, %465, %cst_164 {dimension_numbers = #tpu.dot_dimension_numbers<[1], [0], [0], [1], [0, 0, 1, 1], [], []>} : vector<8x4xf32>, vector<4x8xf32>, vector<8x8xf32> -> vector<8x8xf32>
    %467 = vector.extract_strided_slice %432 {offsets = [8, 0], sizes = [8, 32], strides = [1, 1]} : vector<32x32xf32> to vector<8x32xf32>
    %cst_165 = arith.constant dense<0.000000e+00> : vector<8x32xf32>
    %468 = tpu.matmul %466, %467, %cst_165 {dimension_numbers = #tpu.dot_dimension_numbers<[1], [0], [0], [1], [0, 0, 1, 1], [], []>} : vector<8x8xf32>, vector<8x32xf32>, vector<8x32xf32> -> vector<8x32xf32>
    %469 = arith.addf %450, %468 : vector<8x32xf32>
    %470 = vector.extract_strided_slice %421 {offsets = [0, 16], sizes = [8, 8], strides = [1, 1]} : vector<8x32xf32> to vector<8x8xf32>
    %471 = vector.extract_strided_slice %427 {offsets = [0, 16], sizes = [4, 8], strides = [1, 1]} : vector<4x32xf32> to vector<4x8xf32>
    %cst_166 = arith.constant dense<0.000000e+00> : vector<8x4xf32>
    %472 = tpu.matmul %470, %471, %cst_166 {dimension_numbers = #tpu.dot_dimension_numbers<[1], [1], [0], [0], [0, 0, 1, 0], [], []>} : vector<8x8xf32>, vector<4x8xf32>, vector<8x4xf32> -> vector<8x4xf32>
    %473 = vector.broadcast %94 : vector<1x4xf32> to vector<8x4xf32>
    %474 = arith.addf %472, %473 : vector<8x4xf32>
    %cst_167 = arith.constant dense<0xFF800000> : vector<8xf32>
    %475 = vector.multi_reduction <maximumf>, %474, %cst_167 [1] : vector<8x4xf32> to vector<8xf32>
    %476 = vector.shape_cast %475 : vector<8xf32> to vector<8x1xf32>
    %477 = vector.broadcast %476 : vector<8x1xf32> to vector<8x4xf32>
    %478 = arith.subf %474, %477 : vector<8x4xf32>
    %479 = math.exp %478 : vector<8x4xf32>
    %cst_168 = arith.constant dense<0.000000e+00> : vector<8xf32>
    %480 = vector.multi_reduction <add>, %479, %cst_168 [1] : vector<8x4xf32> to vector<8xf32>
    %481 = vector.shape_cast %480 : vector<8xf32> to vector<8x1xf32>
    %482 = vector.broadcast %481 : vector<8x1xf32> to vector<8x4xf32>
    %483 = arith.divf %479, %482 : vector<8x4xf32>
    %484 = vector.extract_strided_slice %431 {offsets = [0, 16], sizes = [4, 8], strides = [1, 1]} : vector<4x32xf32> to vector<4x8xf32>
    %cst_169 = arith.constant dense<0.000000e+00> : vector<8x8xf32>
    %485 = tpu.matmul %483, %484, %cst_169 {dimension_numbers = #tpu.dot_dimension_numbers<[1], [0], [0], [1], [0, 0, 1, 1], [], []>} : vector<8x4xf32>, vector<4x8xf32>, vector<8x8xf32> -> vector<8x8xf32>
    %486 = vector.extract_strided_slice %432 {offsets = [16, 0], sizes = [8, 32], strides = [1, 1]} : vector<32x32xf32> to vector<8x32xf32>
    %cst_170 = arith.constant dense<0.000000e+00> : vector<8x32xf32>
    %487 = tpu.matmul %485, %486, %cst_170 {dimension_numbers = #tpu.dot_dimension_numbers<[1], [0], [0], [1], [0, 0, 1, 1], [], []>} : vector<8x8xf32>, vector<8x32xf32>, vector<8x32xf32> -> vector<8x32xf32>
    %488 = arith.addf %469, %487 : vector<8x32xf32>
    %489 = vector.extract_strided_slice %421 {offsets = [0, 24], sizes = [8, 8], strides = [1, 1]} : vector<8x32xf32> to vector<8x8xf32>
    %490 = vector.extract_strided_slice %427 {offsets = [0, 24], sizes = [4, 8], strides = [1, 1]} : vector<4x32xf32> to vector<4x8xf32>
    %cst_171 = arith.constant dense<0.000000e+00> : vector<8x4xf32>
    %491 = tpu.matmul %489, %490, %cst_171 {dimension_numbers = #tpu.dot_dimension_numbers<[1], [1], [0], [0], [0, 0, 1, 0], [], []>} : vector<8x8xf32>, vector<4x8xf32>, vector<8x4xf32> -> vector<8x4xf32>
    %492 = vector.broadcast %94 : vector<1x4xf32> to vector<8x4xf32>
    %493 = arith.addf %491, %492 : vector<8x4xf32>
    %cst_172 = arith.constant dense<0xFF800000> : vector<8xf32>
    %494 = vector.multi_reduction <maximumf>, %493, %cst_172 [1] : vector<8x4xf32> to vector<8xf32>
    %495 = vector.shape_cast %494 : vector<8xf32> to vector<8x1xf32>
    %496 = vector.broadcast %495 : vector<8x1xf32> to vector<8x4xf32>
    %497 = arith.subf %493, %496 : vector<8x4xf32>
    %498 = math.exp %497 : vector<8x4xf32>
    %cst_173 = arith.constant dense<0.000000e+00> : vector<8xf32>
    %499 = vector.multi_reduction <add>, %498, %cst_173 [1] : vector<8x4xf32> to vector<8xf32>
    %500 = vector.shape_cast %499 : vector<8xf32> to vector<8x1xf32>
    %501 = vector.broadcast %500 : vector<8x1xf32> to vector<8x4xf32>
    %502 = arith.divf %498, %501 : vector<8x4xf32>
    %503 = vector.extract_strided_slice %431 {offsets = [0, 24], sizes = [4, 8], strides = [1, 1]} : vector<4x32xf32> to vector<4x8xf32>
    %cst_174 = arith.constant dense<0.000000e+00> : vector<8x8xf32>
    %504 = tpu.matmul %502, %503, %cst_174 {dimension_numbers = #tpu.dot_dimension_numbers<[1], [0], [0], [1], [0, 0, 1, 1], [], []>} : vector<8x4xf32>, vector<4x8xf32>, vector<8x8xf32> -> vector<8x8xf32>
    %505 = vector.extract_strided_slice %432 {offsets = [24, 0], sizes = [8, 32], strides = [1, 1]} : vector<32x32xf32> to vector<8x32xf32>
    %cst_175 = arith.constant dense<0.000000e+00> : vector<8x32xf32>
    %506 = tpu.matmul %504, %505, %cst_175 {dimension_numbers = #tpu.dot_dimension_numbers<[1], [0], [0], [1], [0, 0, 1, 1], [], []>} : vector<8x8xf32>, vector<8x32xf32>, vector<8x32xf32> -> vector<8x32xf32>
    %507 = arith.addf %488, %506 : vector<8x32xf32>
    %c29 = arith.constant 29 : index
    %c0_176 = arith.constant 0 : index
    %508 = vector.load %arg10[%c29, %c0_176] : memref<51x32xf32, #tpu.memory_space<vmem>>, vector<1x32xf32>
    %509 = vector.broadcast %508 : vector<1x32xf32> to vector<8x32xf32>
    %510 = arith.addf %507, %509 : vector<8x32xf32>
    %511 = arith.addf %255, %510 : vector<8x32xf32>
    %c30 = arith.constant 30 : index
    %c0_177 = arith.constant 0 : index
    %512 = vector.load %arg10[%c30, %c0_177] : memref<51x32xf32, #tpu.memory_space<vmem>>, vector<1x32xf32>
    %c31 = arith.constant 31 : index
    %c0_178 = arith.constant 0 : index
    %513 = vector.load %arg10[%c31, %c0_178] : memref<51x32xf32, #tpu.memory_space<vmem>>, vector<1x32xf32>
    %cst_179 = arith.constant dense<0.000000e+00> : vector<8xf32>
    %514 = vector.multi_reduction <add>, %511, %cst_179 [1] : vector<8x32xf32> to vector<8xf32>
    %515 = vector.shape_cast %514 : vector<8xf32> to vector<8x1xf32>
    %cst_180 = arith.constant 3.200000e+01 : f32
    %516 = vector.broadcast %cst_180 : f32 to vector<8x1xf32>
    %517 = arith.divf %515, %516 : vector<8x1xf32>
    %518 = vector.broadcast %517 : vector<8x1xf32> to vector<8x32xf32>
    %519 = arith.subf %511, %518 : vector<8x32xf32>
    %520 = arith.mulf %519, %519 : vector<8x32xf32>
    %cst_181 = arith.constant dense<0.000000e+00> : vector<8xf32>
    %521 = vector.multi_reduction <add>, %520, %cst_181 [1] : vector<8x32xf32> to vector<8xf32>
    %522 = vector.shape_cast %521 : vector<8xf32> to vector<8x1xf32>
    %cst_182 = arith.constant 3.200000e+01 : f32
    %523 = vector.broadcast %cst_182 : f32 to vector<8x1xf32>
    %524 = arith.divf %522, %523 : vector<8x1xf32>
    %525 = vector.broadcast %517 : vector<8x1xf32> to vector<8x32xf32>
    %526 = arith.subf %511, %525 : vector<8x32xf32>
    %cst_183 = arith.constant 9.99999996E-13 : f32
    %527 = vector.broadcast %cst_183 : f32 to vector<8x1xf32>
    %528 = arith.addf %524, %527 : vector<8x1xf32>
    %529 = math.rsqrt %528 : vector<8x1xf32>
    %530 = vector.broadcast %529 : vector<8x1xf32> to vector<8x32xf32>
    %531 = arith.mulf %526, %530 : vector<8x32xf32>
    %532 = vector.broadcast %512 : vector<1x32xf32> to vector<8x32xf32>
    %533 = arith.mulf %531, %532 : vector<8x32xf32>
    %534 = vector.broadcast %513 : vector<1x32xf32> to vector<8x32xf32>
    %535 = arith.addf %533, %534 : vector<8x32xf32>
    %c0_184 = arith.constant 0 : index
    %c512 = arith.constant 512 : index
    %536 = vector.load %arg6[%c0_184, %c512] : memref<32x928xf32, #tpu.memory_space<vmem>>, vector<32x96xf32>
    %cst_185 = arith.constant dense<0.000000e+00> : vector<8x96xf32>
    %537 = tpu.matmul %535, %536, %cst_185 {dimension_numbers = #tpu.dot_dimension_numbers<[1], [0], [0], [1], [0, 0, 1, 1], [], []>} : vector<8x32xf32>, vector<32x96xf32>, vector<8x96xf32> -> vector<8x96xf32>
    %538 = vector.extract_strided_slice %537 {offsets = [0, 0], sizes = [8, 32], strides = [1, 1]} : vector<8x96xf32> to vector<8x32xf32>
    %c32_186 = arith.constant 32 : index
    %c0_187 = arith.constant 0 : index
    %539 = vector.load %arg10[%c32_186, %c0_187] : memref<51x32xf32, #tpu.memory_space<vmem>>, vector<1x32xf32>
    %540 = vector.broadcast %539 : vector<1x32xf32> to vector<8x32xf32>
    %541 = arith.addf %538, %540 : vector<8x32xf32>
    %542 = vector.extract_strided_slice %537 {offsets = [0, 32], sizes = [8, 32], strides = [1, 1]} : vector<8x96xf32> to vector<8x32xf32>
    %c33 = arith.constant 33 : index
    %c0_188 = arith.constant 0 : index
    %543 = vector.load %arg10[%c33, %c0_188] : memref<51x32xf32, #tpu.memory_space<vmem>>, vector<1x32xf32>
    %544 = vector.broadcast %543 : vector<1x32xf32> to vector<8x32xf32>
    %545 = arith.addf %542, %544 : vector<8x32xf32>
    %546 = vector.extract_strided_slice %537 {offsets = [0, 64], sizes = [8, 32], strides = [1, 1]} : vector<8x96xf32> to vector<8x32xf32>
    %c34 = arith.constant 34 : index
    %c0_189 = arith.constant 0 : index
    %547 = vector.load %arg10[%c34, %c0_189] : memref<51x32xf32, #tpu.memory_space<vmem>>, vector<1x32xf32>
    %548 = vector.broadcast %547 : vector<1x32xf32> to vector<8x32xf32>
    %549 = arith.addf %546, %548 : vector<8x32xf32>
    %c0_190 = arith.constant 0 : index
    %c608 = arith.constant 608 : index
    %550 = vector.load %arg6[%c0_190, %c608] : memref<32x928xf32, #tpu.memory_space<vmem>>, vector<32x32xf32>
    %551 = vector.extract_strided_slice %541 {offsets = [0, 0], sizes = [8, 8], strides = [1, 1]} : vector<8x32xf32> to vector<8x8xf32>
    %552 = vector.extract_strided_slice %545 {offsets = [0, 0], sizes = [8, 8], strides = [1, 1]} : vector<8x32xf32> to vector<8x8xf32>
    %cst_191 = arith.constant dense<0.000000e+00> : vector<8x8xf32>
    %553 = tpu.matmul %551, %552, %cst_191 {dimension_numbers = #tpu.dot_dimension_numbers<[1], [1], [0], [0], [0, 0, 1, 0], [], []>} : vector<8x8xf32>, vector<8x8xf32>, vector<8x8xf32> -> vector<8x8xf32>
    %554 = vector.broadcast %92 : vector<1x8xf32> to vector<8x8xf32>
    %555 = arith.addf %553, %554 : vector<8x8xf32>
    %cst_192 = arith.constant dense<0xFF800000> : vector<8xf32>
    %556 = vector.multi_reduction <maximumf>, %555, %cst_192 [1] : vector<8x8xf32> to vector<8xf32>
    %557 = vector.shape_cast %556 : vector<8xf32> to vector<8x1xf32>
    %558 = vector.broadcast %557 : vector<8x1xf32> to vector<8x8xf32>
    %559 = arith.subf %555, %558 : vector<8x8xf32>
    %560 = math.exp %559 : vector<8x8xf32>
    %cst_193 = arith.constant dense<0.000000e+00> : vector<8xf32>
    %561 = vector.multi_reduction <add>, %560, %cst_193 [1] : vector<8x8xf32> to vector<8xf32>
    %562 = vector.shape_cast %561 : vector<8xf32> to vector<8x1xf32>
    %563 = vector.broadcast %562 : vector<8x1xf32> to vector<8x8xf32>
    %564 = arith.divf %560, %563 : vector<8x8xf32>
    %565 = vector.extract_strided_slice %549 {offsets = [0, 0], sizes = [8, 8], strides = [1, 1]} : vector<8x32xf32> to vector<8x8xf32>
    %cst_194 = arith.constant dense<0.000000e+00> : vector<8x8xf32>
    %566 = tpu.matmul %564, %565, %cst_194 {dimension_numbers = #tpu.dot_dimension_numbers<[1], [0], [0], [1], [0, 0, 1, 1], [], []>} : vector<8x8xf32>, vector<8x8xf32>, vector<8x8xf32> -> vector<8x8xf32>
    %567 = vector.extract_strided_slice %550 {offsets = [0, 0], sizes = [8, 32], strides = [1, 1]} : vector<32x32xf32> to vector<8x32xf32>
    %cst_195 = arith.constant dense<0.000000e+00> : vector<8x32xf32>
    %568 = tpu.matmul %566, %567, %cst_195 {dimension_numbers = #tpu.dot_dimension_numbers<[1], [0], [0], [1], [0, 0, 1, 1], [], []>} : vector<8x8xf32>, vector<8x32xf32>, vector<8x32xf32> -> vector<8x32xf32>
    %569 = vector.extract_strided_slice %541 {offsets = [0, 8], sizes = [8, 8], strides = [1, 1]} : vector<8x32xf32> to vector<8x8xf32>
    %570 = vector.extract_strided_slice %545 {offsets = [0, 8], sizes = [8, 8], strides = [1, 1]} : vector<8x32xf32> to vector<8x8xf32>
    %cst_196 = arith.constant dense<0.000000e+00> : vector<8x8xf32>
    %571 = tpu.matmul %569, %570, %cst_196 {dimension_numbers = #tpu.dot_dimension_numbers<[1], [1], [0], [0], [0, 0, 1, 0], [], []>} : vector<8x8xf32>, vector<8x8xf32>, vector<8x8xf32> -> vector<8x8xf32>
    %572 = vector.broadcast %92 : vector<1x8xf32> to vector<8x8xf32>
    %573 = arith.addf %571, %572 : vector<8x8xf32>
    %cst_197 = arith.constant dense<0xFF800000> : vector<8xf32>
    %574 = vector.multi_reduction <maximumf>, %573, %cst_197 [1] : vector<8x8xf32> to vector<8xf32>
    %575 = vector.shape_cast %574 : vector<8xf32> to vector<8x1xf32>
    %576 = vector.broadcast %575 : vector<8x1xf32> to vector<8x8xf32>
    %577 = arith.subf %573, %576 : vector<8x8xf32>
    %578 = math.exp %577 : vector<8x8xf32>
    %cst_198 = arith.constant dense<0.000000e+00> : vector<8xf32>
    %579 = vector.multi_reduction <add>, %578, %cst_198 [1] : vector<8x8xf32> to vector<8xf32>
    %580 = vector.shape_cast %579 : vector<8xf32> to vector<8x1xf32>
    %581 = vector.broadcast %580 : vector<8x1xf32> to vector<8x8xf32>
    %582 = arith.divf %578, %581 : vector<8x8xf32>
    %583 = vector.extract_strided_slice %549 {offsets = [0, 8], sizes = [8, 8], strides = [1, 1]} : vector<8x32xf32> to vector<8x8xf32>
    %cst_199 = arith.constant dense<0.000000e+00> : vector<8x8xf32>
    %584 = tpu.matmul %582, %583, %cst_199 {dimension_numbers = #tpu.dot_dimension_numbers<[1], [0], [0], [1], [0, 0, 1, 1], [], []>} : vector<8x8xf32>, vector<8x8xf32>, vector<8x8xf32> -> vector<8x8xf32>
    %585 = vector.extract_strided_slice %550 {offsets = [8, 0], sizes = [8, 32], strides = [1, 1]} : vector<32x32xf32> to vector<8x32xf32>
    %cst_200 = arith.constant dense<0.000000e+00> : vector<8x32xf32>
    %586 = tpu.matmul %584, %585, %cst_200 {dimension_numbers = #tpu.dot_dimension_numbers<[1], [0], [0], [1], [0, 0, 1, 1], [], []>} : vector<8x8xf32>, vector<8x32xf32>, vector<8x32xf32> -> vector<8x32xf32>
    %587 = arith.addf %568, %586 : vector<8x32xf32>
    %588 = vector.extract_strided_slice %541 {offsets = [0, 16], sizes = [8, 8], strides = [1, 1]} : vector<8x32xf32> to vector<8x8xf32>
    %589 = vector.extract_strided_slice %545 {offsets = [0, 16], sizes = [8, 8], strides = [1, 1]} : vector<8x32xf32> to vector<8x8xf32>
    %cst_201 = arith.constant dense<0.000000e+00> : vector<8x8xf32>
    %590 = tpu.matmul %588, %589, %cst_201 {dimension_numbers = #tpu.dot_dimension_numbers<[1], [1], [0], [0], [0, 0, 1, 0], [], []>} : vector<8x8xf32>, vector<8x8xf32>, vector<8x8xf32> -> vector<8x8xf32>
    %591 = vector.broadcast %92 : vector<1x8xf32> to vector<8x8xf32>
    %592 = arith.addf %590, %591 : vector<8x8xf32>
    %cst_202 = arith.constant dense<0xFF800000> : vector<8xf32>
    %593 = vector.multi_reduction <maximumf>, %592, %cst_202 [1] : vector<8x8xf32> to vector<8xf32>
    %594 = vector.shape_cast %593 : vector<8xf32> to vector<8x1xf32>
    %595 = vector.broadcast %594 : vector<8x1xf32> to vector<8x8xf32>
    %596 = arith.subf %592, %595 : vector<8x8xf32>
    %597 = math.exp %596 : vector<8x8xf32>
    %cst_203 = arith.constant dense<0.000000e+00> : vector<8xf32>
    %598 = vector.multi_reduction <add>, %597, %cst_203 [1] : vector<8x8xf32> to vector<8xf32>
    %599 = vector.shape_cast %598 : vector<8xf32> to vector<8x1xf32>
    %600 = vector.broadcast %599 : vector<8x1xf32> to vector<8x8xf32>
    %601 = arith.divf %597, %600 : vector<8x8xf32>
    %602 = vector.extract_strided_slice %549 {offsets = [0, 16], sizes = [8, 8], strides = [1, 1]} : vector<8x32xf32> to vector<8x8xf32>
    %cst_204 = arith.constant dense<0.000000e+00> : vector<8x8xf32>
    %603 = tpu.matmul %601, %602, %cst_204 {dimension_numbers = #tpu.dot_dimension_numbers<[1], [0], [0], [1], [0, 0, 1, 1], [], []>} : vector<8x8xf32>, vector<8x8xf32>, vector<8x8xf32> -> vector<8x8xf32>
    %604 = vector.extract_strided_slice %550 {offsets = [16, 0], sizes = [8, 32], strides = [1, 1]} : vector<32x32xf32> to vector<8x32xf32>
    %cst_205 = arith.constant dense<0.000000e+00> : vector<8x32xf32>
    %605 = tpu.matmul %603, %604, %cst_205 {dimension_numbers = #tpu.dot_dimension_numbers<[1], [0], [0], [1], [0, 0, 1, 1], [], []>} : vector<8x8xf32>, vector<8x32xf32>, vector<8x32xf32> -> vector<8x32xf32>
    %606 = arith.addf %587, %605 : vector<8x32xf32>
    %607 = vector.extract_strided_slice %541 {offsets = [0, 24], sizes = [8, 8], strides = [1, 1]} : vector<8x32xf32> to vector<8x8xf32>
    %608 = vector.extract_strided_slice %545 {offsets = [0, 24], sizes = [8, 8], strides = [1, 1]} : vector<8x32xf32> to vector<8x8xf32>
    %cst_206 = arith.constant dense<0.000000e+00> : vector<8x8xf32>
    %609 = tpu.matmul %607, %608, %cst_206 {dimension_numbers = #tpu.dot_dimension_numbers<[1], [1], [0], [0], [0, 0, 1, 0], [], []>} : vector<8x8xf32>, vector<8x8xf32>, vector<8x8xf32> -> vector<8x8xf32>
    %610 = vector.broadcast %92 : vector<1x8xf32> to vector<8x8xf32>
    %611 = arith.addf %609, %610 : vector<8x8xf32>
    %cst_207 = arith.constant dense<0xFF800000> : vector<8xf32>
    %612 = vector.multi_reduction <maximumf>, %611, %cst_207 [1] : vector<8x8xf32> to vector<8xf32>
    %613 = vector.shape_cast %612 : vector<8xf32> to vector<8x1xf32>
    %614 = vector.broadcast %613 : vector<8x1xf32> to vector<8x8xf32>
    %615 = arith.subf %611, %614 : vector<8x8xf32>
    %616 = math.exp %615 : vector<8x8xf32>
    %cst_208 = arith.constant dense<0.000000e+00> : vector<8xf32>
    %617 = vector.multi_reduction <add>, %616, %cst_208 [1] : vector<8x8xf32> to vector<8xf32>
    %618 = vector.shape_cast %617 : vector<8xf32> to vector<8x1xf32>
    %619 = vector.broadcast %618 : vector<8x1xf32> to vector<8x8xf32>
    %620 = arith.divf %616, %619 : vector<8x8xf32>
    %621 = vector.extract_strided_slice %549 {offsets = [0, 24], sizes = [8, 8], strides = [1, 1]} : vector<8x32xf32> to vector<8x8xf32>
    %cst_209 = arith.constant dense<0.000000e+00> : vector<8x8xf32>
    %622 = tpu.matmul %620, %621, %cst_209 {dimension_numbers = #tpu.dot_dimension_numbers<[1], [0], [0], [1], [0, 0, 1, 1], [], []>} : vector<8x8xf32>, vector<8x8xf32>, vector<8x8xf32> -> vector<8x8xf32>
    %623 = vector.extract_strided_slice %550 {offsets = [24, 0], sizes = [8, 32], strides = [1, 1]} : vector<32x32xf32> to vector<8x32xf32>
    %cst_210 = arith.constant dense<0.000000e+00> : vector<8x32xf32>
    %624 = tpu.matmul %622, %623, %cst_210 {dimension_numbers = #tpu.dot_dimension_numbers<[1], [0], [0], [1], [0, 0, 1, 1], [], []>} : vector<8x8xf32>, vector<8x32xf32>, vector<8x32xf32> -> vector<8x32xf32>
    %625 = arith.addf %606, %624 : vector<8x32xf32>
    %c35 = arith.constant 35 : index
    %c0_211 = arith.constant 0 : index
    %626 = vector.load %arg10[%c35, %c0_211] : memref<51x32xf32, #tpu.memory_space<vmem>>, vector<1x32xf32>
    %627 = vector.broadcast %626 : vector<1x32xf32> to vector<8x32xf32>
    %628 = arith.addf %625, %627 : vector<8x32xf32>
    %629 = arith.addf %535, %628 : vector<8x32xf32>
    %c36 = arith.constant 36 : index
    %c0_212 = arith.constant 0 : index
    %630 = vector.load %arg10[%c36, %c0_212] : memref<51x32xf32, #tpu.memory_space<vmem>>, vector<1x32xf32>
    %c37 = arith.constant 37 : index
    %c0_213 = arith.constant 0 : index
    %631 = vector.load %arg10[%c37, %c0_213] : memref<51x32xf32, #tpu.memory_space<vmem>>, vector<1x32xf32>
    %cst_214 = arith.constant dense<0.000000e+00> : vector<8xf32>
    %632 = vector.multi_reduction <add>, %629, %cst_214 [1] : vector<8x32xf32> to vector<8xf32>
    %633 = vector.shape_cast %632 : vector<8xf32> to vector<8x1xf32>
    %cst_215 = arith.constant 3.200000e+01 : f32
    %634 = vector.broadcast %cst_215 : f32 to vector<8x1xf32>
    %635 = arith.divf %633, %634 : vector<8x1xf32>
    %636 = vector.broadcast %635 : vector<8x1xf32> to vector<8x32xf32>
    %637 = arith.subf %629, %636 : vector<8x32xf32>
    %638 = arith.mulf %637, %637 : vector<8x32xf32>
    %cst_216 = arith.constant dense<0.000000e+00> : vector<8xf32>
    %639 = vector.multi_reduction <add>, %638, %cst_216 [1] : vector<8x32xf32> to vector<8xf32>
    %640 = vector.shape_cast %639 : vector<8xf32> to vector<8x1xf32>
    %cst_217 = arith.constant 3.200000e+01 : f32
    %641 = vector.broadcast %cst_217 : f32 to vector<8x1xf32>
    %642 = arith.divf %640, %641 : vector<8x1xf32>
    %643 = vector.broadcast %635 : vector<8x1xf32> to vector<8x32xf32>
    %644 = arith.subf %629, %643 : vector<8x32xf32>
    %cst_218 = arith.constant 9.99999996E-13 : f32
    %645 = vector.broadcast %cst_218 : f32 to vector<8x1xf32>
    %646 = arith.addf %642, %645 : vector<8x1xf32>
    %647 = math.rsqrt %646 : vector<8x1xf32>
    %648 = vector.broadcast %647 : vector<8x1xf32> to vector<8x32xf32>
    %649 = arith.mulf %644, %648 : vector<8x32xf32>
    %650 = vector.broadcast %630 : vector<1x32xf32> to vector<8x32xf32>
    %651 = arith.mulf %649, %650 : vector<8x32xf32>
    %652 = vector.broadcast %631 : vector<1x32xf32> to vector<8x32xf32>
    %653 = arith.addf %651, %652 : vector<8x32xf32>
    %c0_219 = arith.constant 0 : index
    %c768 = arith.constant 768 : index
    %654 = vector.load %arg6[%c0_219, %c768] : memref<32x928xf32, #tpu.memory_space<vmem>>, vector<32x64xf32>
    %c2_220 = arith.constant 2 : index
    %c0_221 = arith.constant 0 : index
    %655 = vector.load %arg11[%c2_220, %c0_221] : memref<4x64xf32, #tpu.memory_space<vmem>>, vector<1x64xf32>
    %cst_222 = arith.constant dense<0.000000e+00> : vector<8x64xf32>
    %656 = tpu.matmul %653, %654, %cst_222 {dimension_numbers = #tpu.dot_dimension_numbers<[1], [0], [0], [1], [0, 0, 1, 1], [], []>} : vector<8x32xf32>, vector<32x64xf32>, vector<8x64xf32> -> vector<8x64xf32>
    %657 = vector.broadcast %655 : vector<1x64xf32> to vector<8x64xf32>
    %658 = arith.addf %656, %657 : vector<8x64xf32>
    %cst_223 = arith.constant 5.000000e-01 : f32
    %659 = vector.broadcast %cst_223 : f32 to vector<8x64xf32>
    %660 = arith.mulf %659, %658 : vector<8x64xf32>
    %cst_224 = arith.constant 0.707106769 : f32
    %661 = vector.broadcast %cst_224 : f32 to vector<8x64xf32>
    %662 = arith.mulf %658, %661 : vector<8x64xf32>
    %663 = math.erf %662 : vector<8x64xf32>
    %cst_225 = arith.constant 1.000000e+00 : f32
    %664 = vector.broadcast %cst_225 : f32 to vector<8x64xf32>
    %665 = arith.addf %664, %663 : vector<8x64xf32>
    %666 = arith.mulf %660, %665 : vector<8x64xf32>
    %c0_226 = arith.constant 0 : index
    %c64 = arith.constant 64 : index
    %667 = vector.load %arg7[%c0_226, %c64] : memref<64x128xf32, #tpu.memory_space<vmem>>, vector<64x32xf32>
    %c44 = arith.constant 44 : index
    %c0_227 = arith.constant 0 : index
    %668 = vector.load %arg10[%c44, %c0_227] : memref<51x32xf32, #tpu.memory_space<vmem>>, vector<1x32xf32>
    %cst_228 = arith.constant dense<0.000000e+00> : vector<8x32xf32>
    %669 = tpu.matmul %666, %667, %cst_228 {dimension_numbers = #tpu.dot_dimension_numbers<[1], [0], [0], [1], [0, 0, 1, 1], [], []>} : vector<8x64xf32>, vector<64x32xf32>, vector<8x32xf32> -> vector<8x32xf32>
    %670 = vector.broadcast %668 : vector<1x32xf32> to vector<8x32xf32>
    %671 = arith.addf %669, %670 : vector<8x32xf32>
    %672 = arith.addf %653, %671 : vector<8x32xf32>
    %c45 = arith.constant 45 : index
    %c0_229 = arith.constant 0 : index
    %673 = vector.load %arg10[%c45, %c0_229] : memref<51x32xf32, #tpu.memory_space<vmem>>, vector<1x32xf32>
    %c46 = arith.constant 46 : index
    %c0_230 = arith.constant 0 : index
    %674 = vector.load %arg10[%c46, %c0_230] : memref<51x32xf32, #tpu.memory_space<vmem>>, vector<1x32xf32>
    %cst_231 = arith.constant dense<0.000000e+00> : vector<8xf32>
    %675 = vector.multi_reduction <add>, %672, %cst_231 [1] : vector<8x32xf32> to vector<8xf32>
    %676 = vector.shape_cast %675 : vector<8xf32> to vector<8x1xf32>
    %cst_232 = arith.constant 3.200000e+01 : f32
    %677 = vector.broadcast %cst_232 : f32 to vector<8x1xf32>
    %678 = arith.divf %676, %677 : vector<8x1xf32>
    %679 = vector.broadcast %678 : vector<8x1xf32> to vector<8x32xf32>
    %680 = arith.subf %672, %679 : vector<8x32xf32>
    %681 = arith.mulf %680, %680 : vector<8x32xf32>
    %cst_233 = arith.constant dense<0.000000e+00> : vector<8xf32>
    %682 = vector.multi_reduction <add>, %681, %cst_233 [1] : vector<8x32xf32> to vector<8xf32>
    %683 = vector.shape_cast %682 : vector<8xf32> to vector<8x1xf32>
    %cst_234 = arith.constant 3.200000e+01 : f32
    %684 = vector.broadcast %cst_234 : f32 to vector<8x1xf32>
    %685 = arith.divf %683, %684 : vector<8x1xf32>
    %686 = vector.broadcast %678 : vector<8x1xf32> to vector<8x32xf32>
    %687 = arith.subf %672, %686 : vector<8x32xf32>
    %cst_235 = arith.constant 9.99999996E-13 : f32
    %688 = vector.broadcast %cst_235 : f32 to vector<8x1xf32>
    %689 = arith.addf %685, %688 : vector<8x1xf32>
    %690 = math.rsqrt %689 : vector<8x1xf32>
    %691 = vector.broadcast %690 : vector<8x1xf32> to vector<8x32xf32>
    %692 = arith.mulf %687, %691 : vector<8x32xf32>
    %693 = vector.broadcast %673 : vector<1x32xf32> to vector<8x32xf32>
    %694 = arith.mulf %692, %693 : vector<8x32xf32>
    %695 = vector.broadcast %674 : vector<1x32xf32> to vector<8x32xf32>
    %696 = arith.addf %694, %695 : vector<8x32xf32>
    %697 = vector.extract_strided_slice %696 {offsets = [0, 0], sizes = [1, 32], strides = [1, 1]} : vector<8x32xf32> to vector<1x32xf32>
    %c0_236 = arith.constant 0 : index
    %c896 = arith.constant 896 : index
    %698 = vector.load %arg6[%c0_236, %c896] : memref<32x928xf32, #tpu.memory_space<vmem>>, vector<32x32xf32>
    %c50 = arith.constant 50 : index
    %c0_237 = arith.constant 0 : index
    %699 = vector.load %arg10[%c50, %c0_237] : memref<51x32xf32, #tpu.memory_space<vmem>>, vector<1x32xf32>
    %cst_238 = arith.constant dense<0.000000e+00> : vector<1x32xf32>
    %700 = tpu.matmul %697, %698, %cst_238 {dimension_numbers = #tpu.dot_dimension_numbers<[1], [0], [0], [1], [0, 0, 1, 1], [], []>} : vector<1x32xf32>, vector<32x32xf32>, vector<1x32xf32> -> vector<1x32xf32>
    %701 = arith.addf %700, %699 : vector<1x32xf32>
    %702 = math.tanh %701 : vector<1x32xf32>
    %c0_239 = arith.constant 0 : index
    %c0_240 = arith.constant 0 : index
    %c0_241 = arith.constant 0 : index
    %703 = vector.load %arg12[%c0_239, %c0_240, %c0_241] : memref<1x1x32xf32, #tpu.memory_space<vmem>>, vector<1x1x32xf32>
    %704 = vector.shape_cast %703 : vector<1x1x32xf32> to vector<1x32xf32>
    %705 = vector.shape_cast %702 : vector<1x32xf32> to vector<1x1x32xf32>
    tpu.vector_store %arg12[%c0_239, %c0_240, %c0_241], %705 {strides = array<i32>} : memref<1x1x32xf32, #tpu.memory_space<vmem>>, vector<1x1x32xf32>,
    return
  }
  func.func @transform_0(%arg0: i32) -> (i32, i32, i32) {
    %c0_i32 = arith.constant 0 : i32
    %c0_i32_0 = arith.constant 0 : i32
    %c0_i32_1 = arith.constant 0 : i32
    return %arg0, %c0_i32, %c0_i32_0 : i32, i32, i32
  }
  func.func @transform_1(%arg0: i32) -> (i32, i32, i32) {
    %c0_i32 = arith.constant 0 : i32
    %c0_i32_0 = arith.constant 0 : i32
    %c0_i32_1 = arith.constant 0 : i32
    return %arg0, %c0_i32, %c0_i32_0 : i32, i32, i32
  }
  func.func @transform_2(%arg0: i32) -> (i32, i32, i32) {
    %c0_i32 = arith.constant 0 : i32
    %c0_i32_0 = arith.constant 0 : i32
    %c0_i32_1 = arith.constant 0 : i32
    return %arg0, %c0_i32, %c0_i32_0 : i32, i32, i32
  }
  func.func @transform_3(%arg0: i32) -> (i32, i32, i32) {
    %c0_i32 = arith.constant 0 : i32
    %c0_i32_0 = arith.constant 0 : i32
    %c0_i32_1 = arith.constant 0 : i32
    return %arg0, %c0_i32, %c0_i32_0 : i32, i32, i32
  }
  func.func @transform_4(%arg0: i32) -> (i32, i32, i32) {
    %c0_i32 = arith.constant 0 : i32
    %c0_i32_0 = arith.constant 0 : i32
    %c0_i32_1 = arith.constant 0 : i32
    return %arg0, %c0_i32, %c0_i32_0 : i32, i32, i32
  }
  func.func @transform_5(%arg0: i32) -> (i32, i32) {
    %c0_i32 = arith.constant 0 : i32
    %c0_i32_0 = arith.constant 0 : i32
    %c0_i32_1 = arith.constant 0 : i32
    return %c0_i32, %c0_i32_0 : i32, i32
  }
  func.func @transform_6(%arg0: i32) -> (i32, i32) {
    %c0_i32 = arith.constant 0 : i32
    %c0_i32_0 = arith.constant 0 : i32
    %c0_i32_1 = arith.constant 0 : i32
    return %c0_i32, %c0_i32_0 : i32, i32
  }
  func.func @transform_7(%arg0: i32) -> (i32, i32) {
    %c0_i32 = arith.constant 0 : i32
    %c0_i32_0 = arith.constant 0 : i32
    %c0_i32_1 = arith.constant 0 : i32
    return %c0_i32, %c0_i32_0 : i32, i32
  }
  func.func @transform_8(%arg0: i32) -> (i32, i32) {
    %c0_i32 = arith.constant 0 : i32
    %c0_i32_0 = arith.constant 0 : i32
    %c0_i32_1 = arith.constant 0 : i32
    return %c0_i32, %c0_i32_0 : i32, i32
  }
  func.func @transform_9(%arg0: i32) -> (i32, i32) {
    %c0_i32 = arith.constant 0 : i32
    %c0_i32_0 = arith.constant 0 : i32
    %c0_i32_1 = arith.constant 0 : i32
    return %c0_i32, %c0_i32_0 : i32, i32
  }
  func.func @transform_10(%arg0: i32) -> (i32, i32) {
    %c0_i32 = arith.constant 0 : i32
    %c0_i32_0 = arith.constant 0 : i32
    %c0_i32_1 = arith.constant 0 : i32
    return %c0_i32, %c0_i32_0 : i32, i32
  }
  func.func @transform_11(%arg0: i32) -> (i32, i32, i32) {
    %c0_i32 = arith.constant 0 : i32
    %c0_i32_0 = arith.constant 0 : i32
    %c0_i32_1 = arith.constant 0 : i32
    return %arg0, %c0_i32, %c0_i32_0 : i32, i32, i32
  }
}

</mosaic_0001>

<bundles_post_ra>
// kernel: lxrt_encoder_forward.1
= control target key start
LH: loop header
LB: loop body
LE: loop exit
PB: predicated region body
PF: predicated region fallthrough
CT: control target
= control target key end

     0   :  { %s4681_s0 = inlined_call_operand.vmem [shape: f32[2,8,32], index: 0, kind: input, shape index: {}]   ;;  %s4682_s1 = inlined_call_operand.vmem [shape: f32[2,4,16], index: 1, kind: input, shape index: {}]   ;;  %s4683_s2 = inlined_call_operand.vmem [shape: f32[2,4,4], index: 2, kind: input, shape index: {}]   ;;  %s4684_s3 = inlined_call_operand.vmem [shape: f32[2,1,8], index: 3, kind: input, shape index: {}]   ;;  %s4685_s4 = inlined_call_operand.vmem [shape: f32[2,1,4], index: 4, kind: input, shape index: {}]   ;;  %s4686_s5 = inlined_call_operand.vmem [shape: f32[32,928], index: 5, kind: input, shape index: {}]   ;;  %s4687_s6 = inlined_call_operand.vmem [shape: f32[64,128], index: 6, kind: input, shape index: {}]   ;;  %s4688_s7 = inlined_call_operand.vmem [shape: f32[16,32], index: 7, kind: input, shape index: {}]   ;;  %s4689_s8 = inlined_call_operand.vmem [shape: f32[4,32], index: 8, kind: input, shape index: {}]   ;;  %s4690_s9 = inlined_call_operand.vmem [shape: f32[51,32], index: 9, kind: input, shape index: {}]   ;;  %s4691_s10 = inlined_call_operand.vmem [shape: f32[4,64], index: 10, kind: input, shape index: {}]   ;;  %s4692_s11 = inlined_call_operand.hbm [shape: f32[2,1,32], index: 11, kind: output, shape index: {}]  }
   0x1   :  { %4720 = sst [smem:[#allocation8_spill]] %s4681_s0 }
   0x2   :  { %4721 = sst [smem:[#allocation9_spill]] %s4682_s1 }
   0x3   :  { %4722 = sst [smem:[#allocation10_spill]] %s4683_s2 }
   0x4   :  { %4723 = sst [smem:[#allocation11_spill]] %s4684_s3 }
   0x5   :  { %4724 = sst [smem:[#allocation12_spill]] %s4685_s4 }
   0x6   :  { %4725 = sst [smem:[#allocation13_spill]] %s4688_s7 }
   0x7   :  { %4726 = sst [smem:[#allocation14_spill]] %s4689_s8 }
   0x8   :  { %16 = vsyncpa [#allocation3], 0 }
   0x9   :  { %18 = vsyncpa [#allocation3 + $0x1], 0  ;;  %s3784_s17 = smov 0   ;;  %s3786_s18 = smov 0  }
   0xa   :  { %s3788_s19 = smov 0   ;;  %s3790_s20 = smov 0  }
   0xb LB: > { %4727 = sst [smem:[#allocation5_spill]] %s3705_s19  ;;  %s3805_s21 = sadd.s32 4294967295, %s3709_s20   ;;  %s3709_s20 = sphi %s3790_s20, %s4752_s20   ;;  %s3705_s19 = sphi %s3788_s19, %s4754_s19   ;;  %s3701_s18 = sphi %s3786_s18, %s4756_s18   ;;  %s3697_s17 = sphi %s3784_s17, %s4755_s17  }
   0xc   : > { %s3261_s22 = sadd.s32 4294967294, %s3709_s20   ;;  %s3809_s23 = sadd.s32 1, %s3709_s20  }
   0xd   : > { %4728 = sst [smem:[#allocation6_spill]] %s3809_s23  ;;  %s287_s24 = sadd.s32 1, %s3705_s19 }
   0xe   : > { %s284_s25 = ssub.s32 %s3709_s20, %s3809_s23  ;;  %p297_p0 = scmp.ne.s32.totalorder %s3705_s19, %s3701_s18 }
   0xf   : > { %p285_p1 = scmp.eq.s32.totalorder %s284_s25, 0  ;;  %p298_p2 = scmp.eq.s32.totalorder %s3805_s21, 1 }
  0x10   : > { %p303_p3 = scmp.ne.s32.totalorder %s3701_s18, %s3697_s17  ;;  %p304_p4 = scmp.eq.s32.totalorder %s3261_s22, 1 }
  0x11   : > { %s3820_s26 = scalar_select %p285_p1, %s3705_s19, %s287_s24  }
  0x12   : > { %p3822_p5 = por %p298_p2, %p297_p0  ;;  %p3826_p6 = por %p304_p4, %p303_p3 }
  0x13   : > { %4729 = sst [smem:[#allocation7_spill]] %s3820_s26  ;;  %p3264_p7 = scmp.ge.s32.totalorder %s3709_s20, 1 }
  0x14   : > { %p373_p8 = scmp.lt.s32.totalorder %s3709_s20, 3 }
  0x16   : > { %p374_p9 = pnand %p3264_p7, %p373_p8 }
  0x17   : > { %p425_p10 = scmp.lt.s32.totalorder (!%p374_p9), %s3805_s21, 1  ;;  %s4732_s3 = sld [smem:[#allocation11_spill]] (!%p374_p9) }
  0x18   : > { %377 = sbr.rel (%p374_p9) target bundleno = 7802 (0x1e7a), region = 64  ;;  %s4733_s0 = sld [smem:[#allocation8_spill]] (!%p374_p9) }
  0x19   : > { %s4734_s4 = sld [smem:[#allocation12_spill]] (!%p374_p9)  ;;  %s4693_s13 = smov (!%p374_p9), 32  }
  0x1a   : > { %s4735_s2 = sld [smem:[#allocation10_spill]] (!%p374_p9)  ;;  %s4700_s15 = smov (!%p374_p9), 64  }
  0x1b   : > { %s4736_s8 = sld [smem:[#allocation14_spill]] (!%p374_p9)  ;;  %s4737_s16 = smov (!%p374_p9), 32  }
  0x1c   : > { %s4695_s24 = smov (!%p374_p9), 72   ;;  %s4712_s12 = smov (!%p374_p9), 88  }
  0x1d   : > { %s3834_s29 = scalar_select %p425_p10, %s3805_s21, 1  ;;  %vm446_vm0 = vcmask 261120   ;;  %v3711_v2 = vmov 32.0   ;;  %v3860_v14 = vld [vmem:[%s4686_s5 + $0xc0] sm:$0xff]  ;;  %v3501_v19 = vld [vmem:[%s4690_s9 + $0x9] ss:$0 sm:$0xff] }
  0x1e   : > { %3543 = vrcp.f32 %v3711_v2  ;;  %v3865_v15 = vld [vmem:[%s4686_s5 + $0x80] sm:$0xff]  ;;  %621 = vmatpush.msra.mxu2 %v3860_v14  ;;  %635 = vrot.lane.b32.xlu1 %v3501_v19, %s4693_s13  ;;  %vm546_vm5 = vcmask 1043456   ;;  %vm542_vm6 = vcmask 31744   ;;  %v3502_v40 = vld [vmem:[%s4690_s9 + $0x8] ss:$0 sm:$0xff]  ;;  %vm652_vm7 = vcmask 64512  }
  0x1f   : > { %s3265_s30 = sshll.u32 %s3834_s29, 3  ;;  %s3841_s14 = scalar_lea.vmem %s4732_s3, %s3834_s29  ;;  %v3432_v16 = vpack.i.bf16 %v3860_v14, %v3865_v15  ;;  %v3873_v17 = vld [vmem:[%s4686_s5 + $0x40] sm:$0xff]  ;;  %v3504_v48 = vld [vmem:[%s4690_s9 + $0xa] ss:$0 sm:$0xff]  ;;  %vm485_vm8 = vcmask 130048   ;;  %vm511_vm13 = vcmask 257024  }
  0x20   : > { %s428_s22 = scalar_lea.vmem %s4733_s0, %s3265_s30  ;;  %s3850_s26 = scalar_lea.vmem %s4734_s4, %s3834_s29  ;;  %622 = vmatpush.msra.mxu2 %v3865_v15  ;;  %v602_v18 = vld [vmem:[%s4686_s5] sm:$0xff] }
  0x21   : > { %v443_v0 = vld [vmem:[%s428_s22] sm:$0xff]  ;;  %s4699_s25 = sshll.u32 %s3834_s29, 2  ;;  %s4697_s22 = smov 96  }
  0x22   : > { %v447_v1 = vsel %vm446_vm0, %v443_v0, 0.0  ;;  %623 = vmatpush.msra.mxu2 %v3873_v17  ;;  %v3499_v29 = vld [vmem:[%s4690_s9] ss:$0 sm:$0xff]  ;;  %v3500_v32 = vld [vmem:[%s4690_s9 + $0x1] ss:$0 sm:$0xff]  ;;  %s436_s13 = scalar_lea.vmem %s4735_s2, %s4699_s25  ;;  %s4702_s30 = smov 120  }
  0x23   : > { %448 = vadd.xlane.f32.xlu0 %v447_v1  ;;  %v539_v35 = vld [vmem:[%s4736_s8] sm:$0xf]  ;;  %s4738_s7 = sld [smem:[#allocation13_spill]]  ;;  %s4739_s0 = sshll.u32 %s3834_s29, 2 }
  0x24   : > { %v3544_v3 = vpop.eup %3543  ;;  %624 = vmatpush.msra.mxu2 %v602_v18  ;;  %v538_v36 = vld [vmem:[%s436_s13] sm:$0xf]  ;;  %3269 = vmatpush.msk.msra.mxu1 %vm546_vm5, %v539_v35  ;;  %s4704_s13 = smov 80   ;;  %s4740_s1 = sld [smem:[#allocation9_spill]] }
  0x25   : > { %v451_v4 = vmul.f32 32.0, %v3544_v3  ;;  %vm455_vm1 = vweird.f32 %v3544_v3  ;;  %3270 = vmatmul.msk.f32.vlgmr.msra.gmra.mxu1 %vm542_vm6, %v538_v36  ;;  %v3915_v44 = vld [vmem:[%s3841_s14] ss:$0 sm:$0xff]  ;;  %s4716_s29 = smov 56   ;;  %s4710_s25 = smov 48  }
  0x26   : > { %s4741_s3 = smov 64   ;;  %s4745_s2 = smov 72  }
  0x27   : > { %v452_v5 = vsub.f32 1.0, %v451_v4  ;;  %s4750_s8 = smov 88  }
  0x29   : > { %v453_v6 = vmul.f32 %v3544_v3, %v452_v5  ;;  %v482_v56 = vld [vmem:[%s4738_s7 + $0x8] sm:$0xff]  ;;  %v481_v57 = vld [vmem:[%s4738_s7] sm:$0xff]  ;;  %s4749_s7 = smov 104  }
  0x2a   : > { %503 = vmatpush.msra.mxu0 %v482_v56 }
  0x2b   : > { %v454_v7 = vadd.f32 %v3544_v3, %v453_v6 }
  0x2c   : > { %504 = vmatpush.msra.mxu0 %v481_v57 }
  0x2d   : > { %v3853_v8 = vsel %vm455_vm1, %v3544_v3, %v454_v7 }
  0x90   : > { %v636_v37 = vpop.permute.xlu1 %635 }
  0x96   : > { %v449_v9 = vpop.xlane.xlu0 %448 }
  0x97   : > { %v457_v10 = vmul.f32 %v3853_v8, %v449_v9 }
  0x99   : > { %v458_v11 = vsub.f32 %v443_v0, %v457_v10 }
  0x9b   : > { %v459_v12 = vmul.f32 %v458_v11, %v458_v11 }
  0x9d   : > { %v460_v13 = vsel %vm446_vm0, %v459_v12, 0.0 }
  0x9e   : > { %461 = vadd.xlane.f32.xlu0 %v460_v13 }
  0xa2   : > { %v3912_v43 = vpop.f32.mrf.mxu1 }
 0x111   : > { %v462_v20 = vpop.xlane.xlu0 %461 }
 0x112   : > { %v463_v21 = vmul.f32 %v462_v20, %v3853_v8 }
 0x114   : > { %v464_v22 = vadd.f32 1e-12, %v463_v21 }
 0x116   : > { %3545 = vrsqrt.f32 %v464_v22  ;;  %vm471_vm3 = vweird.f32 %v464_v22 }
 0x11c   : > { %v3546_v23 = vpop.eup %3545 }
 0x11d   : > { %v466_v24 = vmul.f32 %v3546_v23, %v464_v22  ;;  %vm472_vm2 = vweird.f32 %v3546_v23 }
 0x11e   : > { %vm473_vm4 = vmor %vm471_vm3, %vm472_vm2 }
 0x11f   : > { %v467_v25 = vmul.f32 %v3546_v23, %v466_v24 }
 0x121   : > { %v468_v26 = vmul.f32 0.5, %v467_v25 }
 0x123   : > { %v469_v27 = vsub.f32 1.5, %v468_v26 }
 0x125   : > { %v470_v28 = vmul.f32 %v3546_v23, %v469_v27 }
 0x127   : > { %v474_v30 = vsel %vm473_vm4, %v3546_v23, %v470_v28  ;;  %v3503_v23 = vld [vmem:[%s4690_s9 + $0x5] ss:$0 sm:$0xff]  ;;  %v3505_v28 = vld [vmem:[%s4690_s9 + $0x2] ss:$0 sm:$0xff] }
 0x128   : > { %v475_v31 = vmul.f32 %v474_v30, %v458_v11  ;;  %v568_v26 = vadd.f32 %v3503_v23, %v3912_v43 }
 0x12a   : > { %v477_v33 = vmul.f32 %v3499_v29, %v475_v31  ;;  %v572_v30 = vsel %vm511_vm13, %v568_v26, 0.0 }
 0x12c   : > { %v3891_v34 = vadd.f32 %v3500_v32, %v477_v33 }
 0x12e   : > { %3271 = vmatmul.msk.f32.vlgmr.msra.gmra.mxu2 %vm446_vm0, %v3891_v34 }
 0x1b1   : > { %v626_v38 = vpop.f32.mrf.mxu2 }
 0x1b2   : > { %v638_v39 = vadd.f32 %v636_v37, %v626_v38  ;;  %v631_v42 = vadd.f32 %v3502_v40, %v626_v38 }
 0x1b4   : > { %650 = vrot.lane.b32.xlu1 %v638_v39, %s4697_s22  ;;  %s4714_s22 = smov 104  }
 0x226   : > { %v651_v41 = vpop.permute.xlu1 %650 }
 0x227   : > { %3272 = vmatpush.xpose.msk.msrb.mxu1 %vm652_vm7, %v651_v41 }
 0x22a   : > { %3273 = vmatmul.msk.f32.vlgmr.msrb.gmra.mxu1 %vm652_vm7, %v631_v42 }
 0x2a7   : > { %v675_v45 = vpop.f32.mrf.mxu1 }
 0x2a8   : > { %v676_v46 = vadd.f32 %v3915_v44, %v675_v45 }
 0x2aa   : > { %v678_v47 = vsel %vm652_vm7, %v676_v46, -inf }
 0x2ab   : > { %679 = vmax.xlane.f32.xlu2 %v678_v47 }
 0x2c3   : > { %642 = vrot.lane.b32.xlu2 %v3504_v48, %s4700_s15 }
 0x2cb   : > { %835 = vrot.lane.b32.xlu2 %v602_v18, %s4737_s16 }
 0x2d3   : > { %969 = vrot.lane.b32.xlu2 %v638_v39, %s4695_s24  ;;  %s4708_s24 = smov 112  }
 0x31e   : > { %v680_v49 = vpop.xlane.xlu2 %679 }
 0x31f   : > { %v681_v50 = vsub.f32 %v676_v46, %v680_v49 }
 0x321   : > { %v682_v51 = vmul.f32 1.442695, %v681_v50 }
 0x323   : > { %3547 = vpow2.f32 %v682_v51 }
 0x326   : > { %v643_v52 = vpop.permute.xlu2 %642 }
 0x327   : > { %v3925_v53 = vadd.f32 %v643_v52, %v626_v38 }
 0x329   : > { %v3548_v54 = vpop.eup %3547  ;;  %703 = vrot.lane.b32.xlu1 %v3925_v53, %s4700_s15  ;;  %s4706_s15 = smov 40  }
 0x32a   : > { %v684_v55 = vsel %vm652_vm7, %v3548_v54, 0.0 }
 0x32b   : > { %685 = vadd.xlane.f32.xlu0 %v684_v55 }
 0x32e   : > { %v836_v60 = vpop.permute.xlu2 %835 }
 0x331   : > { %729 = vrot.lane.b32.xlu1 %v631_v42, %s4702_s30  ;;  %s432_s30 = scalar_lea.vmem %s4740_s1, %s4739_s0  ;;  %s4744_s0 = smov 80  }
 0x332   : > { %v480_v58 = vld [vmem:[%s432_s30] sm:$0xf] }
 0x333   : > { %3268 = vmatmul.msk.f32.vlgmr.msra.gmra.mxu0 %vm485_vm8, %v480_v58 }
 0x336   : > { %v970_v12 = vpop.permute.xlu2 %969 }
 0x339   : > { %863 = vrot.lane.b32.xlu1 %v638_v39, %s4704_s13  ;;  %s4743_s13 = smov 120  }
 0x33f   : > { %731 = vrot.lane.b32.xlu0 %v638_v39, %s4712_s12 }
 0x341   : > { %861 = vrot.lane.b32.xlu1 %v631_v42, %s4708_s24 }
 0x347   : > { %967 = vrot.lane.b32.xlu0 %v631_v42, %s4714_s22 }
 0x39b   : > { %v704_v59 = vpop.permute.xlu1 %703 }
 0x39c   : > { %724 = vmatpush.msra.mxu1 %v704_v59 }
 0x39e   : > { %856 = vmatpush.msrb.mxu1 %v836_v60  ;;  %v686_v61 = vpop.xlane.xlu0 %685 }
 0x39f   : > { %3549 = vrcp.f32 %v686_v61  ;;  %v698_v2 = vand.u32 2147483648, %v686_v61  ;;  %v696_v4 = vand.u32 2147483647, %v686_v61  ;;  %vm692_vm10 = vweird.f32 %v686_v61 }
 0x3a1   : > { %v699_v6 = vor.u32 1.1754944e-38, %v698_v2  ;;  %vm697_vm12 = vcmp.eq.f32.partialorder %v696_v4, 8.507059e+37  ;;  %v4015_v4 = vld [vmem:[%s4686_s5 + $0x88] sm:$0xff] }
 0x3a3   : > { %v730_v1 = vpop.permute.xlu1 %729 }
 0x3a5   : > { %v3550_v62 = vpop.eup %3549 }
 0x3a6   : > { %v688_v63 = vmul.f32 %v3550_v62, %v686_v61  ;;  %vm693_vm9 = vweird.f32 %v3550_v62 }
 0x3a7   : > { %vm694_vm11 = vmor %vm692_vm10, %vm693_vm9 }
 0x3a8   : > { %v689_v0 = vsub.f32 1.0, %v688_v63  ;;  %v4000_v63 = vld [vmem:[%s4686_s5 + $0x48] sm:$0xff] }
 0x3aa   : > { %v690_v3 = vmul.f32 %v3550_v62, %v689_v0  ;;  %v4005_v0 = vld [vmem:[%s4686_s5 + $0x50] sm:$0xff] }
 0x3ab   : > { %v864_v13 = vpop.permute.xlu1 %863  ;;  %v3422_v2 = vpack.i.bf16 %v4005_v0, %v4000_v63 }
 0x3ac   : > { %v691_v5 = vadd.f32 %v3550_v62, %v690_v3 }
 0x3ae   : > { %v695_v7 = vsel %vm694_vm11, %v3550_v62, %v691_v5  ;;  %v4020_v5 = vld [vmem:[%s4686_s5 + $0x90] sm:$0xff] }
 0x3af   : > { %v700_v9 = vsel %vm697_vm12, %v699_v6, %v695_v7 }
 0x3b0   : > { %v701_v10 = vmul.f32 %v3548_v54, %v700_v9  ;;  %v506_v19 = vpop.f32.mrf.mxu0  ;;  %v3417_v9 = vpack.i.bf16 %v4020_v5, %v4015_v4 }
 0x3b1   : > { %v732_v11 = vpop.permute.xlu0 %731  ;;  %v507_v32 = vadd.f32 %v3505_v28, %v506_v19 }
 0x3b2   : > { %3274 = vmatmul.msk.f32.vlgmr.msra.gmra.mxu1 %vm652_vm7, %v701_v10  ;;  %3275 = vmatpush.xpose.msk.msrb.mxu0 %vm652_vm7, %v732_v11 }
 0x3b3   : > { %3284 = vmatpush.xpose.msk.msra.mxu1 %vm652_vm7, %v970_v12  ;;  %v862_v18 = vpop.permute.xlu1 %861  ;;  %v512_v33 = vsel %vm511_vm13, %v507_v32, 0.0  ;;  %v4032_v12 = vld [vmem:[%s4686_s5 + $0x8] sm:$0xff] }
 0x3b5   : > { %3276 = vmatmul.msk.f32.vlgmr.msrb.gmra.mxu0 %vm652_vm7, %v730_v1 }
 0x3b6   : > { %3280 = vmatpush.xpose.msk.msra.mxu0 %vm652_vm7, %v864_v13  ;;  %v4037_v13 = vld [vmem:[%s4686_s5 + $0x10] sm:$0xff] }
 0x3b9   : > { %v968_v25 = vpop.permute.xlu0 %967 }
 0x3bd   : > { %3281 = vmatmul.msk.f32.vlgmr.msra.gmra.mxu0 %vm652_vm7, %v862_v18 }
 0x42f   : > { %v726_v20 = vpop.f32.mrf.mxu1 }
 0x430   : > { %3279 = vmatmul.msk.f32.vlgmr.msrb.gmra.mxu1 %vm652_vm7, %v726_v20 }
 0x432   : > { %v754_v21 = vpop.f32.mrf.mxu0 }
 0x433   : > { %v755_v22 = vadd.f32 %v3915_v44, %v754_v21  ;;  %v3427_v21 = vpack.i.bf16 %v4037_v13, %v4032_v12 }
 0x435   : > { %v757_v24 = vsel %vm652_vm7, %v755_v22, -inf }
 0x436   : > { %758 = vmax.xlane.f32.xlu1 %v757_v24 }
 0x438   : > { %3285 = vmatmul.msk.f32.vlgmr.msra.gmra.mxu1 %vm652_vm7, %v968_v25 }
 0x43a   : > { %v886_v27 = vpop.f32.mrf.mxu0 }
 0x43b   : > { %v887_v29 = vadd.f32 %v3915_v44, %v886_v27 }
 0x43d   : > { %v889_v31 = vsel %vm652_vm7, %v887_v29, -inf }
 0x43e   : > { %573 = vadd.xlane.f32.xlu1 %v572_v30  ;;  %890 = vmax.xlane.f32.xlu2 %v889_v31 }
 0x446   : > { %513 = vadd.xlane.f32.xlu2 %v512_v33 }
 0x4a9   : > { %v759_v35 = vpop.xlane.xlu1 %758 }
 0x4aa   : > { %v760_v37 = vsub.f32 %v755_v22, %v759_v35 }
 0x4ac   : > { %v761_v40 = vmul.f32 1.442695, %v760_v37 }
 0x4ad   : > { %v3967_v36 = vpop.f32.mrf.mxu1 }
 0x4b1   : > { %v891_v38 = vpop.xlane.xlu2 %890  ;;  %v574_v46 = vpop.xlane.xlu1 %573 }
 0x4b2   : > { %v892_v39 = vsub.f32 %v887_v29, %v891_v38  ;;  %v575_v50 = vmul.f32 %v574_v46, %v3853_v8 }
 0x4b4   : > { %v893_v41 = vmul.f32 1.442695, %v892_v39  ;;  %v3983_v55 = vsub.f32 %v568_v26, %v575_v50  ;;  %v4051_v39 = vld [vmem:[%s4686_s5 + $0xc8] sm:$0xff] }
 0x4b5   : > { %v992_v42 = vpop.f32.mrf.mxu1 }
 0x4b6   : > { %3551 = vpow2.f32 %v893_v41  ;;  %v993_v43 = vadd.f32 %v3915_v44, %v992_v42  ;;  %v577_v58 = vmul.f32 %v3983_v55, %v3983_v55 }
 0x4b7   : > { %3553 = vpow2.f32 %v761_v40  ;;  %v4056_v40 = vld [vmem:[%s4686_s5 + $0xd0] sm:$0xff] }
 0x4b8   : > { %v995_v45 = vsel %vm652_vm7, %v993_v43, -inf  ;;  %v578_v59 = vsel %vm511_vm13, %v577_v58, 0.0  ;;  %v3412_v42 = vpack.i.bf16 %v4056_v40, %v4051_v39 }
 0x4b9   : > { %996 = vmax.xlane.f32.xlu0 %v995_v45  ;;  %v514_v47 = vpop.xlane.xlu2 %513 }
 0x4ba   : > { %v515_v48 = vmul.f32 %v514_v47, %v3853_v8 }
 0x4bc   : > { %v3972_v49 = vpop.eup %3551  ;;  %v3975_v51 = vsub.f32 %v507_v32, %v515_v48 }
 0x4bd   : > { %v3977_v52 = vpop.eup %3553  ;;  %v895_v54 = vsel %vm652_vm7, %v3972_v49, 0.0 }
 0x4be   : > { %896 = vadd.xlane.f32.xlu2 %v895_v54  ;;  %v517_v44 = vmul.f32 %v3975_v51, %v3975_v51  ;;  %v763_v56 = vsel %vm652_vm7, %v3977_v52, 0.0 }
 0x4c0   : > { %v518_v57 = vsel %vm511_vm13, %v517_v44, 0.0 }
 0x4c1   : > { %764 = vadd.xlane.f32.xlu0 %v763_v56  ;;  %519 = vadd.xlane.f32.xlu1 %v518_v57 }
 0x4c9   : > { %579 = vadd.xlane.f32.xlu1 %v578_v59 }
 0x4d5   : > { %781 = vrot.lane.b32.xlu0 %v3925_v53, %s4716_s29 }
 0x4d6   : > { %913 = vrot.lane.b32.xlu2 %v3925_v53, %s4710_s25  ;;  %s4747_s25 = smov 40  }
 0x4dd   : > { %1019 = vrot.lane.b32.xlu0 %v3925_v53, %s4706_s15  ;;  %s4742_s15 = smov 96  }
 0x4de   : > { %3418 = vrot.lane.b32.xlu2 %v3417_v9, %s4741_s3 }
 0x4e5   : > { %3423 = vrot.lane.b32.xlu0 %v3422_v2, %s4741_s3 }
 0x4e6   : > { %3428 = vrot.lane.b32.xlu2 %v3427_v21, %s4741_s3 }
 0x4ed   : > { %808 = vrot.lane.b32.xlu0 %v3873_v17, %s4737_s16 }
 0x4ee   : > { %3433 = vrot.lane.b32.xlu2 %v3432_v16, %s4737_s16 }
 0x52c   : > { %v997_v60 = vpop.xlane.xlu0 %996 }
 0x52d   : > { %v998_v61 = vsub.f32 %v993_v43, %v997_v60 }
 0x52f   : > { %v999_v62 = vmul.f32 1.442695, %v998_v61 }
 0x531   : > { %3555 = vpow2.f32 %v999_v62  ;;  %v897_v1 = vpop.xlane.xlu2 %896 }
 0x532   : > { %3557 = vrcp.f32 %v897_v1  ;;  %v909_v30 = vand.u32 2147483648, %v897_v1  ;;  %vm903_vm4 = vweird.f32 %v897_v1  ;;  %v907_v32 = vand.u32 2147483647, %v897_v1 }
 0x534   : > { %v765_v53 = vpop.xlane.xlu0 %764  ;;  %v910_v38 = vor.u32 1.1754944e-38, %v909_v30  ;;  %vm908_vm9 = vcmp.eq.f32.partialorder %v907_v32, 8.507059e+37  ;;  %v520_v14 = vpop.xlane.xlu1 %519 }
 0x535   : > { %3559 = vrcp.f32 %v765_v53  ;;  %v777_v22 = vand.u32 2147483648, %v765_v53  ;;  %v775_v17 = vand.u32 2147483647, %v765_v53  ;;  %vm771_vm15 = vweird.f32 %v765_v53 }
 0x536   : > { %v521_v46 = vmul.f32 %v520_v14, %v3853_v8 }
 0x537   : > { %v4010_v3 = vpop.eup %3555  ;;  %v778_v26 = vor.u32 1.1754944e-38, %v777_v22  ;;  %vm776_vm2 = vcmp.eq.f32.partialorder %v775_v17, 8.507059e+37 }
 0x538   : > { %v3558_v6 = vpop.eup %3557  ;;  %v1001_v7 = vsel %vm652_vm7, %v4010_v3, 0.0  ;;  %v522_v48 = vadd.f32 1e-12, %v521_v46 }
 0x539   : > { %v899_v10 = vmul.f32 %v3558_v6, %v897_v1  ;;  %1002 = vadd.xlane.f32.xlu1 %v1001_v7  ;;  %vm904_vm3 = vweird.f32 %v3558_v6  ;;  %v914_v35 = vpop.permute.xlu2 %913 }
 0x53a   : > { %vm905_vm8 = vmor %vm903_vm4, %vm904_vm3 }
 0x53b   : > { %v3560_v11 = vpop.eup %3559  ;;  %v900_v19 = vsub.f32 1.0, %v899_v10 }
 0x53c   : > { %v767_v18 = vmul.f32 %v3560_v11, %v765_v53  ;;  %vm772_vm14 = vweird.f32 %v3560_v11  ;;  %v580_v15 = vpop.xlane.xlu1 %579 }
 0x53d   : > { %v901_v24 = vmul.f32 %v3558_v6, %v900_v19  ;;  %vm773_vm1 = vmor %vm771_vm15, %vm772_vm14  ;;  %v581_v16 = vmul.f32 %v580_v15, %v3853_v8  ;;  %v3510_v19 = vld [vmem:[%s4690_s9 + $0x12] ss:$0 sm:$0xff] }
 0x53e   : > { %v768_v20 = vsub.f32 1.0, %v767_v18  ;;  %1310 = vrot.lane.b32.xlu0 %v3510_v19, %s4737_s16 }
 0x53f   : > { %v902_v28 = vadd.f32 %v3558_v6, %v901_v24  ;;  %v582_v47 = vadd.f32 1e-12, %v581_v16 }
 0x540   : > { %v769_v23 = vmul.f32 %v3560_v11, %v768_v20 }
 0x541   : > { %v906_v37 = vsel %vm905_vm8, %v3558_v6, %v902_v28  ;;  %3561 = vrsqrt.f32 %v582_v47  ;;  %v4065_v50 = vpop.permute.xlu2 %3418  ;;  %vm589_vm12 = vweird.f32 %v582_v47  ;;  %v3508_v28 = vld [vmem:[%s4690_s9 + $0x6] ss:$0 sm:$0xff] }
 0x542   : > { %v770_v25 = vadd.f32 %v3560_v11, %v769_v23  ;;  %v911_v41 = vsel %vm908_vm9, %v910_v38, %v906_v37  ;;  %3563 = vrsqrt.f32 %v522_v48  ;;  %v3509_v37 = vld [vmem:[%s4690_s9 + $0x7] ss:$0 sm:$0xff]  ;;  %vm1188_vm9 = vcmask 523264  }
 0x543   : > { %v912_v45 = vmul.f32 %v3972_v49, %v911_v41 }
 0x544   : > { %v774_v27 = vsel %vm773_vm1, %v3560_v11, %v770_v25  ;;  %vm529_vm1 = vweird.f32 %v522_v48 }
 0x545   : > { %v779_v29 = vsel %vm776_vm2, %v778_v26, %v774_v27 }
 0x546   : > { %v780_v31 = vmul.f32 %v3977_v52, %v779_v29 }
 0x547   : > { %v782_v33 = vpop.permute.xlu0 %781  ;;  %v3562_v52 = vpop.eup %3561 }
 0x548   : > { %802 = vmatpush.msra.mxu3 %v782_v33  ;;  %v3564_v54 = vpop.eup %3563  ;;  %v584_v49 = vmul.f32 %v3562_v52, %v582_v47  ;;  %vm590_vm10 = vweird.f32 %v3562_v52  ;;  %v3506_v33 = vld [vmem:[%s4690_s9 + $0x3] ss:$0 sm:$0xff] }
 0x549   : > { %3277 = vmatmul.msk.f32.vlgmr.msra.gmra.mxu3 %vm652_vm7, %v780_v31  ;;  %v524_v56 = vmul.f32 %v3564_v54, %v522_v48  ;;  %v4069_v57 = vpop.permute.xlu2 %3428  ;;  %vm530_vm11 = vweird.f32 %v3564_v54  ;;  %vm591_vm14 = vmor %vm589_vm12, %vm590_vm10  ;;  %vm1352_vm10 = vcmask 27648  }
 0x54a   : > { %934 = vmatpush.msrb.mxu3 %v914_v35  ;;  %v585_v58 = vmul.f32 %v3562_v52, %v584_v49  ;;  %vm531_vm2 = vmor %vm529_vm1, %vm530_vm11  ;;  %v3431_v48 = vunpack.i.h.bf16 %v4069_v57 }
 0x54b   : > { %v525_v59 = vmul.f32 %v3564_v54, %v524_v56 }
 0x54c   : > { %v586_v61 = vmul.f32 0.5, %v585_v58 }
 0x54d   : > { %v526_v1 = vmul.f32 0.5, %v525_v59 }
 0x54e   : > { %v587_v53 = vsub.f32 1.5, %v586_v61 }
 0x54f   : > { %v1020_v43 = vpop.permute.xlu0 %1019  ;;  %v527_v10 = vsub.f32 1.5, %v526_v1 }
 0x550   : > { %1040 = vmatpush.msrb.mxu0 %v1020_v43  ;;  %v588_v18 = vmul.f32 %v3562_v52, %v587_v53  ;;  %v3420_v43 = vunpack.i.l.bf16 %v4065_v50 }
 0x551   : > { %3282 = vmatmul.msk.f32.vlgmr.msrb.gmra.mxu3 %vm652_vm7, %v912_v45  ;;  %v3434_v2 = vpop.permute.xlu2 %3433  ;;  %v528_v22 = vmul.f32 %v3564_v54, %v527_v10 }
 0x552   : > { %3413 = vrot.lane.b32.xlu1 %v3412_v42, %s4741_s3  ;;  %v3436_v6 = vunpack.i.h.bf16 %v3434_v2  ;;  %v3435_v7 = vunpack.i.l.bf16 %v3434_v2  ;;  %v592_v24 = vsel %vm591_vm14, %v3562_v52, %v588_v18  ;;  %v3430_v52 = vunpack.i.l.bf16 %v4069_v57 }
 0x553   : > { %v532_v27 = vsel %vm531_vm2, %v3564_v54, %v528_v22  ;;  %v593_v29 = vmul.f32 %v592_v24, %v3983_v55  ;;  %v3507_v55 = vld [vmem:[%s4690_s9 + $0x4] ss:$0 sm:$0xff] }
 0x554   : > { %1067 = vmatpush.msra.mxu3 %v3436_v6  ;;  %v533_v35 = vmul.f32 %v532_v27, %v3975_v51  ;;  %v1273_v58 = vsel %vm1188_vm9, %v3430_v52, %v3431_v48  ;;  %v3514_v52 = vld [vmem:[%s4690_s9 + $0xc] ss:$0 sm:$0xff] }
 0x555   : > { %v595_v38 = vmul.f32 %v3508_v28, %v593_v29 }
 0x556   : > { %v535_v41 = vmul.f32 %v3506_v33, %v533_v35 }
 0x557   : > { %v4067_v44 = vpop.permute.xlu0 %3423  ;;  %v597_v42 = vadd.f32 %v3509_v37, %v595_v38 }
 0x558   : > { %v3426_v51 = vunpack.i.h.bf16 %v4067_v44  ;;  %v3425_v14 = vunpack.i.l.bf16 %v4067_v44  ;;  %v537_v46 = vadd.f32 %v3507_v55, %v535_v41  ;;  %v3517_v44 = vld [vmem:[%s4690_s9 + $0xe] ss:$0 sm:$0xff] }
 0x55a   : > { %v1274_v49 = vsel %vm1188_vm9, %v3425_v14, %v3426_v51  ;;  %v598_v56 = vadd.f32 %v597_v42, %v537_v46 }
 0x55f   : > { %v809_v62 = vpop.permute.xlu0 %808 }
 0x560   : > { %829 = vmatpush.msrb.mxu2 %v809_v62 }
 0x562   : > { %961 = vmatpush.msra.mxu2 %v3435_v7  ;;  %v3512_v7 = vld [vmem:[%s4690_s9 + $0xb] ss:$0 sm:$0xff] }
 0x5ac   : > { %v1003_v60 = vpop.xlane.xlu1 %1002 }
 0x5ad   : > { %3565 = vrcp.f32 %v1003_v60  ;;  %v1015_v21 = vand.u32 2147483648, %v1003_v60  ;;  %v1013_v17 = vand.u32 2147483647, %v1003_v60  ;;  %vm1009_vm3 = vweird.f32 %v1003_v60 }
 0x5af   : > { %v1016_v26 = vor.u32 1.1754944e-38, %v1015_v21  ;;  %vm1014_vm8 = vcmp.eq.f32.partialorder %v1013_v17, 8.507059e+37  ;;  %v3513_v21 = vld [vmem:[%s4690_s9 + $0x13] ss:$0 sm:$0xff] }
 0x5b0   : > { %v1311_v1 = vpop.permute.xlu0 %1310 }
 0x5b3   : > { %v3566_v9 = vpop.eup %3565 }
 0x5b4   : > { %v1005_v11 = vmul.f32 %v3566_v9, %v1003_v60  ;;  %vm1010_vm15 = vweird.f32 %v3566_v9  ;;  %v4114_v60 = vmul.f32 0.5, %v598_v56  ;;  %v3515_v56 = vld [vmem:[%s4690_s9 + $0xd] ss:$0 sm:$0xff] }
 0x5b5   : > { %vm1011_vm4 = vmor %vm1009_vm3, %vm1010_vm15 }
 0x5b6   : > { %v1006_v20 = vsub.f32 1.0, %v1005_v11 }
 0x5b8   : > { %v1007_v23 = vmul.f32 %v3566_v9, %v1006_v20 }
 0x5ba   : > { %v1008_v25 = vadd.f32 %v3566_v9, %v1007_v23 }
 0x5bc   : > { %v1012_v30 = vsel %vm1011_vm4, %v3566_v9, %v1008_v25  ;;  %v4148_v25 = vld [vmem:[%s3850_s26] ss:$0 sm:$0xff] }
 0x5bd   : > { %v1017_v31 = vsel %vm1014_vm8, %v1016_v26, %v1012_v30 }
 0x5be   : > { %v1018_v32 = vmul.f32 %v4010_v3, %v1017_v31  ;;  %v3421_v3 = vunpack.i.h.bf16 %v4065_v50 }
 0x5c0   : > { %3286 = vmatmul.msk.f32.vlgmr.msrb.gmra.mxu0 %vm652_vm7, %v1018_v32  ;;  %v1275_v54 = vsel %vm1188_vm9, %v3420_v43, %v3421_v3 }
 0x5c4   : > { %v4093_v45 = vpop.permute.xlu1 %3413 }
 0x5c5   : > { %v3416_v15 = vunpack.i.h.bf16 %v4093_v45  ;;  %v3415_v16 = vunpack.i.l.bf16 %v4093_v45  ;;  %v3518_v45 = vld [vmem:[%s4690_s9 + $0x14] ss:$0 sm:$0xff] }
 0x5c7   : > { %v1276_v47 = vsel %vm1188_vm9, %v3415_v16, %v3416_v15 }
 0x5c8   : > { %1296 = vmatpush.msra.mxu0 %v1276_v47 }
 0x5ca   : > { %1297 = vmatpush.msra.mxu0 %v1275_v54 }
 0x5cc   : > { %v804_v59 = vpop.f32.mrf.mxu3  ;;  %1298 = vmatpush.msra.mxu0 %v1274_v49 }
 0x5cd   : > { %3278 = vmatmul.msk.f32.vlgmr.msrb.gmra.mxu2 %vm652_vm7, %v804_v59 }
 0x5ce   : > { %1299 = vmatpush.msra.mxu0 %v1273_v58  ;;  %1126 = vmatpush.msrb.mxu2 %v4051_v39 }
 0x5cf   : > { %3291 = vmatmul.msk.f32.vlgmr.msra.gmra.mxu0 %vm446_vm0, %v4114_v60 }
 0x5d0   : > { %1127 = vmatpush.msrb.mxu2 %v4015_v4 }
 0x5d2   : > { %1128 = vmatpush.msrb.mxu2 %v4000_v63  ;;  %v3511_v63 = vld [vmem:[%s4690_s9 + $0x11] ss:$0 sm:$0xff] }
 0x5d4   : > { %v936_v61 = vpop.f32.mrf.mxu3  ;;  %1129 = vmatpush.msrb.mxu2 %v4032_v12 }
 0x5d5   : > { %3283 = vmatmul.msk.f32.vlgmr.msra.gmra.mxu2 %vm652_vm7, %v936_v61 }
 0x63d   : > { %v1042_v62 = vpop.f32.mrf.mxu0 }
 0x63e   : > { %3287 = vmatmul.msk.f32.vlgmr.msra.gmra.mxu3 %vm652_vm7, %v1042_v62 }
 0x64c   : > { %v1301_v2 = vpop.f32.mrf.mxu0 }
 0x64d   : > { %v4124_v53 = vadd.f32 %v1311_v1, %v1301_v2  ;;  %v1306_v18 = vadd.f32 %v3511_v63, %v1301_v2 }
 0x64f   : > { %1325 = vrot.lane.b32.xlu1 %v4124_v53, %s4742_s15 }
 0x650   : > { %v831_v39 = vpop.f32.mrf.mxu2 }
 0x651   : > { %v859_v4 = vadd.f32 %v3967_v36, %v831_v39 }
 0x658   : > { %v963_v6 = vpop.f32.mrf.mxu2 }
 0x659   : > { %v966_v12 = vadd.f32 %v963_v6, %v859_v4 }
 0x6c1   : > { %v1069_v9 = vpop.f32.mrf.mxu3  ;;  %v1326_v10 = vpop.permute.xlu1 %1325 }
 0x6c2   : > { %v1072_v11 = vadd.f32 %v1069_v9, %v966_v12  ;;  %3292 = vmatpush.xpose.msk.msrb.mxu3 %vm652_vm7, %v1326_v10 }
 0x6c4   : > { %v1075_v19 = vadd.f32 %v3512_v7, %v1072_v11 }
 0x6c5   : > { %3293 = vmatmul.msk.f32.vlgmr.msrb.gmra.mxu3 %vm652_vm7, %v1306_v18 }
 0x6c6   : > { %v1076_v36 = vadd.f32 %v1075_v19, %v3891_v34  ;;  %v3516_v19 = vld [vmem:[%s4691_s10] ss:$0 sm:$0xff] }
 0x6c8   : > { %v1079_v20 = vsel %vm446_vm0, %v1076_v36, 0.0 }
 0x6c9   : > { %1080 = vadd.xlane.f32.xlu2 %v1079_v20 }
 0x6e1   : > { %1317 = vrot.lane.b32.xlu2 %v3513_v21, %s4741_s3 }
 0x6e9   : > { %1405 = vrot.lane.b32.xlu2 %v1306_v18, %s4743_s13 }
 0x6f1   : > { %1536 = vrot.lane.b32.xlu2 %v1306_v18, %s4708_s24 }
 0x73c   : > { %v1081_v22 = vpop.xlane.xlu2 %1080 }
 0x73d   : > { %v1082_v23 = vmul.f32 %v1081_v22, %v3853_v8 }
 0x73f   : > { %v1083_v17 = vsub.f32 %v1076_v36, %v1082_v23 }
 0x741   : > { %v1084_v24 = vmul.f32 %v1083_v17, %v1083_v17 }
 0x743   : > { %v1085_v34 = vsel %vm446_vm0, %v1084_v24, 0.0 }
 0x744   : > { %1086 = vadd.xlane.f32.xlu0 %v1085_v34  ;;  %v1318_v29 = vpop.permute.xlu2 %1317  ;;  %v4195_v34 = vld [vmem:[%s4687_s6 + $0x30] sm:$0xff] }
 0x745   : > { %v4152_v30 = vadd.f32 %v1318_v29, %v1301_v2 }
 0x748   : > { %v1349_v26 = vpop.f32.mrf.mxu3 }
 0x749   : > { %v1350_v27 = vadd.f32 %v4148_v25, %v1349_v26 }
 0x74b   : > { %v1353_v28 = vsel %vm1352_vm10, %v1350_v27, -inf }
 0x74c   : > { %1354 = vmax.xlane.f32.xlu1 %v1353_v28  ;;  %v1406_v11 = vpop.permute.xlu2 %1405  ;;  %v4201_v28 = vld [vmem:[%s4687_s6 + $0x28] sm:$0xff] }
 0x754   : > { %v1537_v23 = vpop.permute.xlu2 %1536 }
 0x765   : > { %1378 = vrot.lane.b32.xlu1 %v4152_v30, %s4741_s3 }
 0x76d   : > { %1538 = vrot.lane.b32.xlu1 %v4124_v53, %s4744_s0 }
 0x775   : > { %1644 = vrot.lane.b32.xlu1 %v4124_v53, %s4745_s2 }
 0x7b7   : > { %v1087_v31 = vpop.xlane.xlu0 %1086 }
 0x7b8   : > { %v1088_v32 = vmul.f32 %v1087_v31, %v3853_v8 }
 0x7ba   : > { %v1089_v33 = vadd.f32 1e-12, %v1088_v32  ;;  %v4207_v32 = vld [vmem:[%s4687_s6 + $0x20] sm:$0xff] }
 0x7bc   : > { %3567 = vrsqrt.f32 %v1089_v33  ;;  %vm1096_vm12 = vweird.f32 %v1089_v33 }
 0x7bf   : > { %v1355_v35 = vpop.xlane.xlu1 %1354 }
 0x7c0   : > { %v1356_v37 = vsub.f32 %v1350_v27, %v1355_v35 }
 0x7c2   : > { %v3568_v38 = vpop.eup %3567  ;;  %v1357_v55 = vmul.f32 1.442695, %v1356_v37  ;;  %v4213_v37 = vld [vmem:[%s4687_s6 + $0x18] sm:$0xff] }
 0x7c3   : > { %v1091_v41 = vmul.f32 %v3568_v38, %v1089_v33  ;;  %vm1097_vm11 = vweird.f32 %v3568_v38 }
 0x7c4   : > { %3569 = vpow2.f32 %v1357_v55  ;;  %vm1098_vm14 = vmor %vm1096_vm12, %vm1097_vm11 }
 0x7c5   : > { %v1092_v42 = vmul.f32 %v3568_v38, %v1091_v41  ;;  %v4219_v41 = vld [vmem:[%s4687_s6 + $0x10] sm:$0xff] }
 0x7c7   : > { %v1093_v43 = vmul.f32 0.5, %v1092_v42 }
 0x7c9   : > { %v1094_v14 = vsub.f32 1.5, %v1093_v43  ;;  %v4225_v43 = vld [vmem:[%s4687_s6 + $0x8] sm:$0xff] }
 0x7ca   : > { %v3570_v16 = vpop.eup %3569 }
 0x7cb   : > { %v1095_v46 = vmul.f32 %v3568_v38, %v1094_v14  ;;  %v1359_v47 = vsel %vm1352_vm10, %v3570_v16, 0.0 }
 0x7cc   : > { %1360 = vadd.xlane.f32.xlu0 %v1359_v47 }
 0x7cd   : > { %v1099_v54 = vsel %vm1098_vm14, %v3568_v38, %v1095_v46  ;;  %v4231_v46 = vld [vmem:[%s4687_s6] sm:$0xff] }
 0x7ce   : > { %v1100_v49 = vmul.f32 %v1099_v54, %v1083_v17  ;;  %v4188_v17 = vld [vmem:[%s4687_s6 + $0x38] sm:$0xff] }
 0x7cf   : > { %1200 = vmatpush.msrb.mxu1 %v4188_v17 }
 0x7d0   : > { %v1102_v58 = vmul.f32 %v3514_v52, %v1100_v49 }
 0x7d1   : > { %1201 = vmatpush.msrb.mxu1 %v4195_v34 }
 0x7d2   : > { %v4168_v59 = vadd.f32 %v3515_v56, %v1102_v58 }
 0x7d3   : > { %1202 = vmatpush.msrb.mxu1 %v4201_v28 }
 0x7d4   : > { %3288 = vmatmul.msk.f32.vlgmr.msrb.gmra.mxu2 %vm446_vm0, %v4168_v59 }
 0x7d5   : > { %1203 = vmatpush.msrb.mxu1 %v4207_v32 }
 0x7d7   : > { %v1379_v61 = vpop.permute.xlu1 %1378  ;;  %1204 = vmatpush.msrb.mxu1 %v4213_v37 }
 0x7d8   : > { %3294 = vmatpush.msk.msra.mxu2 %vm546_vm5, %v1379_v61 }
 0x7d9   : > { %1205 = vmatpush.msrb.mxu1 %v4219_v41 }
 0x7db   : > { %1206 = vmatpush.msrb.mxu1 %v4225_v43 }
 0x7dd   : > { %1207 = vmatpush.msrb.mxu1 %v4231_v46 }
 0x7e0   : > { %1407 = vrot.lane.b32.xlu0 %v4124_v53, %s4712_s12  ;;  %s4748_s12 = smov 112  }
 0x7e8   : > { %1510 = vrot.lane.b32.xlu0 %v4037_v13, %s4742_s15 }
 0x7f0   : > { %1642 = vrot.lane.b32.xlu0 %v1306_v18, %s4714_s22  ;;  %v1539_v18 = vpop.permute.xlu1 %1538  ;;  %s4746_s22 = smov 48  }
 0x83f   : > { %v1361_v62 = vpop.xlane.xlu0 %1360 }
 0x840   : > { %3571 = vrcp.f32 %v1361_v62  ;;  %v1373_v6 = vand.u32 2147483648, %v1361_v62  ;;  %v1371_v63 = vand.u32 2147483647, %v1361_v62  ;;  %vm1367_vm1 = vweird.f32 %v1361_v62 }
 0x842   : > { %v1374_v7 = vor.u32 1.1754944e-38, %v1373_v6  ;;  %vm1372_vm3 = vcmp.eq.f32.partialorder %v1371_v63, 8.507059e+37 }
 0x846   : > { %v3572_v1 = vpop.eup %3571 }
 0x847   : > { %v1363_v2 = vmul.f32 %v3572_v1, %v1361_v62  ;;  %vm1368_vm15 = vweird.f32 %v3572_v1 }
 0x848   : > { %vm1369_vm2 = vmor %vm1367_vm1, %vm1368_vm15 }
 0x849   : > { %v1364_v39 = vsub.f32 1.0, %v1363_v2 }
 0x84b   : > { %v1365_v4 = vmul.f32 %v3572_v1, %v1364_v39 }
 0x84d   : > { %v1366_v12 = vadd.f32 %v3572_v1, %v1365_v4 }
 0x84f   : > { %v1370_v9 = vsel %vm1369_vm2, %v3572_v1, %v1366_v12 }
 0x850   : > { %v1375_v53 = vsel %vm1372_vm3, %v1374_v7, %v1370_v9 }
 0x851   : > { %v1376_v10 = vmul.f32 %v3570_v16, %v1375_v53 }
 0x852   : > { %v1408_v13 = vpop.permute.xlu0 %1407 }
 0x853   : > { %3295 = vmatmul.msk.f32.vlgmr.msra.gmra.mxu2 %vm542_vm6, %v1376_v10  ;;  %3296 = vmatpush.xpose.msk.msrb.mxu0 %vm652_vm7, %v1408_v13 }
 0x856   : > { %3297 = vmatmul.msk.f32.vlgmr.msrb.gmra.mxu0 %vm652_vm7, %v1406_v11 }
 0x857   : > { %3302 = vmatpush.xpose.msk.msra.mxu0 %vm652_vm7, %v1539_v18  ;;  %v1131_v36 = vpop.f32.mrf.mxu2 }
 0x858   : > { %v1132_v20 = vadd.f32 %v3516_v19, %v1131_v36 }
 0x85a   : > { %v1135_v21 = vmul.f32 0.70710677, %v1132_v20  ;;  %v1511_v52 = vpop.permute.xlu0 %1510  ;;  %v1134_v36 = vmul.f32 0.5, %v1132_v20 }
 0x85b   : > { %1531 = vmatpush.msra.mxu1 %v1511_v52 }
 0x85c   : > { %v1136_v22 = vmul.f32 %v1135_v21, %v1135_v21 }
 0x85e   : > { %v1137_v24 = vmin.f32 %v1136_v22, 16.0  ;;  %3303 = vmatmul.msk.f32.vlgmr.msra.gmra.mxu0 %vm652_vm7, %v1537_v23 }
 0x860   : > { %v1138_v26 = vmul.f32 2.1237322e-06, %v1137_v24  ;;  %v1149_v27 = vmul.f32 3.8918573e-05, %v1137_v24 }
 0x862   : > { %v1139_v29 = vadd.f32 0.00028619796, %v1138_v26  ;;  %v1150_v31 = vadd.f32 0.001143296, %v1149_v27  ;;  %v1643_v20 = vpop.permute.xlu0 %1642 }
 0x864   : > { %v1140_v33 = vmul.f32 %v1139_v29, %v1137_v24  ;;  %v1151_v35 = vmul.f32 %v1150_v31, %v1137_v24 }
 0x866   : > { %v1152_v38 = vadd.f32 0.014752088, %v1151_v35  ;;  %v1141_v55 = vadd.f32 0.0036580483, %v1140_v33 }
 0x868   : > { %v1153_v42 = vmul.f32 %v1152_v38, %v1137_v24  ;;  %v1142_v16 = vmul.f32 %v1141_v55, %v1137_v24 }
 0x86a   : > { %v1154_v14 = vadd.f32 0.112945676, %v1153_v42  ;;  %v1143_v49 = vadd.f32 0.05243302, %v1142_v16 }
 0x86c   : > { %v1155_v47 = vmul.f32 %v1154_v14, %v1137_v24  ;;  %v1144_v61 = vmul.f32 %v1143_v49, %v1137_v24 }
 0x86e   : > { %v1156_v54 = vadd.f32 0.4994258, %v1155_v47  ;;  %v1145_v62 = vadd.f32 0.18741608, %v1144_v61 }
 0x870   : > { %v1157_v56 = vmul.f32 %v1156_v54, %v1137_v24  ;;  %v1146_v2 = vmul.f32 %v1145_v62, %v1137_v24  ;;  %v1645_v24 = vpop.permute.xlu1 %1644 }
 0x872   : > { %v1158_v58 = vadd.f32 1.0, %v1157_v56  ;;  %v1147_v63 = vadd.f32 1.1283791, %v1146_v2 }
 0x874   : > { %3573 = vrcp.f32 %v1158_v58  ;;  %v1170_v4 = vand.u32 2147483648, %v1158_v58  ;;  %v1168_v7 = vand.u32 2147483647, %v1158_v58  ;;  %vm1164_vm8 = vweird.f32 %v1158_v58 }
 0x875   : > { %v1148_v10 = vmul.f32 %v1147_v63, %v1135_v21 }
 0x876   : > { %v1171_v53 = vor.u32 1.1754944e-38, %v1170_v4  ;;  %vm1169_vm12 = vcmp.eq.f32.partialorder %v1168_v7, 8.507059e+37 }
 0x87a   : > { %v3574_v1 = vpop.eup %3573 }
 0x87b   : > { %v1160_v39 = vmul.f32 %v3574_v1, %v1158_v58  ;;  %vm1165_vm4 = vweird.f32 %v3574_v1 }
 0x87c   : > { %vm1166_vm11 = vmor %vm1164_vm8, %vm1165_vm4 }
 0x87d   : > { %v1161_v6 = vsub.f32 1.0, %v1160_v39 }
 0x87f   : > { %v1162_v12 = vmul.f32 %v3574_v1, %v1161_v6 }
 0x881   : > { %v1163_v9 = vadd.f32 %v3574_v1, %v1162_v12 }
 0x883   : > { %v1167_v13 = vsel %vm1166_vm11, %v3574_v1, %v1163_v9 }
 0x884   : > { %v1172_v11 = vsel %vm1169_vm12, %v1171_v53, %v1167_v13 }
 0x885   : > { %v1173_v18 = vmul.f32 %v1172_v11, %v1148_v10 }
 0x887   : > { %v3289_v19 = vclamps-f32 %v1173_v18, 1.0 }
 0x889   : > { %v1176_v22 = vadd.f32 1.0, %v3289_v19 }
 0x88b   : > { %v1177_v23 = vmul.f32 %v1176_v22, %v1134_v36 }
 0x88d   : > { %3290 = vmatmul.msk.f32.vlgmr.msrb.gmra.mxu1 %vm1188_vm9, %v1177_v23 }
 0x88e   : > { %3307 = vmatpush.xpose.msk.msrb.mxu1 %vm652_vm7, %v1645_v24 }
 0x8d3   : > { %v1430_v26 = vpop.f32.mrf.mxu0 }
 0x8d4   : > { %v1431_v27 = vadd.f32 %v4148_v25, %v1430_v26 }
 0x8d6   : > { %v1402_v29 = vpop.f32.mrf.mxu2  ;;  %v1433_v31 = vsel %vm1352_vm10, %v1431_v27, -inf }
 0x8d7   : > { %1434 = vmax.xlane.f32.xlu2 %v1433_v31  ;;  %3301 = vmatmul.msk.f32.vlgmr.msra.gmra.mxu1 %vm652_vm7, %v1402_v29 }
 0x8db   : > { %v1561_v21 = vpop.f32.mrf.mxu0 }
 0x8dc   : > { %v1562_v33 = vadd.f32 %v4148_v25, %v1561_v21 }
 0x8de   : > { %v1564_v35 = vsel %vm1352_vm10, %v1562_v33, -inf }
 0x8df   : > { %1565 = vmax.xlane.f32.xlu1 %v1564_v35  ;;  %3308 = vmatmul.msk.f32.vlgmr.msrb.gmra.mxu1 %vm652_vm7, %v1643_v20 }
 0x90a   : > { %v4242_v42 = vpop.f32.mrf.mxu1 }
 0x94a   : > { %v1435_v38 = vpop.xlane.xlu2 %1434 }
 0x94b   : > { %v1436_v55 = vsub.f32 %v1431_v27, %v1435_v38 }
 0x94d   : > { %v1437_v14 = vmul.f32 1.442695, %v1436_v55 }
 0x94f   : > { %3575 = vpow2.f32 %v1437_v14 }
 0x952   : > { %v1566_v16 = vpop.xlane.xlu1 %1565 }
 0x953   : > { %v1567_v47 = vsub.f32 %v1562_v33, %v1566_v16 }
 0x954   : > { %v4244_v52 = vpop.f32.mrf.mxu1 }
 0x955   : > { %v3576_v54 = vpop.eup %3575  ;;  %v1568_v49 = vmul.f32 1.442695, %v1567_v47 }
 0x956   : > { %v1439_v56 = vsel %vm1352_vm10, %v3576_v54, 0.0 }
 0x957   : > { %3577 = vpow2.f32 %v1568_v49  ;;  %1440 = vadd.xlane.f32.xlu2 %v1439_v56 }
 0x95c   : > { %v1667_v58 = vpop.f32.mrf.mxu1 }
 0x95d   : > { %v3578_v61 = vpop.eup %3577  ;;  %v1668_v62 = vadd.f32 %v4148_v25, %v1667_v58 }
 0x95e   : > { %v1570_v1 = vsel %vm1352_vm10, %v3578_v61, 0.0 }
 0x95f   : > { %1571 = vadd.xlane.f32.xlu1 %v1570_v1  ;;  %v1670_v2 = vsel %vm1352_vm10, %v1668_v62, -inf }
 0x960   : > { %1671 = vmax.xlane.f32.xlu0 %v1670_v2 }
 0x96f   : > { %1457 = vrot.lane.b32.xlu2 %v4152_v30, %s4716_s29 }
 0x977   : > { %1484 = vrot.lane.b32.xlu2 %v4005_v0, %s4742_s15 }
 0x978   : > { %1588 = vrot.lane.b32.xlu1 %v4152_v30, %s4746_s22 }
 0x9ca   : > { %v1441_v39 = vpop.xlane.xlu2 %1440 }
 0x9cb   : > { %3579 = vrcp.f32 %v1441_v39  ;;  %v1453_v10 = vand.u32 2147483648, %v1441_v39  ;;  %v1451_v11 = vand.u32 2147483647, %v1441_v39  ;;  %vm1447_vm15 = vweird.f32 %v1441_v39 }
 0x9cd   : > { %v1454_v36 = vor.u32 1.1754944e-38, %v1453_v10  ;;  %vm1452_vm2 = vcmp.eq.f32.partialorder %v1451_v11, 8.507059e+37 }
 0x9d1   : > { %v3580_v6 = vpop.eup %3579 }
 0x9d2   : > { %v1443_v4 = vmul.f32 %v3580_v6, %v1441_v39  ;;  %v1458_v63 = vpop.permute.xlu2 %1457  ;;  %v1572_v12 = vpop.xlane.xlu1 %1571  ;;  %vm1448_vm14 = vweird.f32 %v3580_v6 }
 0x9d3   : > { %3581 = vrcp.f32 %v1572_v12  ;;  %3298 = vmatpush.msk.msra.mxu3 %vm546_vm5, %v1458_v63  ;;  %v1672_v7 = vpop.xlane.xlu0 %1671  ;;  %vm1449_vm1 = vmor %vm1447_vm15, %vm1448_vm14  ;;  %v1584_v20 = vand.u32 2147483648, %v1572_v12  ;;  %vm1578_vm4 = vweird.f32 %v1572_v12  ;;  %v1582_v35 = vand.u32 2147483647, %v1572_v12 }
 0x9d4   : > { %v1444_v9 = vsub.f32 1.0, %v1443_v4  ;;  %v1673_v53 = vsub.f32 %v1668_v62, %v1672_v7 }
 0x9d5   : > { %v1585_v55 = vor.u32 1.1754944e-38, %v1584_v20  ;;  %vm1583_vm11 = vcmp.eq.f32.partialorder %v1582_v35, 8.507059e+37  ;;  %v4304_v20 = vld [vmem:[%s4686_s5 + $0x98] sm:$0xff] }
 0x9d6   : > { %v1445_v13 = vmul.f32 %v3580_v6, %v1444_v9  ;;  %v1674_v0 = vmul.f32 1.442695, %v1673_v53 }
 0x9d8   : > { %v1446_v18 = vadd.f32 %v3580_v6, %v1445_v13  ;;  %3583 = vpow2.f32 %v1674_v0 }
 0x9d9   : > { %v3582_v19 = vpop.eup %3581 }
 0x9da   : > { %v1450_v22 = vsel %vm1449_vm1, %v3580_v6, %v1446_v18  ;;  %v1574_v23 = vmul.f32 %v3582_v19, %v1572_v12  ;;  %vm1579_vm3 = vweird.f32 %v3582_v19  ;;  %v1485_v49 = vpop.permute.xlu2 %1484 }
 0x9db   : > { %v1455_v24 = vsel %vm1452_vm2, %v1454_v36, %v1450_v22  ;;  %vm1580_vm8 = vmor %vm1578_vm4, %vm1579_vm3  ;;  %1505 = vmatpush.msrb.mxu2 %v1485_v49 }
 0x9dc   : > { %v1575_v26 = vsub.f32 1.0, %v1574_v23  ;;  %v1456_v27 = vmul.f32 %v3576_v54, %v1455_v24  ;;  %v3437_v54 = vpack.i.bf16 %v4056_v40, %v4020_v5 }
 0x9de   : > { %v3584_v29 = vpop.eup %3583  ;;  %v1576_v31 = vmul.f32 %v3582_v19, %v1575_v26  ;;  %3299 = vmatmul.msk.f32.vlgmr.msra.gmra.mxu3 %vm542_vm6, %v1456_v27 }
 0x9df   : > { %v1676_v21 = vsel %vm1352_vm10, %v3584_v29, 0.0 }
 0x9e0   : > { %v1577_v33 = vadd.f32 %v3582_v19, %v1576_v31  ;;  %1677 = vadd.xlane.f32.xlu0 %v1676_v21 }
 0x9e2   : > { %v1581_v38 = vsel %vm1580_vm8, %v3582_v19, %v1577_v33 }
 0x9e3   : > { %v1586_v14 = vsel %vm1583_vm11, %v1585_v55, %v1581_v38  ;;  %v4311_v38 = vld [vmem:[%s4686_s5 + $0x58] sm:$0xff] }
 0x9e4   : > { %v1587_v47 = vmul.f32 %v3578_v61, %v1586_v14  ;;  %v4316_v55 = vld [vmem:[%s4686_s5 + $0x18] sm:$0xff] }
 0x9ea   : > { %v1589_v16 = vpop.permute.xlu1 %1588 }
 0x9eb   : > { %3304 = vmatpush.msk.msrb.mxu3 %vm546_vm5, %v1589_v16  ;;  %v3442_v16 = vpack.i.bf16 %v4195_v34, %v4188_v17  ;;  %v3452_v17 = vpack.i.bf16 %v4219_v41, %v4213_v37 }
 0x9ec   : > { %3305 = vmatmul.msk.f32.vlgmr.msrb.gmra.mxu3 %vm542_vm6, %v1587_v47 }
 0x9f4   : > { %1694 = vrot.lane.b32.xlu0 %v4152_v30, %s4747_s25 }
 0x9fc   : > { %3438 = vrot.lane.b32.xlu0 %v3437_v54, %s4742_s15 }
 0xa04   : > { %3443 = vrot.lane.b32.xlu0 %v3442_v16, %s4742_s15 }
 0xa53   : > { %v1678_v56 = vpop.xlane.xlu0 %1677 }
 0xa54   : > { %3585 = vrcp.f32 %v1678_v56  ;;  %v1690_v61 = vand.u32 2147483648, %v1678_v56  ;;  %v1688_v39 = vand.u32 2147483647, %v1678_v56  ;;  %vm1684_vm12 = vweird.f32 %v1678_v56 }
 0xa56   : > { %v1691_v30 = vor.u32 1.1754944e-38, %v1690_v61  ;;  %vm1689_vm15 = vcmp.eq.f32.partialorder %v1688_v39, 8.507059e+37 }
 0xa5a   : > { %v3586_v58 = vpop.eup %3585 }
 0xa5b   : > { %v1680_v62 = vmul.f32 %v3586_v58, %v1678_v56  ;;  %vm1685_vm10 = vweird.f32 %v3586_v58 }
 0xa5c   : > { %vm1686_vm14 = vmor %vm1684_vm12, %vm1685_vm10 }
 0xa5d   : > { %v1681_v1 = vsub.f32 1.0, %v1680_v62 }
 0xa5f   : > { %v1682_v2 = vmul.f32 %v3586_v58, %v1681_v1 }
 0xa61   : > { %v1683_v6 = vadd.f32 %v3586_v58, %v1682_v2  ;;  %v1481_v4 = vpop.f32.mrf.mxu3 }
 0xa62   : > { %3300 = vmatmul.msk.f32.vlgmr.msrb.gmra.mxu2 %vm652_vm7, %v1481_v4  ;;  %v3519_v4 = vld [vmem:[%s4690_s9 + $0x15] ss:$0 sm:$0xff] }
 0xa63   : > { %v1687_v5 = vsel %vm1686_vm14, %v3586_v58, %v1683_v6  ;;  %v3447_v58 = vpack.i.bf16 %v4207_v32, %v4201_v28 }
 0xa64   : > { %v1692_v40 = vsel %vm1689_vm15, %v1691_v30, %v1687_v5  ;;  %v3521_v5 = vld [vmem:[%s4690_s9 + $0x16] ss:$0 sm:$0xff] }
 0xa65   : > { %v1693_v63 = vmul.f32 %v3584_v29, %v1692_v40  ;;  %3448 = vrot.lane.b32.xlu0 %v3447_v58, %s4742_s15 }
 0xa66   : > { %v1695_v12 = vpop.permute.xlu0 %1694 }
 0xa67   : > { %3309 = vmatpush.msk.msrb.mxu0 %vm546_vm5, %v1695_v12  ;;  %v3457_v12 = vpack.i.bf16 %v4231_v46, %v4225_v43 }
 0xa68   : > { %3310 = vmatmul.msk.f32.vlgmr.msrb.gmra.mxu0 %vm542_vm6, %v1693_v63 }
 0xa6d   : > { %3453 = vrot.lane.b32.xlu0 %v3452_v17, %s4742_s15 }
 0xa6e   : > { %v3439_v7 = vpop.permute.xlu0 %3438 }
 0xa6f   : > { %v3441_v9 = vunpack.i.h.bf16 %v3439_v7  ;;  %v3440_v53 = vunpack.i.l.bf16 %v3439_v7  ;;  %v1612_v10 = vpop.f32.mrf.mxu3 }
 0xa71   : > { %1636 = vmatpush.msra.mxu2 %v3440_v53  ;;  %1742 = vmatpush.msra.mxu3 %v3441_v9  ;;  %v3520_v9 = vld [vmem:[%s4690_s9 + $0xf] ss:$0 sm:$0xff] }
 0xa72   : > { %3306 = vmatmul.msk.f32.vlgmr.msra.gmra.mxu2 %vm652_vm7, %v1612_v10 }
 0xa73   : > { %1801 = vmatpush.msrb.mxu2 %v3416_v15  ;;  %v1210_v15 = vadd.f32 %v3517_v44, %v4242_v42 }
 0xa75   : > { %1802 = vmatpush.msrb.mxu2 %v3421_v3  ;;  %3458 = vrot.lane.b32.xlu0 %v3457_v12, %s4742_s15 }
 0xa76   : > { %v3444_v46 = vpop.permute.xlu0 %3443 }
 0xa77   : > { %1803 = vmatpush.msrb.mxu2 %v3426_v51 }
 0xa79   : > { %1804 = vmatpush.msrb.mxu2 %v3431_v48 }
 0xae5   : > { %v1718_v13 = vpop.f32.mrf.mxu0  ;;  %v1507_v11 = vpop.f32.mrf.mxu2 }
 0xae6   : > { %3311 = vmatmul.msk.f32.vlgmr.msra.gmra.mxu3 %vm652_vm7, %v1718_v13  ;;  %v1534_v18 = vadd.f32 %v4244_v52, %v1507_v11  ;;  %v1212_v52 = vadd.f32 %v1210_v15, %v4168_v59  ;;  %v4298_v59 = vld [vmem:[%s4686_s5 + $0xd8] sm:$0xff]  ;;  %v3522_v13 = vld [vmem:[%s4690_s9 + $0x10] ss:$0 sm:$0xff] }
 0xae7   : > { %1960 = vmatpush.msra.mxu0 %v4298_v59 }
 0xae8   : > { %v1215_v36 = vsel %vm446_vm0, %v1212_v52, 0.0 }
 0xae9   : > { %1961 = vmatpush.msra.mxu0 %v4304_v20 }
 0xaeb   : > { %1962 = vmatpush.msra.mxu0 %v4311_v38 }
 0xaed   : > { %1963 = vmatpush.msra.mxu0 %v4316_v55 }
 0xaf5   : > { %v1638_v0 = vpop.f32.mrf.mxu2 }
 0xaf6   : > { %v1641_v19 = vadd.f32 %v1638_v0, %v1534_v18  ;;  %v3445_v0 = vunpack.i.l.bf16 %v3444_v46  ;;  %v3446_v18 = vunpack.i.h.bf16 %v3444_v46 }
 0xaf8   : > { %1898 = vmatpush.msra.mxu1 %v3445_v0 }
 0xafa   : > { %1899 = vmatpush.msra.mxu1 %v3446_v18 }
 0xb69   : > { %v1744_v50 = vpop.f32.mrf.mxu3 }
 0xb6a   : > { %v1747_v3 = vadd.f32 %v1744_v50, %v1641_v19  ;;  %v3523_v19 = vld [vmem:[%s4691_s10 + $0x1] ss:$0 sm:$0xff] }
 0xb6c   : > { %v1750_v57 = vadd.f32 %v3518_v45, %v1747_v3  ;;  %v3449_v45 = vpop.permute.xlu0 %3448 }
 0xb6d   : > { %v3450_v3 = vunpack.i.l.bf16 %v3449_v45 }
 0xb6e   : > { %v1751_v51 = vadd.f32 %v1750_v57, %v4114_v60  ;;  %v3451_v57 = vunpack.i.h.bf16 %v3449_v45 }
 0xb6f   : > { %1900 = vmatpush.msra.mxu1 %v3450_v3 }
 0xb70   : > { %v1754_v48 = vsel %vm511_vm13, %v1751_v51, 0.0 }
 0xb71   : > { %1755 = vadd.xlane.f32.xlu1 %v1754_v48  ;;  %1901 = vmatpush.msra.mxu1 %v3451_v57 }
 0xb79   : > { %1216 = vadd.xlane.f32.xlu1 %v1215_v36 }
 0xbe4   : > { %v1756_v22 = vpop.xlane.xlu1 %1755 }
 0xbe5   : > { %v1757_v23 = vmul.f32 %v1756_v22, %v3853_v8 }
 0xbe7   : > { %v1758_v24 = vsub.f32 %v1751_v51, %v1757_v23 }
 0xbe9   : > { %v1759_v26 = vmul.f32 %v1758_v24, %v1758_v24 }
 0xbeb   : > { %v1760_v27 = vsel %vm511_vm13, %v1759_v26, 0.0 }
 0xbec   : > { %1761 = vadd.xlane.f32.xlu2 %v1760_v27  ;;  %v1217_v29 = vpop.xlane.xlu1 %1216 }
 0xbed   : > { %v1218_v60 = vmul.f32 %v1217_v29, %v3853_v8 }
 0xbef   : > { %v1219_v42 = vsub.f32 %v1212_v52, %v1218_v60  ;;  %v3454_v52 = vpop.permute.xlu0 %3453 }
 0xbf0   : > { %v3455_v36 = vunpack.i.l.bf16 %v3454_v52 }
 0xbf1   : > { %v1220_v31 = vmul.f32 %v1219_v42, %v1219_v42 }
 0xbf2   : > { %1902 = vmatpush.msra.mxu1 %v3455_v36 }
 0xbf3   : > { %v1221_v21 = vsel %vm446_vm0, %v1220_v31, 0.0 }
 0xbf4   : > { %1222 = vadd.xlane.f32.xlu1 %v1221_v21 }
 0xbf7   : > { %v3459_v31 = vpop.permute.xlu0 %3458 }
 0xc5f   : > { %v1762_v33 = vpop.xlane.xlu2 %1761 }
 0xc60   : > { %v1763_v35 = vmul.f32 %v1762_v33, %v3853_v8  ;;  %v3460_v33 = vunpack.i.l.bf16 %v3459_v31 }
 0xc62   : > { %v1764_v14 = vadd.f32 1e-12, %v1763_v35 }
 0xc64   : > { %3587 = vrsqrt.f32 %v1764_v14  ;;  %vm1771_vm2 = vweird.f32 %v1764_v14 }
 0xc67   : > { %v1223_v47 = vpop.xlane.xlu1 %1222 }
 0xc68   : > { %v1224_v54 = vmul.f32 %v1223_v47, %v3853_v8 }
 0xc6a   : > { %v3588_v49 = vpop.eup %3587  ;;  %v1225_v56 = vadd.f32 1e-12, %v1224_v54 }
 0xc6b   : > { %v1766_v62 = vmul.f32 %v3588_v49, %v1764_v14  ;;  %vm1772_vm1 = vweird.f32 %v3588_v49  ;;  %v3461_v14 = vunpack.i.h.bf16 %v3459_v31 }
 0xc6c   : > { %3589 = vrsqrt.f32 %v1225_v56  ;;  %vm1773_vm3 = vmor %vm1771_vm2, %vm1772_vm1  ;;  %vm1232_vm8 = vweird.f32 %v1225_v56 }
 0xc6d   : > { %v1767_v1 = vmul.f32 %v3588_v49, %v1766_v62 }
 0xc6f   : > { %v1768_v61 = vmul.f32 0.5, %v1767_v1 }
 0xc71   : > { %v1769_v2 = vsub.f32 1.5, %v1768_v61 }
 0xc72   : > { %v3590_v39 = vpop.eup %3589 }
 0xc73   : > { %v1770_v34 = vmul.f32 %v3588_v49, %v1769_v2  ;;  %v1227_v6 = vmul.f32 %v3590_v39, %v1225_v56  ;;  %vm1233_vm4 = vweird.f32 %v3590_v39 }
 0xc74   : > { %vm1234_vm11 = vmor %vm1232_vm8, %vm1233_vm4 }
 0xc75   : > { %v1774_v28 = vsel %vm1773_vm3, %v3588_v49, %v1770_v34  ;;  %v1228_v32 = vmul.f32 %v3590_v39, %v1227_v6 }
 0xc76   : > { %v1775_v30 = vmul.f32 %v1774_v28, %v1758_v24  ;;  %v3456_v24 = vunpack.i.h.bf16 %v3454_v52 }
 0xc77   : > { %v1229_v40 = vmul.f32 0.5, %v1228_v32 }
 0xc78   : > { %v1777_v63 = vmul.f32 %v3519_v4, %v1775_v30  ;;  %1903 = vmatpush.msra.mxu1 %v3456_v24 }
 0xc79   : > { %v1230_v37 = vsub.f32 1.5, %v1229_v40 }
 0xc7a   : > { %v4336_v41 = vadd.f32 %v3521_v5, %v1777_v63  ;;  %1904 = vmatpush.msra.mxu1 %v3460_v33 }
 0xc7b   : > { %v1231_v7 = vmul.f32 %v3590_v39, %v1230_v37 }
 0xc7c   : > { %3312 = vmatmul.msk.f32.vlgmr.msrb.gmra.mxu2 %vm446_vm0, %v4336_v41  ;;  %1905 = vmatpush.msra.mxu1 %v3461_v14 }
 0xc7d   : > { %v1235_v53 = vsel %vm1234_vm11, %v3590_v39, %v1231_v7 }
 0xc7e   : > { %v1236_v10 = vmul.f32 %v1235_v53, %v1219_v42 }
 0xc80   : > { %v1238_v11 = vmul.f32 %v3520_v9, %v1236_v10 }
 0xc82   : > { %v4349_v43 = vadd.f32 %v3522_v13, %v1238_v11  ;;  %v3525_v13 = vld [vmem:[%s4690_s9 + $0x17] ss:$0 sm:$0xff] }
 0xc84   : > { %3315 = vmatmul.msk.f32.vlgmr.msra.gmra.mxu0 %vm446_vm0, %v4349_v43 }
 0xcff   : > { %v1806_v50 = vpop.f32.mrf.mxu2 }
 0xd00   : > { %v1807_v44 = vadd.f32 %v3523_v19, %v1806_v50  ;;  %v3467_v19 = vpack.i.bf16 %v4316_v55, %v4311_v38 }
 0xd02   : > { %v1810_v51 = vmul.f32 0.70710677, %v1807_v44  ;;  %v1809_v9 = vmul.f32 0.5, %v1807_v44  ;;  %3468 = vrot.lane.b32.xlu1 %v3467_v19, %s4742_s15 }
 0xd04   : > { %v1811_v15 = vmul.f32 %v1810_v51, %v1810_v51 }
 0xd06   : > { %v1812_v48 = vmin.f32 %v1811_v15, 16.0 }
 0xd08   : > { %v1813_v22 = vmul.f32 2.1237322e-06, %v1812_v48  ;;  %v1824_v23 = vmul.f32 3.8918573e-05, %v1812_v48 }
 0xd0a   : > { %v1814_v26 = vadd.f32 0.00028619796, %v1813_v22  ;;  %v1825_v27 = vadd.f32 0.001143296, %v1824_v23 }
 0xd0c   : > { %v1815_v29 = vmul.f32 %v1814_v26, %v1812_v48  ;;  %v1826_v60 = vmul.f32 %v1825_v27, %v1812_v48 }
 0xd0e   : > { %v1827_v42 = vadd.f32 0.014752088, %v1826_v60  ;;  %v1816_v21 = vadd.f32 0.0036580483, %v1815_v29 }
 0xd10   : > { %v1828_v35 = vmul.f32 %v1827_v42, %v1812_v48  ;;  %v1817_v47 = vmul.f32 %v1816_v21, %v1812_v48 }
 0xd12   : > { %v1829_v16 = vadd.f32 0.112945676, %v1828_v35  ;;  %v1818_v56 = vadd.f32 0.05243302, %v1817_v47  ;;  %v3526_v35 = vld [vmem:[%s4690_s9 + $0x18] ss:$0 sm:$0xff] }
 0xd13   : > { %v3527_v47 = vld [vmem:[%s4690_s9 + $0x19] ss:$0 sm:$0xff] }
 0xd14   : > { %v1830_v54 = vmul.f32 %v1829_v16, %v1812_v48  ;;  %v1819_v1 = vmul.f32 %v1818_v56, %v1812_v48  ;;  %v3529_v56 = vld [vmem:[%s4690_s9 + $0x1b] ss:$0 sm:$0xff] }
 0xd16   : > { %v1831_v49 = vadd.f32 0.4994258, %v1830_v54  ;;  %v1820_v61 = vadd.f32 0.18741608, %v1819_v1 }
 0xd18   : > { %v1832_v58 = vmul.f32 %v1831_v49, %v1812_v48  ;;  %v1821_v39 = vmul.f32 %v1820_v61, %v1812_v48  ;;  %v1965_v61 = vpop.f32.mrf.mxu0 }
 0xd1a   : > { %v1833_v62 = vadd.f32 1.0, %v1832_v58  ;;  %v1822_v4 = vadd.f32 1.1283791, %v1821_v39 }
 0xd1c   : > { %3591 = vrcp.f32 %v1833_v62  ;;  %v1845_v6 = vand.u32 2147483648, %v1833_v62  ;;  %v1843_v32 = vand.u32 2147483647, %v1833_v62  ;;  %vm1839_vm12 = vweird.f32 %v1833_v62 }
 0xd1d   : > { %v1823_v40 = vmul.f32 %v1822_v4, %v1810_v51  ;;  %v3462_v51 = vpack.i.bf16 %v4304_v20, %v4298_v59 }
 0xd1e   : > { %v1846_v5 = vor.u32 1.1754944e-38, %v1845_v6  ;;  %vm1844_vm15 = vcmp.eq.f32.partialorder %v1843_v32, 8.507059e+37 }
 0xd22   : > { %v3592_v2 = vpop.eup %3591 }
 0xd23   : > { %v1835_v17 = vmul.f32 %v3592_v2, %v1833_v62  ;;  %vm1840_vm10 = vweird.f32 %v3592_v2  ;;  %v3524_v62 = vld [vmem:[%s4690_s9 + $0x1a] ss:$0 sm:$0xff] }
 0xd24   : > { %vm1841_vm14 = vmor %vm1839_vm12, %vm1840_vm10 }
 0xd25   : > { %v1836_v34 = vsub.f32 1.0, %v1835_v17  ;;  %v1966_v17 = vadd.f32 %v3524_v62, %v1965_v61 }
 0xd27   : > { %v1837_v28 = vmul.f32 %v3592_v2, %v1836_v34 }
 0xd29   : > { %v1838_v30 = vadd.f32 %v3592_v2, %v1837_v28 }
 0xd2b   : > { %v1842_v63 = vsel %vm1841_vm14, %v3592_v2, %v1838_v30 }
 0xd2c   : > { %v1847_v37 = vsel %vm1844_vm15, %v1846_v5, %v1842_v63 }
 0xd2d   : > { %v1848_v12 = vmul.f32 %v1847_v37, %v1823_v40 }
 0xd2f   : > { %v3313_v7 = vclamps-f32 %v1848_v12, 1.0 }
 0xd31   : > { %v1851_v53 = vadd.f32 1.0, %v3313_v7 }
 0xd33   : > { %v1852_v10 = vmul.f32 %v1851_v53, %v1809_v9 }
 0xd35   : > { %3314 = vmatmul.msk.f32.vlgmr.msra.gmra.mxu1 %vm1188_vm9, %v1852_v10 }
 0xd74   : > { %v3469_v22 = vpop.permute.xlu1 %3468 }
 0xd75   : > { %v3470_v27 = vunpack.i.l.bf16 %v3469_v22  ;;  %v3471_v60 = vunpack.i.h.bf16 %v3469_v22 }
 0xdb2   : > { %v1907_v11 = vpop.f32.mrf.mxu1 }
 0xdb3   : > { %v1908_v46 = vadd.f32 %v3525_v13, %v1907_v11 }
 0xdb5   : > { %v1910_v0 = vadd.f32 %v1908_v46, %v4336_v41  ;;  %v3528_v41 = vld [vmem:[%s4690_s9 + $0x1c] ss:$0 sm:$0xff] }
 0xdb7   : > { %v1913_v18 = vsel %vm511_vm13, %v1910_v0, 0.0 }
 0xdb8   : > { %1914 = vadd.xlane.f32.xlu0 %v1913_v18 }
 0xdcc   : > { %2013 = vrot.lane.b32.xlu0 %v3528_v41, %s4737_s16 }
 0xe2b   : > { %v1915_v45 = vpop.xlane.xlu0 %1914 }
 0xe2c   : > { %v1916_v50 = vmul.f32 %v1915_v45, %v3853_v8 }
 0xe2e   : > { %v1917_v3 = vsub.f32 %v1910_v0, %v1916_v50 }
 0xe30   : > { %v1918_v44 = vmul.f32 %v1917_v3, %v1917_v3 }
 0xe32   : > { %v1919_v57 = vsel %vm511_vm13, %v1918_v44, 0.0 }
 0xe33   : > { %1920 = vadd.xlane.f32.xlu2 %v1919_v57 }
 0xe3e   : > { %v2014_v58 = vpop.permute.xlu0 %2013 }
 0xe4b   : > { %3463 = vrot.lane.b32.xlu2 %v3462_v51, %s4742_s15 }
 0xea6   : > { %v1921_v15 = vpop.xlane.xlu2 %1920 }
 0xea7   : > { %v1922_v48 = vmul.f32 %v1921_v15, %v3853_v8 }
 0xea9   : > { %v1923_v52 = vadd.f32 1e-12, %v1922_v48 }
 0xeab   : > { %3593 = vrsqrt.f32 %v1923_v52  ;;  %vm1930_vm1 = vweird.f32 %v1923_v52 }
 0xeae   : > { %v3464_v36 = vpop.permute.xlu2 %3463 }
 0xeaf   : > { %v3466_v23 = vunpack.i.h.bf16 %v3464_v36  ;;  %v3465_v24 = vunpack.i.l.bf16 %v3464_v36 }
 0xeb1   : > { %v3594_v26 = vpop.eup %3593  ;;  %1999 = vmatpush.msrb.mxu3 %v3465_v24 }
 0xeb2   : > { %v1925_v29 = vmul.f32 %v3594_v26, %v1923_v52  ;;  %vm1931_vm13 = vweird.f32 %v3594_v26 }
 0xeb3   : > { %2000 = vmatpush.msrb.mxu3 %v3466_v23  ;;  %vm1932_vm2 = vmor %vm1930_vm1, %vm1931_vm13 }
 0xeb4   : > { %v1926_v42 = vmul.f32 %v3594_v26, %v1925_v29 }
 0xeb5   : > { %2001 = vmatpush.msrb.mxu3 %v3470_v27 }
 0xeb6   : > { %v1927_v31 = vmul.f32 0.5, %v1926_v42 }
 0xeb7   : > { %2002 = vmatpush.msrb.mxu3 %v3471_v60 }
 0xeb8   : > { %v1928_v21 = vsub.f32 1.5, %v1927_v31 }
 0xeba   : > { %v1929_v33 = vmul.f32 %v3594_v26, %v1928_v21 }
 0xebc   : > { %v1933_v14 = vsel %vm1932_vm2, %v3594_v26, %v1929_v33 }
 0xebd   : > { %v1934_v16 = vmul.f32 %v1933_v14, %v1917_v3 }
 0xebf   : > { %v1936_v54 = vmul.f32 %v3526_v35, %v1934_v16 }
 0xec1   : > { %v1938_v49 = vadd.f32 %v3527_v47, %v1936_v54 }
 0xec3   : > { %3316 = vmatmul.msk.f32.vlgmr.msrb.gmra.mxu3 %vm446_vm0, %v1938_v49 }
 0xf46   : > { %v2004_v1 = vpop.f32.mrf.mxu3 }
 0xf47   : > { %v2009_v2 = vadd.f32 %v3529_v56, %v2004_v1  ;;  %v4388_v39 = vadd.f32 %v2014_v58, %v2004_v1 }
 0xf49   : > { %2068 = vrot.lane.b32.xlu0 %v4388_v39, %s4742_s15  ;;  %3317 = vmatpush.xpose.msk.msra.mxu2 %vm652_vm7, %v2009_v2 }
 0xf4c   : > { %3318 = vmatmul.msk.f32.vlgmr.msra.gmra.mxu2 %vm652_vm7, %v1966_v17 }
 0xf51   : > { %2097 = vrot.lane.b32.xlu0 %v2009_v2, %s4743_s13 }
 0xf59   : > { %2095 = vrot.lane.b32.xlu0 %v1966_v17, %s4743_s13 }
 0xf61   : > { %2228 = vrot.lane.b32.xlu0 %v2009_v2, %s4748_s12 }
 0xf69   : > { %2226 = vrot.lane.b32.xlu0 %v1966_v17, %s4748_s12 }
 0xf71   : > { %2332 = vrot.lane.b32.xlu0 %v1966_v17, %s4749_s7 }
 0xfbb   : > { %v2069_v34 = vpop.permute.xlu0 %2068 }
 0xfbc   : > { %3319 = vmatpush.msk.msrb.mxu0 %vm546_vm5, %v2069_v34 }
 0xfc3   : > { %v2098_v6 = vpop.permute.xlu0 %2097 }
 0xfc4   : > { %3321 = vmatpush.xpose.msk.msra.mxu3 %vm652_vm7, %v2098_v6 }
 0xfcb   : > { %v2096_v4 = vpop.permute.xlu0 %2095 }
 0xfcc   : > { %3322 = vmatmul.msk.f32.vlgmr.msra.gmra.mxu3 %vm652_vm7, %v2096_v4 }
 0xfcf   : > { %v2040_v28 = vpop.f32.mrf.mxu2 }
 0xfd0   : > { %v2041_v32 = vadd.f32 %v4148_v25, %v2040_v28 }
 0xfd2   : > { %v2043_v30 = vsel %vm542_vm6, %v2041_v32, -inf }
 0xfd3   : > { %v2229_v5 = vpop.permute.xlu0 %2228  ;;  %2044 = vmax.xlane.f32.xlu2 %v2043_v30 }
 0xfd4   : > { %3327 = vmatpush.xpose.msk.msrb.mxu3 %vm652_vm7, %v2229_v5 }
 0xfdb   : > { %v2227_v40 = vpop.permute.xlu0 %2226 }
 0xfdc   : > { %3328 = vmatmul.msk.f32.vlgmr.msrb.gmra.mxu3 %vm652_vm7, %v2227_v40 }
 0xfe3   : > { %v2333_v61 = vpop.permute.xlu0 %2332 }
 0xfeb   : > { %2200 = vrot.lane.b32.xlu2 %v4316_v55, %s4737_s16 }
0x1046   : > { %v2045_v63 = vpop.xlane.xlu2 %2044 }
0x1047   : > { %v2046_v37 = vsub.f32 %v2041_v32, %v2045_v63 }
0x1049   : > { %v2047_v12 = vmul.f32 1.442695, %v2046_v37 }
0x104b   : > { %3595 = vpow2.f32 %v2047_v12 }
0x104e   : > { %v2201_v46 = vpop.permute.xlu2 %2200 }
0x104f   : > { %v2120_v7 = vpop.f32.mrf.mxu3  ;;  %2221 = vmatpush.msra.mxu0 %v2201_v46 }
0x1050   : > { %v2121_v9 = vadd.f32 %v4148_v25, %v2120_v7 }
0x1051   : > { %v3596_v53 = vpop.eup %3595 }
0x1052   : > { %v2123_v10 = vsel %vm542_vm6, %v2121_v9, -inf  ;;  %v2049_v13 = vsel %vm542_vm6, %v3596_v53, 0.0 }
0x1053   : > { %2124 = vmax.xlane.f32.xlu2 %v2123_v10  ;;  %2050 = vadd.xlane.f32.xlu1 %v2049_v13 }
0x105f   : > { %v2251_v11 = vpop.f32.mrf.mxu3 }
0x1060   : > { %v2252_v55 = vadd.f32 %v4148_v25, %v2251_v11 }
0x1062   : > { %v2254_v0 = vsel %vm542_vm6, %v2252_v55, -inf }
0x106c   : > { %2334 = vrot.lane.b32.xlu1 %v2009_v2, %s4749_s7 }
0x1096   : > { %2255 = vmax.xlane.f32.xlu1 %v2254_v0 }
0x10af   : > { %2147 = vrot.lane.b32.xlu1 %v4388_v39, %s4750_s8 }
0x10b7   : > { %2411 = vrot.lane.b32.xlu1 %v4298_v59, %s4737_s16 }
0x10c6   : > { %v2051_v18 = vpop.xlane.xlu1 %2050  ;;  %v2125_v19 = vpop.xlane.xlu2 %2124 }
0x10c7   : > { %3597 = vrcp.f32 %v2051_v18  ;;  %v2126_v45 = vsub.f32 %v2121_v9, %v2125_v19  ;;  %v2063_v51 = vand.u32 2147483648, %v2051_v18  ;;  %v2061_v15 = vand.u32 2147483647, %v2051_v18 }
0x10c8   : > { %vm2057_vm4 = vweird.f32 %v2051_v18 }
0x10c9   : > { %v2127_v50 = vmul.f32 1.442695, %v2126_v45  ;;  %v2064_v59 = vor.u32 1.1754944e-38, %v2063_v51  ;;  %vm2062_vm11 = vcmp.eq.f32.partialorder %v2061_v15, 8.507059e+37 }
0x10cb   : > { %3599 = vpow2.f32 %v2127_v50 }
0x10cd   : > { %v3598_v3 = vpop.eup %3597 }
0x10ce   : > { %v2053_v44 = vmul.f32 %v3598_v3, %v2051_v18  ;;  %vm2058_vm3 = vweird.f32 %v3598_v3 }
0x10cf   : > { %vm2059_vm8 = vmor %vm2057_vm4, %vm2058_vm3 }
0x10d0   : > { %v2054_v57 = vsub.f32 1.0, %v2053_v44 }
0x10d1   : > { %v3600_v25 = vpop.eup %3599 }
0x10d2   : > { %v2055_v41 = vmul.f32 %v3598_v3, %v2054_v57  ;;  %v2129_v48 = vsel %vm542_vm6, %v3600_v25, 0.0 }
0x10d3   : > { %2130 = vadd.xlane.f32.xlu2 %v2129_v48 }
0x10d4   : > { %v2056_v52 = vadd.f32 %v3598_v3, %v2055_v41 }
0x10d6   : > { %v2060_v36 = vsel %vm2059_vm8, %v3598_v3, %v2056_v52 }
0x10d7   : > { %v2065_v22 = vsel %vm2062_vm11, %v2064_v59, %v2060_v36 }
0x10d8   : > { %v2066_v23 = vmul.f32 %v3596_v53, %v2065_v22  ;;  %v3637_v53 = vld [vmem:[%s3850_s26] ss:$0 sm:$0xff]  ;;  %s3160_s26 = scalar_lea.hbm %s4692_s11, %s3805_s21  ;;  %s3667_s21 = scalar_lea.hbm %s4692_s11, 2 }
0x10d9   : > { %s3164_s23 = sshll.u32 %s3160_s26, 4  ;;  %s3165_s23 = int_to_ptr.hbm [resolvable:$true] %s3164_s23 }
0x10da   : > { %3320 = vmatmul.msk.f32.vlgmr.msrb.gmra.mxu0 %vm542_vm6, %v2066_v23  ;;  %s3661_s4 = sshra.s32 %s3165_s23, 4  ;;  %s3662_s4 = int_to_ptr.hbm [resolvable:$true] %s3661_s4 }
0x10db   : > { %s3663_s30 = scalar_lea.hbm %s3662_s4, 1  ;;  %p3668_p0 = scmp.lt.s32.totalorder %s3662_s4, %s4692_s11 }
0x10dc   : > { %p3664_p11 = scmp.ne.s32.totalorder %s3662_s4, %s3663_s30  ;;  %p3669_p1 = scmp.lt.s32.totalorder %s3667_s21, %s3663_s30 }
0x10de   : > { %v2335_v24 = vpop.permute.xlu1 %2334  ;;  %p3665_p12 = pnand %p3664_p11, %p3822_p5  ;;  %p3670_p2 = por %p3669_p1, %p3668_p0 }
0x10df   : > { %3332 = vmatpush.xpose.msk.msrb.mxu0 %vm652_vm7, %v2335_v24 }
0x10e0   : > { %p3666_p13 = pneg %p3665_p12 }
0x10e2   : > { %p3671_p3 = pnand %p3670_p2, %p3666_p13 }
0x1109   : > { %v2256_v26 = vpop.xlane.xlu1 %2255 }
0x110a   : > { %v2257_v27 = vsub.f32 %v2252_v55, %v2256_v26 }
0x110c   : > { %v2258_v29 = vmul.f32 1.442695, %v2257_v27 }
0x110e   : > { %3601 = vpow2.f32 %v2258_v29 }
0x1114   : > { %v3602_v60 = vpop.eup %3601 }
0x1115   : > { %v2260_v42 = vsel %vm542_vm6, %v3602_v60, 0.0 }
0x1116   : > { %2261 = vadd.xlane.f32.xlu2 %v2260_v42  ;;  %v3530_v42 = vld [vmem:[%s4690_s9 + $0x1d] ss:$0 sm:$0xff] }
0x1121   : > { %v2148_v31 = vpop.permute.xlu1 %2147 }
0x1122   : > { %3323 = vmatpush.msk.msrb.mxu2 %vm546_vm5, %v2148_v31 }
0x1129   : > { %v2412_v45 = vpop.permute.xlu1 %2411 }
0x112e   : > { %2278 = vrot.lane.b32.xlu2 %v4388_v39, %s4744_s0 }
0x1136   : > { %2305 = vrot.lane.b32.xlu2 %v4304_v20, %s4737_s16 }
0x1146   : > { %v2131_v21 = vpop.xlane.xlu2 %2130 }
0x1147   : > { %3603 = vrcp.f32 %v2131_v21  ;;  %v2143_v16 = vand.u32 2147483648, %v2131_v21  ;;  %v2141_v54 = vand.u32 2147483647, %v2131_v21  ;;  %vm2137_vm12 = vweird.f32 %v2131_v21 }
0x1149   : > { %v2144_v56 = vor.u32 1.1754944e-38, %v2143_v16  ;;  %vm2142_vm15 = vcmp.eq.f32.partialorder %v2141_v54, 8.507059e+37 }
0x114d   : > { %v3604_v33 = vpop.eup %3603 }
0x114e   : > { %v2133_v35 = vmul.f32 %v3604_v33, %v2131_v21  ;;  %vm2138_vm10 = vweird.f32 %v3604_v33 }
0x114f   : > { %vm2139_vm14 = vmor %vm2137_vm12, %vm2138_vm10 }
0x1150   : > { %v2134_v14 = vsub.f32 1.0, %v2133_v35 }
0x1152   : > { %v2135_v47 = vmul.f32 %v3604_v33, %v2134_v14 }
0x1154   : > { %v2136_v49 = vadd.f32 %v3604_v33, %v2135_v47 }
0x1156   : > { %v2140_v58 = vsel %vm2139_vm14, %v3604_v33, %v2136_v49 }
0x1157   : > { %v2092_v62 = vpop.f32.mrf.mxu0  ;;  %v2145_v1 = vsel %vm2142_vm15, %v2144_v56, %v2140_v58  ;;  %v4454_v58 = vld [vmem:[%s4686_s5 + $0xe0] sm:$0xff] }
0x1158   : > { %3326 = vmatmul.msk.f32.vlgmr.msra.gmra.mxu0 %vm652_vm7, %v2092_v62  ;;  %v2146_v20 = vmul.f32 %v3600_v25, %v2145_v1  ;;  %v4468_v1 = vld [vmem:[%s4686_s5 + $0x60] sm:$0xff] }
0x115a   : > { %3324 = vmatmul.msk.f32.vlgmr.msrb.gmra.mxu2 %vm542_vm6, %v2146_v20  ;;  %v2470_v20 = vld [vmem:[%s4686_s5 + $0x20] sm:$0xff] }
0x1160   : > { %3333 = vmatmul.msk.f32.vlgmr.msrb.gmra.mxu0 %vm652_vm7, %v2333_v61  ;;  %v3533_v61 = vld [vmem:[%s4690_s9 + $0x22] ss:$0 sm:$0xff] }
0x1189   : > { %v2262_v2 = vpop.xlane.xlu2 %2261 }
0x118a   : > { %3605 = vrcp.f32 %v2262_v2  ;;  %v2274_v28 = vand.u32 2147483648, %v2262_v2  ;;  %v2272_v30 = vand.u32 2147483647, %v2262_v2  ;;  %vm2268_vm1 = vweird.f32 %v2262_v2 }
0x118c   : > { %v2275_v40 = vor.u32 1.1754944e-38, %v2274_v28  ;;  %vm2273_vm3 = vcmp.eq.f32.partialorder %v2272_v30, 8.507059e+37 }
0x1190   : > { %v3606_v17 = vpop.eup %3605 }
0x1191   : > { %v2264_v34 = vmul.f32 %v3606_v17, %v2262_v2  ;;  %v2279_v6 = vpop.permute.xlu2 %2278  ;;  %vm2269_vm13 = vweird.f32 %v3606_v17  ;;  %v3534_v2 = vld [vmem:[%s4690_s9 + $0x21] ss:$0 sm:$0xff] }
0x1192   : > { %3329 = vmatpush.msk.msra.mxu2 %vm546_vm5, %v2279_v6  ;;  %vm2270_vm2 = vmor %vm2268_vm1, %vm2269_vm13  ;;  %2503 = vrot.lane.b32.xlu2 %v3534_v2, %s4737_s16 }
0x1193   : > { %v2265_v4 = vsub.f32 1.0, %v2264_v34 }
0x1194   : > { %2432 = vmatpush.msrb.mxu2 %v2412_v45 }
0x1195   : > { %v2266_v32 = vmul.f32 %v3606_v17, %v2265_v4 }
0x1197   : > { %v2267_v5 = vadd.f32 %v3606_v17, %v2266_v32 }
0x1199   : > { %v2271_v63 = vsel %vm2270_vm2, %v3606_v17, %v2267_v5  ;;  %v2306_v36 = vpop.permute.xlu2 %2305 }
0x119a   : > { %v2276_v37 = vsel %vm2273_vm3, %v2275_v40, %v2271_v63  ;;  %v3531_v63 = vld [vmem:[%s4690_s9 + $0x1e] ss:$0 sm:$0xff] }
0x119b   : > { %v2277_v12 = vmul.f32 %v3602_v60, %v2276_v37 }
0x119d   : > { %3330 = vmatmul.msk.f32.vlgmr.msra.gmra.mxu2 %vm542_vm6, %v2277_v12 }
0x11d5   : > { %v2223_v7 = vpop.f32.mrf.mxu0 }
0x11dd   : > { %v2357_v9 = vpop.f32.mrf.mxu0  ;;  %v2171_v22 = vpop.f32.mrf.mxu2 }
0x11de   : > { %v2358_v10 = vadd.f32 %v3637_v53, %v2357_v9 }
0x11e0   : > { %v2360_v13 = vsel %vm542_vm6, %v2358_v10, -inf }
0x11e1   : > { %2361 = vmax.xlane.f32.xlu0 %v2360_v13 }
0x1220   : > { %v2302_v23 = vpop.f32.mrf.mxu2 }
0x1254   : > { %v2362_v11 = vpop.xlane.xlu0 %2361 }
0x1255   : > { %v2363_v46 = vsub.f32 %v2358_v10, %v2362_v11  ;;  %v2504_v10 = vpop.permute.xlu2 %2503 }
0x1257   : > { %v2364_v55 = vmul.f32 1.442695, %v2363_v46  ;;  %v3535_v46 = vld [vmem:[%s4690_s9 + $0x20] ss:$0 sm:$0xff] }
0x1259   : > { %3607 = vpow2.f32 %v2364_v55 }
0x125f   : > { %v3608_v0 = vpop.eup %3607 }
0x1260   : > { %v2366_v18 = vsel %vm542_vm6, %v3608_v0, 0.0 }
0x1261   : > { %2367 = vadd.xlane.f32.xlu0 %v2366_v18 }
0x1275   : > { %2384 = vrot.lane.b32.xlu0 %v4388_v39, %s4745_s2 }
0x127d   : > { %2174 = vrot.lane.b32.xlu0 %v4311_v38, %s4737_s16 }
0x12d4   : > { %v2368_v19 = vpop.xlane.xlu0 %2367 }
0x12d5   : > { %3609 = vrcp.f32 %v2368_v19  ;;  %v2380_v57 = vand.u32 2147483648, %v2368_v19  ;;  %v2378_v25 = vand.u32 2147483647, %v2368_v19  ;;  %vm2374_vm8 = vweird.f32 %v2368_v19 }
0x12d7   : > { %v2381_v15 = vor.u32 1.1754944e-38, %v2380_v57  ;;  %vm2379_vm10 = vcmp.eq.f32.partialorder %v2378_v25, 8.507059e+37 }
0x12db   : > { %v3610_v50 = vpop.eup %3609 }
0x12dc   : > { %v2370_v3 = vmul.f32 %v3610_v50, %v2368_v19  ;;  %vm2375_vm4 = vweird.f32 %v3610_v50 }
0x12dd   : > { %vm2376_vm11 = vmor %vm2374_vm8, %vm2375_vm4 }
0x12de   : > { %v2371_v44 = vsub.f32 1.0, %v2370_v3  ;;  %v4505_v3 = vld [vmem:[%s3841_s14] ss:$0 sm:$0xff]  ;;  %s4751_s14 = smov 56  }
0x12e0   : > { %v2372_v51 = vmul.f32 %v3610_v50, %v2371_v44 }
0x12e2   : > { %v2373_v41 = vadd.f32 %v3610_v50, %v2372_v51 }
0x12e4   : > { %v2377_v48 = vsel %vm2376_vm11, %v3610_v50, %v2373_v41 }
0x12e5   : > { %v2382_v39 = vsel %vm2379_vm10, %v2381_v15, %v2377_v48 }
0x12e6   : > { %v2383_v52 = vmul.f32 %v3608_v0, %v2382_v39 }
0x12e7   : > { %v2385_v38 = vpop.permute.xlu0 %2384 }
0x12e8   : > { %3334 = vmatpush.msk.msra.mxu3 %vm546_vm5, %v2385_v38 }
0x12e9   : > { %3335 = vmatmul.msk.f32.vlgmr.msra.gmra.mxu3 %vm542_vm6, %v2383_v52 }
0x12ef   : > { %v2175_v59 = vpop.permute.xlu0 %2174 }
0x12f0   : > { %2195 = vmatpush.msrb.mxu1 %v2175_v59 }
0x12f1   : > { %3325 = vmatmul.msk.f32.vlgmr.msrb.gmra.mxu1 %vm652_vm7, %v2171_v22 }
0x12f2   : > { %2326 = vmatpush.msra.mxu1 %v2306_v36 }
0x12f4   : > { %2489 = vmatpush.msrb.mxu1 %v4454_v58 }
0x12f9   : > { %3331 = vmatmul.msk.f32.vlgmr.msra.gmra.mxu1 %vm652_vm7, %v2302_v23 }
0x136c   : > { %v2408_v24 = vpop.f32.mrf.mxu3 }
0x136d   : > { %3336 = vmatmul.msk.f32.vlgmr.msrb.gmra.mxu2 %vm652_vm7, %v2408_v24 }
0x136e   : > { %v2197_v26 = vpop.f32.mrf.mxu1 }
0x136f   : > { %v2224_v29 = vadd.f32 %v2223_v7, %v2197_v26  ;;  %v3532_v7 = vld [vmem:[%s4690_s9 + $0x1f] ss:$0 sm:$0xff] }
0x1376   : > { %v2328_v27 = vpop.f32.mrf.mxu1 }
0x1377   : > { %v2331_v60 = vadd.f32 %v2328_v27, %v2224_v29 }
0x13f0   : > { %v2434_v31 = vpop.f32.mrf.mxu2 }
0x13f1   : > { %v2437_v21 = vadd.f32 %v2434_v31, %v2331_v60 }
0x13f3   : > { %v2440_v33 = vadd.f32 %v3530_v42, %v2437_v21 }
0x13f5   : > { %v2441_v35 = vadd.f32 %v2440_v33, %v4349_v43  ;;  %v4460_v43 = vld [vmem:[%s4686_s5 + $0xa0] sm:$0xff] }
0x13f6   : > { %v3472_v62 = vpack.i.bf16 %v4454_v58, %v4460_v43  ;;  %2490 = vmatpush.msrb.mxu1 %v4460_v43 }
0x13f7   : > { %v2444_v14 = vsel %vm446_vm0, %v2441_v35, 0.0 }
0x13f8   : > { %2445 = vadd.xlane.f32.xlu0 %v2444_v14  ;;  %2491 = vmatpush.msrb.mxu1 %v4468_v1 }
0x13fa   : > { %2492 = vmatpush.msrb.mxu1 %v2470_v20 }
0x140c   : > { %2510 = vrot.lane.b32.xlu0 %v3533_v61, %s4741_s3 }
0x146b   : > { %v2446_v16 = vpop.xlane.xlu0 %2445 }
0x146c   : > { %v2447_v47 = vmul.f32 %v2446_v16, %v3853_v8 }
0x146e   : > { %v2448_v54 = vsub.f32 %v2441_v35, %v2447_v47 }
0x1470   : > { %v2449_v49 = vmul.f32 %v2448_v54, %v2448_v54 }
0x1472   : > { %v2450_v56 = vsel %vm446_vm0, %v2449_v49, 0.0 }
0x1473   : > { %2451 = vadd.xlane.f32.xlu1 %v2450_v56 }
0x147e   : > { %v2511_v18 = vpop.permute.xlu0 %2510 }
0x14e6   : > { %v2452_v17 = vpop.xlane.xlu1 %2451 }
0x14e7   : > { %v2453_v34 = vmul.f32 %v2452_v17, %v3853_v8 }
0x14e9   : > { %v2454_v6 = vadd.f32 1e-12, %v2453_v34 }
0x14eb   : > { %3611 = vrsqrt.f32 %v2454_v6  ;;  %vm2461_vm6 = vweird.f32 %v2454_v6 }
0x14f1   : > { %v3612_v4 = vpop.eup %3611 }
0x14f2   : > { %v2456_v28 = vmul.f32 %v3612_v4, %v2454_v6  ;;  %vm2462_vm5 = vweird.f32 %v3612_v4 }
0x14f3   : > { %vm2463_vm12 = vmor %vm2461_vm6, %vm2462_vm5 }
0x14f4   : > { %v2457_v32 = vmul.f32 %v3612_v4, %v2456_v28 }
0x14f6   : > { %v2458_v30 = vmul.f32 0.5, %v2457_v32 }
0x14f8   : > { %v2459_v5 = vsub.f32 1.5, %v2458_v30 }
0x14fa   : > { %v2460_v40 = vmul.f32 %v3612_v4, %v2459_v5 }
0x14fc   : > { %v2464_v37 = vsel %vm2463_vm12, %v3612_v4, %v2460_v40 }
0x14fd   : > { %v2465_v12 = vmul.f32 %v2464_v37, %v2448_v54 }
0x14ff   : > { %v2467_v9 = vmul.f32 %v3531_v63, %v2465_v12 }
0x1501   : > { %v4489_v53 = vadd.f32 %v3532_v7, %v2467_v9 }
0x1503   : > { %3337 = vmatmul.msk.f32.vlgmr.msrb.gmra.mxu1 %vm446_vm0, %v4489_v53 }
0x1580   : > { %v2494_v13 = vpop.f32.mrf.mxu1 }
0x1581   : > { %v2506_v11 = vadd.f32 %v2504_v10, %v2494_v13  ;;  %v2499_v55 = vadd.f32 %v3535_v46, %v2494_v13  ;;  %v4516_v22 = vadd.f32 %v2511_v18, %v2494_v13 }
0x1583   : > { %2595 = vrot.lane.b32.xlu0 %v2506_v11, %s4750_s8  ;;  %2515 = vrot.lane.b32.xlu2 %v2506_v11, %s4742_s15  ;;  %s423_s8 = sand.u32 1, %s3701_s18  }
0x1584   : > { %s3152_s24 = scalar_lea.sflag [#allocation3], %s423_s8 }
0x158b   : > { %2593 = vrot.lane.b32.xlu0 %v2499_v55, %s4743_s13 }
0x1593   : > { %2831 = vrot.lane.b32.xlu0 %v2499_v55, %s4749_s7 }
0x15dd   : > { %v2516_v0 = vpop.permute.xlu2 %2515 }
0x15de   : > { %3338 = vmatpush.xpose.msk.msra.mxu0 %vm652_vm7, %v2516_v0 }
0x15e1   : > { %3339 = vmatmul.msk.f32.vlgmr.msra.gmra.mxu0 %vm652_vm7, %v2499_v55 }
0x15f5   : > { %v2596_v19 = vpop.permute.xlu0 %2595 }
0x15f6   : > { %3341 = vmatpush.xpose.msk.msra.mxu2 %vm652_vm7, %v2596_v19 }
0x15fd   : > { %v2594_v45 = vpop.permute.xlu0 %2593 }
0x15fe   : > { %3342 = vmatmul.msk.f32.vlgmr.msra.gmra.mxu2 %vm652_vm7, %v2594_v45 }
0x1605   : > { %v4514_v59 = vpop.permute.xlu0 %2831 }
0x165e   : > { %v2539_v50 = vpop.f32.mrf.mxu0 }
0x165f   : > { %v2540_v44 = vadd.f32 %v4505_v3, %v2539_v50 }
0x1661   : > { %v2542_v57 = vsel %vm652_vm7, %v2540_v44, -inf }
0x1662   : > { %2543 = vmax.xlane.f32.xlu2 %v2542_v57 }
0x167a   : > { %2699 = vrot.lane.b32.xlu2 %v2470_v20, %s4737_s16 }
0x1681   : > { %v2618_v51 = vpop.f32.mrf.mxu2 }
0x1682   : > { %v2619_v25 = vadd.f32 %v4505_v3, %v2618_v51  ;;  %2725 = vrot.lane.b32.xlu2 %v2499_v55, %s4748_s12 }
0x1684   : > { %v2621_v41 = vsel %vm652_vm7, %v2619_v25, -inf }
0x1685   : > { %2622 = vmax.xlane.f32.xlu0 %v2621_v41 }
0x16d5   : > { %v2544_v15 = vpop.xlane.xlu2 %2543 }
0x16d6   : > { %v2545_v48 = vsub.f32 %v2540_v44, %v2544_v15 }
0x16d8   : > { %v2546_v39 = vmul.f32 1.442695, %v2545_v48 }
0x16da   : > { %3613 = vpow2.f32 %v2546_v39 }
0x16dd   : > { %v2700_v58 = vpop.permute.xlu2 %2699 }
0x16e0   : > { %v3614_v52 = vpop.eup %3613 }
0x16e1   : > { %v2548_v38 = vsel %vm652_vm7, %v3614_v52, 0.0 }
0x16e2   : > { %2549 = vadd.xlane.f32.xlu1 %v2548_v38 }
0x16e5   : > { %v2726_v61 = vpop.permute.xlu2 %2725 }
0x16f8   : > { %v2623_v36 = vpop.xlane.xlu0 %2622 }
0x16f9   : > { %v2624_v23 = vsub.f32 %v2619_v25, %v2623_v36 }
0x16fb   : > { %v2625_v24 = vmul.f32 1.442695, %v2624_v23  ;;  %2567 = vrot.lane.b32.xlu1 %v4516_v22, %s4741_s3 }
0x16fd   : > { %3615 = vpow2.f32 %v2625_v24 }
0x1703   : > { %v3616_v26 = vpop.eup %3615  ;;  %2833 = vrot.lane.b32.xlu1 %v2506_v11, %s4745_s2 }
0x1704   : > { %v2627_v27 = vsel %vm652_vm7, %v3616_v26, 0.0 }
0x1705   : > { %2628 = vadd.xlane.f32.xlu0 %v2627_v27 }
0x170b   : > { %2727 = vrot.lane.b32.xlu1 %v2506_v11, %s4744_s0 }
0x1719   : > { %2645 = vrot.lane.b32.xlu0 %v4516_v22, %s4751_s14 }
0x1721   : > { %2672 = vrot.lane.b32.xlu0 %v4468_v1, %s4737_s16 }
0x1729   : > { %3473 = vrot.lane.b32.xlu0 %v3472_v62, %s4737_s16 }
0x1755   : > { %v2550_v29 = vpop.xlane.xlu1 %2549 }
0x1756   : > { %3617 = vrcp.f32 %v2550_v29  ;;  %v2562_v35 = vand.u32 2147483648, %v2550_v29  ;;  %vm2556_vm15 = vweird.f32 %v2550_v29  ;;  %v2560_v14 = vand.u32 2147483647, %v2550_v29 }
0x1758   : > { %v2563_v47 = vor.u32 1.1754944e-38, %v2562_v35  ;;  %vm2561_vm1 = vcmp.eq.f32.partialorder %v2560_v14, 8.507059e+37 }
0x175c   : > { %v3618_v60 = vpop.eup %3617 }
0x175d   : > { %v2552_v42 = vmul.f32 %v3618_v60, %v2550_v29  ;;  %vm2557_vm14 = vweird.f32 %v3618_v60 }
0x175e   : > { %vm2558_vm13 = vmor %vm2556_vm15, %vm2557_vm14 }
0x175f   : > { %v2553_v31 = vsub.f32 1.0, %v2552_v42 }
0x1761   : > { %v2554_v21 = vmul.f32 %v3618_v60, %v2553_v31 }
0x1763   : > { %v2555_v33 = vadd.f32 %v3618_v60, %v2554_v21 }
0x1765   : > { %v2559_v16 = vsel %vm2558_vm13, %v3618_v60, %v2555_v33 }
0x1766   : > { %v2564_v54 = vsel %vm2561_vm1, %v2563_v47, %v2559_v16 }
0x1767   : > { %v2565_v56 = vmul.f32 %v3614_v52, %v2564_v54 }
0x176d   : > { %v2568_v49 = vpop.permute.xlu1 %2567 }
0x176e   : > { %2588 = vmatpush.msrb.mxu3 %v2568_v49 }
0x176f   : > { %3340 = vmatmul.msk.f32.vlgmr.msrb.gmra.mxu3 %vm652_vm7, %v2565_v56 }
0x1770   : > { %2720 = vmatpush.msra.mxu3 %v2700_v58 }
0x1775   : > { %v2834_v43 = vpop.permute.xlu1 %2833 }
0x1776   : > { %3350 = vmatpush.xpose.msk.msrb.mxu3 %vm652_vm7, %v2834_v43 }
0x1778   : > { %v2629_v62 = vpop.xlane.xlu0 %2628 }
0x1779   : > { %3619 = vrcp.f32 %v2629_v62  ;;  %v2641_v34 = vand.u32 2147483648, %v2629_v62  ;;  %v2639_v4 = vand.u32 2147483647, %v2629_v62  ;;  %vm2635_vm3 = vweird.f32 %v2629_v62 }
0x177b   : > { %v2642_v32 = vor.u32 1.1754944e-38, %v2641_v34  ;;  %vm2640_vm8 = vcmp.eq.f32.partialorder %v2639_v4, 8.507059e+37  ;;  %v3536_v4 = vld [vmem:[%s4690_s9 + $0x23] ss:$0 sm:$0xff] }
0x177d   : > { %v2728_v1 = vpop.permute.xlu1 %2727 }
0x177e   : > { %3346 = vmatpush.xpose.msk.msrb.mxu2 %vm652_vm7, %v2728_v1 }
0x177f   : > { %v3620_v20 = vpop.eup %3619 }
0x1780   : > { %v2631_v2 = vmul.f32 %v3620_v20, %v2629_v62  ;;  %vm2636_vm2 = vweird.f32 %v3620_v20 }
0x1781   : > { %3347 = vmatmul.msk.f32.vlgmr.msrb.gmra.mxu2 %vm652_vm7, %v2726_v61  ;;  %vm2637_vm4 = vmor %vm2635_vm3, %vm2636_vm2 }
0x1782   : > { %v2632_v17 = vsub.f32 1.0, %v2631_v2 }
0x1784   : > { %v2633_v6 = vmul.f32 %v3620_v20, %v2632_v17 }
0x1786   : > { %v2634_v28 = vadd.f32 %v3620_v20, %v2633_v6 }
0x1788   : > { %v2638_v30 = vsel %vm2637_vm4, %v3620_v20, %v2634_v28 }
0x1789   : > { %v2643_v5 = vsel %vm2640_vm8, %v2642_v32, %v2638_v30 }
0x178a   : > { %v2644_v40 = vmul.f32 %v3616_v26, %v2643_v5 }
0x178b   : > { %v2646_v63 = vpop.permute.xlu0 %2645 }
0x178c   : > { %2666 = vmatpush.msra.mxu1 %v2646_v63 }
0x178d   : > { %3343 = vmatmul.msk.f32.vlgmr.msra.gmra.mxu1 %vm652_vm7, %v2644_v40 }
0x1793   : > { %v2673_v37 = vpop.permute.xlu0 %2672 }
0x1794   : > { %2693 = vmatpush.msrb.mxu0 %v2673_v37 }
0x179b   : > { %v3474_v42 = vpop.permute.xlu0 %3473 }
0x179c   : > { %v3476_v31 = vunpack.i.h.bf16 %v3474_v42  ;;  %v3475_v21 = vunpack.i.l.bf16 %v3474_v42 }
0x179e   : > { %2825 = vmatpush.msra.mxu0 %v3475_v21 }
0x17f2   : > { %v2590_v12 = vpop.f32.mrf.mxu3 }
0x17f3   : > { %3345 = vmatmul.msk.f32.vlgmr.msra.gmra.mxu3 %vm652_vm7, %v2590_v12 }
0x17fb   : > { %3351 = vmatmul.msk.f32.vlgmr.msrb.gmra.mxu3 %vm652_vm7, %v4514_v59 }
0x1804   : > { %v2750_v7 = vpop.f32.mrf.mxu2 }
0x1805   : > { %v2751_v9 = vadd.f32 %v4505_v3, %v2750_v7 }
0x1807   : > { %v2753_v10 = vsel %vm652_vm7, %v2751_v9, -inf }
0x1808   : > { %2754 = vmax.xlane.f32.xlu2 %v2753_v10  ;;  %v2972_v10 = vld [vmem:[%s4686_s5 + $0xf0] sm:$0xff] }
0x180a   : > { %v2668_v13 = vpop.f32.mrf.mxu1 }
0x180b   : > { %3344 = vmatmul.msk.f32.vlgmr.msrb.gmra.mxu0 %vm652_vm7, %v2668_v13  ;;  %v2970_v13 = vld [vmem:[%s4686_s5 + $0x70] sm:$0xff] }
0x180c   : > { %2990 = vmatpush.msrb.mxu0 %v2972_v10 }
0x1876   : > { %v4542_v11 = vpop.f32.mrf.mxu3 }
0x187b   : > { %v2755_v46 = vpop.xlane.xlu2 %2754 }
0x187c   : > { %v2756_v55 = vsub.f32 %v2751_v9, %v2755_v46  ;;  %v3639_v46 = vld [vmem:[%s4687_s6 + $0x38] sm:$0xff] }
0x187e   : > { %v2757_v0 = vmul.f32 1.442695, %v2756_v55  ;;  %v2856_v18 = vpop.f32.mrf.mxu3  ;;  %v3640_v55 = vld [vmem:[%s4687_s6 + $0x30] sm:$0xff] }
0x187f   : > { %v2857_v19 = vadd.f32 %v4505_v3, %v2856_v18 }
0x1880   : > { %3621 = vpow2.f32 %v2757_v0  ;;  %v3477_v0 = vpack.i.bf16 %v3640_v55, %v3639_v46 }
0x1881   : > { %v2859_v45 = vsel %vm652_vm7, %v2857_v19, -inf }
0x1882   : > { %2860 = vmax.xlane.f32.xlu1 %v2859_v45  ;;  %3478 = vrot.lane.b32.xlu0 %v3477_v0, %s4741_s3 }
0x1886   : > { %v3622_v50 = vpop.eup %3621 }
0x1887   : > { %v2759_v44 = vsel %vm652_vm7, %v3622_v50, 0.0 }
0x1888   : > { %2760 = vadd.xlane.f32.xlu2 %v2759_v44  ;;  %v2695_v2 = vpop.f32.mrf.mxu0  ;;  %v3642_v44 = vld [vmem:[%s4687_s6 + $0x20] sm:$0xff] }
0x1889   : > { %v2723_v34 = vadd.f32 %v4542_v11, %v2695_v2  ;;  %v2969_v11 = vld [vmem:[%s4686_s5 + $0x30] sm:$0xff] }
0x18a0   : > { %2777 = vrot.lane.b32.xlu2 %v4516_v22, %s4746_s22 }
0x18f5   : > { %v2861_v57 = vpop.xlane.xlu1 %2860 }
0x18f6   : > { %v2862_v51 = vsub.f32 %v2857_v19, %v2861_v57 }
0x18f8   : > { %v2863_v25 = vmul.f32 1.442695, %v2862_v51 }
0x18fa   : > { %3623 = vpow2.f32 %v2863_v25  ;;  %v3643_v25 = vld [vmem:[%s4687_s6 + $0x18] sm:$0xff] }
0x18fb   : > { %v2761_v41 = vpop.xlane.xlu2 %2760 }
0x18fc   : > { %3625 = vrcp.f32 %v2761_v41  ;;  %v2773_v59 = vand.u32 2147483648, %v2761_v41  ;;  %v2771_v23 = vand.u32 2147483647, %v2761_v41  ;;  %vm2767_vm10 = vweird.f32 %v2761_v41 }
0x18fe   : > { %v2774_v26 = vor.u32 1.1754944e-38, %v2773_v59  ;;  %vm2772_vm6 = vcmp.eq.f32.partialorder %v2771_v23, 8.507059e+37  ;;  %v3646_v59 = vld [vmem:[%s4687_s6] sm:$0xff] }
0x1900   : > { %v3624_v15 = vpop.eup %3623 }
0x1901   : > { %v2865_v3 = vsel %vm652_vm7, %v3624_v15, 0.0 }
0x1902   : > { %v3626_v48 = vpop.eup %3625  ;;  %2866 = vadd.xlane.f32.xlu1 %v2865_v3 }
0x1903   : > { %v2763_v39 = vmul.f32 %v3626_v48, %v2761_v41  ;;  %v2778_v52 = vpop.permute.xlu2 %2777  ;;  %vm2768_vm11 = vweird.f32 %v3626_v48  ;;  %v3644_v41 = vld [vmem:[%s4687_s6 + $0x10] sm:$0xff] }
0x1904   : > { %2798 = vmatpush.msrb.mxu1 %v2778_v52  ;;  %vm2769_vm5 = vmor %vm2767_vm10, %vm2768_vm11 }
0x1905   : > { %v2764_v38 = vsub.f32 1.0, %v2763_v39 }
0x1906   : > { %2931 = vmatpush.msra.mxu1 %v3476_v31  ;;  %v3479_v31 = vpop.permute.xlu0 %3478 }
0x1907   : > { %v2765_v36 = vmul.f32 %v3626_v48, %v2764_v38  ;;  %v3645_v38 = vld [vmem:[%s4687_s6 + $0x8] sm:$0xff]  ;;  %v3480_v21 = vunpack.i.l.bf16 %v3479_v31 }
0x1909   : > { %v2766_v24 = vadd.f32 %v3626_v48, %v2765_v36  ;;  %v3492_v36 = vpack.i.bf16 %v3646_v59, %v3645_v38  ;;  %3079 = vmatpush.msra.mxu3 %v3480_v21  ;;  %v3540_v59 = vld [vmem:[%s4690_s9 + $0x2c] ss:$0 sm:$0xff] }
0x190b   : > { %v2770_v27 = vsel %vm2769_vm5, %v3626_v48, %v2766_v24  ;;  %v3537_v24 = vld [vmem:[%s4690_s9 + $0x24] ss:$0 sm:$0xff] }
0x190c   : > { %v2775_v29 = vsel %vm2772_vm6, %v2774_v26, %v2770_v27  ;;  %vm3149_vm6 = vcmask 253952  }
0x190d   : > { %v2776_v60 = vmul.f32 %v3622_v50, %v2775_v29  ;;  %v3641_v50 = vld [vmem:[%s4687_s6 + $0x28] sm:$0xff]  ;;  %v3538_v29 = vld [vmem:[%s4690_s9 + $0x25] ss:$0 sm:$0xff] }
0x190e   : > { %v3482_v57 = vpack.i.bf16 %v3642_v44, %v3641_v50 }
0x190f   : > { %3348 = vmatmul.msk.f32.vlgmr.msrb.gmra.mxu1 %vm652_vm7, %v2776_v60 }
0x1910   : > { %3483 = vrot.lane.b32.xlu0 %v3482_v57, %s4741_s3 }
0x191b   : > { %2883 = vrot.lane.b32.xlu1 %v4516_v22, %s4747_s25 }
0x1975   : > { %v2867_v33 = vpop.xlane.xlu1 %2866 }
0x1976   : > { %3627 = vrcp.f32 %v2867_v33  ;;  %v2879_v49 = vand.u32 2147483648, %v2867_v33  ;;  %vm2873_vm14 = vweird.f32 %v2867_v33  ;;  %v2877_v56 = vand.u32 2147483647, %v2867_v33 }
0x1978   : > { %v2880_v43 = vor.u32 1.1754944e-38, %v2879_v49  ;;  %vm2878_vm13 = vcmp.eq.f32.partialorder %v2877_v56, 8.507059e+37 }
0x197c   : > { %v3628_v35 = vpop.eup %3627 }
0x197d   : > { %v2869_v14 = vmul.f32 %v3628_v35, %v2867_v33  ;;  %vm2874_vm12 = vweird.f32 %v3628_v35  ;;  %v3481_v33 = vunpack.i.h.bf16 %v3479_v31 }
0x197e   : > { %vm2875_vm15 = vmor %vm2873_vm14, %vm2874_vm12 }
0x197f   : > { %v2870_v16 = vsub.f32 1.0, %v2869_v14  ;;  %3080 = vmatpush.msra.mxu3 %v3481_v33  ;;  %v3123_v33 = vld [vmem:[%s4686_s5 + $0xf8] sm:$0xff] }
0x1981   : > { %v2871_v47 = vmul.f32 %v3628_v35, %v2870_v16 }
0x1982   : > { %v3484_v14 = vpop.permute.xlu0 %3483 }
0x1983   : > { %v2872_v54 = vadd.f32 %v3628_v35, %v2871_v47  ;;  %v3485_v47 = vunpack.i.l.bf16 %v3484_v14  ;;  %v3486_v49 = vunpack.i.h.bf16 %v3484_v14  ;;  %v3120_v14 = vld [vmem:[%s4686_s5 + $0x38] sm:$0xff] }
0x1985   : > { %v2876_v58 = vsel %vm2875_vm15, %v3628_v35, %v2872_v54  ;;  %v3539_v35 = vld [vmem:[%s4691_s10 + $0x2] ss:$0 sm:$0xff]  ;;  %3081 = vmatpush.msra.mxu3 %v3485_v47 }
0x1986   : > { %v2881_v22 = vsel %vm2878_vm13, %v2880_v43, %v2876_v58 }
0x1987   : > { %v2882_v20 = vmul.f32 %v3624_v15, %v2881_v22  ;;  %v3487_v15 = vpack.i.bf16 %v3644_v41, %v3643_v25  ;;  %3082 = vmatpush.msra.mxu3 %v3486_v49 }
0x1989   : > { %3488 = vrot.lane.b32.xlu0 %v3487_v15, %s4741_s3 }
0x198c   : > { %v2800_v62 = vpop.f32.mrf.mxu1 }
0x198d   : > { %v2884_v1 = vpop.permute.xlu1 %2883  ;;  %3349 = vmatmul.msk.f32.vlgmr.msra.gmra.mxu0 %vm652_vm7, %v2800_v62 }
0x198e   : > { %2904 = vmatpush.msra.mxu2 %v2884_v1 }
0x198f   : > { %3352 = vmatmul.msk.f32.vlgmr.msra.gmra.mxu2 %vm652_vm7, %v2882_v20 }
0x1990   : > { %3140 = vmatpush.msrb.mxu2 %v3123_v33 }
0x1991   : > { %3493 = vrot.lane.b32.xlu0 %v3492_v36, %s4741_s3  ;;  %s424_s3 = scalar_lea.vmem [#allocation2], %s423_s8 }
0x1992   : > { %s3162_s19 = sshll.u32 %s424_s3, 4  ;;  %s3163_s19 = int_to_ptr.vmem [resolvable:$true] %s3162_s19 }
0x19fb   : > { %v3489_v22 = vpop.permute.xlu0 %3488 }
0x19fc   : > { %v3490_v62 = vunpack.i.l.bf16 %v3489_v22 }
0x19fe   : > { %3083 = vmatpush.msra.mxu3 %v3490_v62 }
0x1a0a   : > { %v2827_v17 = vpop.f32.mrf.mxu0 }
0x1a0b   : > { %v2830_v6 = vadd.f32 %v2827_v17, %v2723_v34 }
0x1a12   : > { %v2906_v61 = vpop.f32.mrf.mxu2 }
0x1a13   : > { %3353 = vmatmul.msk.f32.vlgmr.msra.gmra.mxu1 %vm652_vm7, %v2906_v61  ;;  %v3491_v61 = vunpack.i.h.bf16 %v3489_v22 }
0x1a15   : > { %3084 = vmatpush.msra.mxu3 %v3491_v61 }
0x1a90   : > { %v2933_v28 = vpop.f32.mrf.mxu1 }
0x1a91   : > { %v2936_v32 = vadd.f32 %v2933_v28, %v2830_v6  ;;  %v3494_v28 = vpop.permute.xlu0 %3493 }
0x1a93   : > { %v2939_v30 = vadd.f32 %v3536_v4, %v2936_v32 }
0x1a95   : > { %v2940_v5 = vadd.f32 %v2939_v30, %v4489_v53  ;;  %v2971_v53 = vld [vmem:[%s4686_s5 + $0xb0] sm:$0xff]  ;;  %v3495_v30 = vunpack.i.l.bf16 %v3494_v28 }
0x1a96   : > { %2991 = vmatpush.msrb.mxu0 %v2971_v53 }
0x1a97   : > { %v2943_v40 = vsel %vm446_vm0, %v2940_v5, 0.0  ;;  %3085 = vmatpush.msra.mxu3 %v3495_v30 }
0x1a98   : > { %2944 = vadd.xlane.f32.xlu1 %v2943_v40  ;;  %2992 = vmatpush.msrb.mxu0 %v2970_v13  ;;  %v3496_v40 = vunpack.i.h.bf16 %v3494_v28 }
0x1a9a   : > { %2993 = vmatpush.msrb.mxu0 %v2969_v11  ;;  %3086 = vmatpush.msra.mxu3 %v3496_v40 }
0x1b0b   : > { %v2945_v63 = vpop.xlane.xlu1 %2944 }
0x1b0c   : > { %v2946_v37 = vmul.f32 %v2945_v63, %v3853_v8 }
0x1b0e   : > { %v2947_v12 = vsub.f32 %v2940_v5, %v2946_v37 }
0x1b10   : > { %v2948_v7 = vmul.f32 %v2947_v12, %v2947_v12 }
0x1b12   : > { %v2949_v9 = vsel %vm446_vm0, %v2948_v7, 0.0 }
0x1b13   : > { %2950 = vadd.xlane.f32.xlu2 %v2949_v9 }
0x1b86   : > { %v2951_v18 = vpop.xlane.xlu2 %2950 }
0x1b87   : > { %v2952_v19 = vmul.f32 %v2951_v18, %v3853_v8 }
0x1b89   : > { %v2953_v45 = vadd.f32 1e-12, %v2952_v19 }
0x1b8b   : > { %3629 = vrsqrt.f32 %v2953_v45  ;;  %vm2960_vm1 = vweird.f32 %v2953_v45 }
0x1b91   : > { %v3630_v51 = vpop.eup %3629 }
0x1b92   : > { %v2955_v3 = vmul.f32 %v3630_v51, %v2953_v45  ;;  %vm2961_vm7 = vweird.f32 %v3630_v51 }
0x1b93   : > { %vm2962_vm2 = vmor %vm2960_vm1, %vm2961_vm7 }
0x1b94   : > { %v2956_v48 = vmul.f32 %v3630_v51, %v2955_v3 }
0x1b96   : > { %v2957_v39 = vmul.f32 0.5, %v2956_v48 }
0x1b98   : > { %v2958_v52 = vsub.f32 1.5, %v2957_v39 }
0x1b9a   : > { %v2959_v23 = vmul.f32 %v3630_v51, %v2958_v52 }
0x1b9c   : > { %v2963_v26 = vsel %vm2962_vm2, %v3630_v51, %v2959_v23 }
0x1b9d   : > { %v2964_v27 = vmul.f32 %v2963_v26, %v2947_v12 }
0x1b9f   : > { %v2966_v60 = vmul.f32 %v3537_v24, %v2964_v27 }
0x1ba1   : > { %v4611_v42 = vadd.f32 %v3538_v29, %v2966_v60 }
0x1ba3   : > { %3354 = vmatmul.msk.f32.vlgmr.msrb.gmra.mxu0 %vm446_vm0, %v4611_v42 }
0x1c20   : > { %v2995_v16 = vpop.f32.mrf.mxu0 }
0x1c21   : > { %v2996_v54 = vadd.f32 %v3539_v35, %v2995_v16  ;;  %v3121_v35 = vld [vmem:[%s4686_s5 + $0x78] sm:$0xff] }
0x1c23   : > { %v2999_v56 = vmul.f32 0.70710677, %v2996_v54  ;;  %v2998_v39 = vmul.f32 0.5, %v2996_v54 }
0x1c25   : > { %v3000_v58 = vmul.f32 %v2999_v56, %v2999_v56 }
0x1c27   : > { %v3001_v43 = vmin.f32 %v3000_v58, 16.0 }
0x1c29   : > { %v3002_v1 = vmul.f32 2.1237322e-06, %v3001_v43  ;;  %v3013_v20 = vmul.f32 3.8918573e-05, %v3001_v43 }
0x1c2b   : > { %v3003_v2 = vadd.f32 0.00028619796, %v3002_v1  ;;  %v3014_v17 = vadd.f32 0.001143296, %v3013_v20  ;;  %v3541_v1 = vld [vmem:[%s4690_s9 + $0x2d] ss:$0 sm:$0xff] }
0x1c2d   : > { %v3004_v34 = vmul.f32 %v3003_v2, %v3001_v43  ;;  %v3015_v6 = vmul.f32 %v3014_v17, %v3001_v43 }
0x1c2f   : > { %v3016_v4 = vadd.f32 0.014752088, %v3015_v6  ;;  %v3005_v32 = vadd.f32 0.0036580483, %v3004_v34  ;;  %v3124_v34 = vld [vmem:[%s4690_s9 + $0x32] sm:$0x1] }
0x1c31   : > { %v3017_v5 = vmul.f32 %v3016_v4, %v3001_v43  ;;  %v3006_v37 = vmul.f32 %v3005_v32, %v3001_v43 }
0x1c33   : > { %v3018_v63 = vadd.f32 0.112945676, %v3017_v5  ;;  %v3007_v9 = vadd.f32 0.05243302, %v3006_v37 }
0x1c35   : > { %v3019_v12 = vmul.f32 %v3018_v63, %v3001_v43  ;;  %v3008_v13 = vmul.f32 %v3007_v9, %v3001_v43 }
0x1c37   : > { %v3020_v7 = vadd.f32 0.4994258, %v3019_v12  ;;  %v3009_v11 = vadd.f32 0.18741608, %v3008_v13 }
0x1c39   : > { %v3021_v10 = vmul.f32 %v3020_v7, %v3001_v43  ;;  %v3010_v55 = vmul.f32 %v3009_v11, %v3001_v43 }
0x1c3b   : > { %v3022_v53 = vadd.f32 1.0, %v3021_v10  ;;  %v3011_v45 = vadd.f32 1.1283791, %v3010_v55 }
0x1c3d   : > { %3631 = vrcp.f32 %v3022_v53  ;;  %v3034_v19 = vand.u32 2147483648, %v3022_v53  ;;  %v3032_v44 = vand.u32 2147483647, %v3022_v53  ;;  %vm3028_vm4 = vweird.f32 %v3022_v53 }
0x1c3e   : > { %v3012_v25 = vmul.f32 %v3011_v45, %v2999_v56 }
0x1c3f   : > { %v3035_v51 = vor.u32 1.1754944e-38, %v3034_v19  ;;  %vm3033_vm11 = vcmp.eq.f32.partialorder %v3032_v44, 8.507059e+37 }
0x1c43   : > { %v3632_v46 = vpop.eup %3631 }
0x1c44   : > { %v3024_v0 = vmul.f32 %v3632_v46, %v3022_v53  ;;  %vm3029_vm3 = vweird.f32 %v3632_v46 }
0x1c45   : > { %vm3030_vm8 = vmor %vm3028_vm4, %vm3029_vm3 }
0x1c46   : > { %v3025_v18 = vsub.f32 1.0, %v3024_v0 }
0x1c48   : > { %v3026_v50 = vmul.f32 %v3632_v46, %v3025_v18 }
0x1c4a   : > { %v3027_v57 = vadd.f32 %v3632_v46, %v3026_v50 }
0x1c4c   : > { %v3031_v41 = vsel %vm3030_vm8, %v3632_v46, %v3027_v57 }
0x1c4d   : > { %v3036_v15 = vsel %vm3033_vm11, %v3035_v51, %v3031_v41 }
0x1c4e   : > { %v3037_v3 = vmul.f32 %v3036_v15, %v3012_v25 }
0x1c50   : > { %v3355_v48 = vclamps-f32 %v3037_v3, 1.0 }
0x1c52   : > { %v3040_v52 = vadd.f32 1.0, %v3355_v48 }
0x1c54   : > { %v3041_v38 = vmul.f32 %v3040_v52, %v2998_v39 }
0x1c56   : > { %3356 = vmatmul.msk.f32.vlgmr.msra.gmra.mxu3 %vm1188_vm9, %v3041_v38 }
0x1cd9   : > { %v3088_v36 = vpop.f32.mrf.mxu3 }
0x1cda   : > { %v3089_v23 = vadd.f32 %v3540_v59, %v3088_v36 }
0x1cdc   : > { %v3091_v24 = vadd.f32 %v3089_v23, %v4611_v42  ;;  %v3122_v42 = vld [vmem:[%s4686_s5 + $0xb8] sm:$0xff] }
0x1cdd   : > { %3141 = vmatpush.msrb.mxu2 %v3122_v42 }
0x1cde   : > { %v3094_v26 = vsel %vm446_vm0, %v3091_v24, 0.0 }
0x1cdf   : > { %3095 = vadd.xlane.f32.xlu0 %v3094_v26  ;;  %3142 = vmatpush.msrb.mxu2 %v3121_v35 }
0x1ce1   : > { %3143 = vmatpush.msrb.mxu2 %v3120_v14 }
0x1d52   : > { %v3096_v27 = vpop.xlane.xlu0 %3095 }
0x1d53   : > { %v3097_v29 = vmul.f32 %v3096_v27, %v3853_v8 }
0x1d55   : > { %v3098_v60 = vsub.f32 %v3091_v24, %v3097_v29 }
0x1d57   : > { %v3099_v31 = vmul.f32 %v3098_v60, %v3098_v60 }
0x1d59   : > { %v3100_v21 = vsel %vm446_vm0, %v3099_v31, 0.0 }
0x1d5a   : > { %3101 = vadd.xlane.f32.xlu2 %v3100_v21 }
0x1dcd   : > { %v3102_v16 = vpop.xlane.xlu2 %3101 }
0x1dce   : > { %v3103_v47 = vmul.f32 %v3102_v16, %v3853_v8  ;;  %v3542_v8 = vld [vmem:[%s4690_s9 + $0x2e] ss:$0 sm:$0xff] }
0x1dd0   : > { %v3104_v54 = vadd.f32 1e-12, %v3103_v47 }
0x1dd2   : > { %3633 = vrsqrt.f32 %v3104_v54  ;;  %vm3111_vm10 = vweird.f32 %v3104_v54 }
0x1dd8   : > { %v3634_v49 = vpop.eup %3633 }
0x1dd9   : > { %v3106_v56 = vmul.f32 %v3634_v49, %v3104_v54  ;;  %vm3112_vm9 = vweird.f32 %v3634_v49 }
0x1dda   : > { %vm3113_vm5 = vmor %vm3111_vm10, %vm3112_vm9 }
0x1ddb   : > { %v3107_v58 = vmul.f32 %v3634_v49, %v3106_v56 }
0x1ddd   : > { %v3108_v43 = vmul.f32 0.5, %v3107_v58 }
0x1ddf   : > { %v3109_v22 = vsub.f32 1.5, %v3108_v43 }
0x1de1   : > { %v3110_v62 = vmul.f32 %v3634_v49, %v3109_v22 }
0x1de3   : > { %v3114_v20 = vsel %vm3113_vm5, %v3634_v49, %v3110_v62 }
0x1de4   : > { %v3115_v61 = vmul.f32 %v3114_v20, %v3098_v60 }
0x1de6   : > { %v3117_v2 = vmul.f32 %v3541_v1, %v3115_v61 }
0x1de8   : > { %v3119_v17 = vadd.f32 %v3542_v8, %v3117_v2 }
0x1dea   : > { %3357 = vmatmul.msk.f32.vlgmr.msrb.gmra.mxu2 %vm446_vm0, %v3119_v17 }
0x1e6d   : > { %v3145_v6 = vpop.f32.mrf.mxu2 }
0x1e6e   : > { %v3146_v4 = vadd.f32 %v3145_v6, %v3124_v34 }
0x1e70   : > { %3635 = vtanh.f32 %v3146_v4 }
0x1e76   : > { %v3636_v28 = vpop.eup %3635 }
0x1e77   : > { %3150 = vst.msk [vmem:[%s424_s3] sm:$0x1] %vm3149_vm6, %v3636_v28 }
0x1e78   : > { %3674 = shalt.err (!%p3671_p3)
}
0x1e79   : > { %3360 = dma.vmem_to_hbm [thread:$0]  (%p3822_p5), %s3163_s19, 16, %s3165_s23, %s3152_s24  }
0x1e7a PF: > { %p3366_p4 = scmp.ge.s32.totalorder %s3709_s20, 2  ;;  %s3176_s0 = sand.u32 1, %s3697_s17  }
0x1e7b   : > { %s3177_s2 = scalar_lea.sflag [#allocation3], %s3176_s0 }
0x1e7c   : > { %p3363_p7 = pnand %p3366_p4, %p3826_p6 }
0x1e7e   : > { %p3364_p8 = pneg %p3363_p7 }
0x1e80   : > { %3692 = dma.done.wait (%p3364_p8), %s3177_s2, 16  }
0x1e81   : > { %3694 = vsyncadd (%p3364_p8), %s3177_s2, 4294967280  ;;  %s4752_s20 = sld [smem:[#allocation6_spill]]  ;;  %s4755_s17 = smov %s3701_s18 }
0x1e82   : > { %s4753_s22 = sld [smem:[#allocation5_spill]] }
0x1e83   : > { %s4754_s19 = sld [smem:[#allocation7_spill]] }
0x1e87   : > { %p21_p9 = scmp.ge.s32.totalorder %s4752_s20, 4  }
0x1e88   : > { %s4756_s18 = smov %s4753_s22 }
0x1e89   :  { %23 = sbr.rel (!%p21_p9) target bundleno = 11 (0xb), region = 111 }
0x1e8e   :  { %3182 = vsyncpa [#allocation3], 1 }
0x1e8f   :  { %3184 = vsyncpa [#allocation3 + $0x1], 1 }

</bundles_post_ra>
